<compile_context>
chip_gen: v7x
topology: tpu7x:2x2x1
jax: 0.10.0
libtpu: 0.0.40
codegen_flags: <defaults>
</compile_context>

<pallas_src>
import functools

import numpy as np
import jax
import jax.numpy as jnp
from jax.experimental import pallas as pl
from jax.experimental.pallas import tpu as pltpu

DILATIONS = (6, 12, 18)
DMAX = max(DILATIONS)            # shared halo / pad width for all dilations


def assp3_kernel(xp_ref, w1_ref, w3_ref, wout_ref, pool_ref, bias_ref, out_ref,
                 *, tile_h, width):
    """Fused ASSP3 forward for one tile of `tile_h` output image-rows.

    xp_ref:   (N, H+2*DMAX, W+2*DMAX, Cin) f32  padded input, VMEM-resident
    w1_ref:   (Cin, C)          bf16  1x1 branch weight (BN scale folded in)
    w3_ref:   (3, 9, Cin, C)    bf16  dilated 3x3 tap weights (BN scale folded)
    wout_ref: (4*C, C)          bf16  output 1x1 weight over the 4 conv branches
                                      (output-BN scale folded in)
    pool_ref: (N, 1, C)         f32   rank-1 pooled-branch contribution
    bias_ref: (5, C)            f32   folded BN biases (branches 0..3, output)
    out_ref:  (N, tile_h*W, C)  f32   output tile
    """
    n, _, c = out_ref.shape
    cin = xp_ref.shape[-1]
    m = n * tile_h * width
    h0 = pl.multiple_of(pl.program_id(0) * tile_h, tile_h)

    bias = bias_ref[...]

    def mm(a, b):
        return jnp.dot(a, b, preferred_element_type=jnp.float32)

    def window(row_off, col_off):
        # Shifted (N, tile_h, W, Cin) view of the padded input, flattened so
        # every GEMM is a single 2-D dot (N folded into M), cast to bf16 for
        # the MXU (f32 accumulation via preferred_element_type).
        blk = xp_ref[:, pl.ds(h0 + row_off, tile_h), pl.ds(col_off, width), :]
        return blk.reshape(m, cin).astype(jnp.bfloat16)

    # Branch 0: 1x1 conv + (folded) BN bias + ReLU.
    branches = [jnp.maximum(mm(window(DMAX, DMAX), w1_ref[...]) + bias[0:1],
                            0.0)]

    # Branches 1..3: dilated 3x3 convs as 9 shifted GEMMs accumulated in f32.
    # Taps are built on-chip from the resident padded input (no HBM im2col).
    for d_idx, dil in enumerate(DILATIONS):
        acc = jnp.zeros((m, c), jnp.float32)
        for kh in range(3):
            for kw in range(3):
                acc = acc + mm(window((kh - 1) * dil + DMAX,
                                      (kw - 1) * dil + DMAX),
                               w3_ref[d_idx, kh * 3 + kw])
        branches.append(jnp.maximum(acc + bias[1 + d_idx:2 + d_idx], 0.0))

    # Output 1x1 conv: one K=4C GEMM over the concatenated branch activations,
    # plus the rank-1 pooled contribution (identical for every pixel, added
    # broadcast instead of a full (M, Cin) GEMM), plus output-BN bias + ReLU.
    cat = jnp.concatenate([b.astype(jnp.bfloat16) for b in branches], axis=-1)
    out = mm(cat, wout_ref[...])                            # (M, C) f32
    out = out.reshape(n, tile_h * width, c) + pool_ref[...] + bias[4:5]
    out_ref[...] = jnp.maximum(out, 0.0).astype(out_ref.dtype)


def _fold_bn(gamma, beta, mean, var, eps=1e-5):
    s = gamma / jnp.sqrt(var + eps)
    return s, beta - mean * s


def _pick_tile_h(n, h, w, target_rows=1024):
    # Biggest divisor of H whose GEMM-row count (N*tile_h*W) stays <= target
    # (amortizes the ~0.35us per-grid-step overhead without blowing VMEM).
    best = 1
    for cand in range(1, h + 1):
        if h % cand == 0 and n * cand * w <= target_rows:
            best = cand
    return best


def assp3_pallas(x_nchw, params, tile_h=None):
    x = jnp.transpose(x_nchw, (0, 2, 3, 1)).astype(jnp.float32)    # NHWC
    n, h, w, cin = x.shape
    c = params['w1'].shape[-1]

    scale, bias = _fold_bn(params['bn_gamma'], params['bn_beta'],
                           params['bn_mean'], params['bn_var'])

    # Fold BN scales into the conv weights (one-time wrapper work); bf16 MXU
    # operands, f32 elementwise.
    w1s = (params['w1'][0, 0] * scale[0][None, :]).astype(jnp.bfloat16)
    w3s = jnp.stack(
        [params['w3'][d].reshape(9, cin, c) * scale[1 + d][None, None, :]
         for d in range(len(DILATIONS))], axis=0).astype(jnp.bfloat16)
    wout = params['wout'][0, 0] * scale[4][None, :]                 # (4C+Cin, C)
    wout_b = wout[:4 * c].astype(jnp.bfloat16)                      # (4C, C)

    # Rank-1 pooled branch: pooled feature is constant over HW, so its
    # output-conv contribution is mean(x) @ wout_pool, computed once in f32.
    mean_x = jnp.mean(x.reshape(n, h * w, cin), axis=1)             # (N, Cin)
    pool = (mean_x @ wout[4 * c:]).reshape(n, 1, c)                 # (N, 1, C)

    # Single DMAX-halo padded input shared by every dilated branch.
    xp = jnp.pad(x, ((0, 0), (DMAX, DMAX), (DMAX, DMAX), (0, 0)))
    hp, wp = h + 2 * DMAX, w + 2 * DMAX

    if tile_h is None:
        tile_h = _pick_tile_h(n, h, w)
    assert h % tile_h == 0, (h, tile_h)
    grid = (h // tile_h,)

    kernel = functools.partial(assp3_kernel, tile_h=tile_h, width=w)
    out3 = pl.pallas_call(
        kernel,
        out_shape=jax.ShapeDtypeStruct((n, h * w, c), jnp.float32),
        grid=grid,
        in_specs=[
            # Padded input: constant block index -> DMA'd once, VMEM-resident.
            pl.BlockSpec((n, hp, wp, cin), lambda i: (0, 0, 0, 0)),
            pl.BlockSpec((cin, c), lambda i: (0, 0)),
            pl.BlockSpec((len(DILATIONS), 9, cin, c), lambda i: (0, 0, 0, 0)),
            pl.BlockSpec((4 * c, c), lambda i: (0, 0)),
            pl.BlockSpec((n, 1, c), lambda i: (0, 0, 0)),
            pl.BlockSpec((5, c), lambda i: (0, 0)),
        ],
        out_specs=pl.BlockSpec((n, tile_h * w, c), lambda i: (0, i, 0)),
        compiler_params=pltpu.CompilerParams(
            dimension_semantics=("parallel",),   # shard H-tiles across TCs
            vmem_limit_bytes=32 * 1024 * 1024),  # above v5e's 16MiB default
    )(xp, w1s, w3s, wout_b, pool, bias)

    return jnp.transpose(out3.reshape(n, h, w, c), (0, 3, 1, 2))    # NCHW


def assp3_reference(x_nchw, params):
    """Pure-JAX reference (lax convs), used for a correctness check."""
    x = jnp.transpose(x_nchw, (0, 2, 3, 1)).astype(jnp.float32)
    eps = 1e-5

    def conv(inp, k, dil, pad):
        return jax.lax.conv_general_dilated(
            inp, k, window_strides=(1, 1),
            padding=[(pad, pad), (pad, pad)],
            rhs_dilation=(dil, dil),
            dimension_numbers=('NHWC', 'HWIO', 'NHWC'),
            precision=jax.lax.Precision.HIGHEST)

    def bn_relu(y, i):
        g, b = params['bn_gamma'][i], params['bn_beta'][i]
        m, v = params['bn_mean'][i], params['bn_var'][i]
        return jnp.maximum((y - m) / jnp.sqrt(v + eps) * g + b, 0.0)

    outs = [bn_relu(conv(x, params['w1'], 1, 0), 0)]
    for i, d in enumerate(DILATIONS):
        outs.append(bn_relu(conv(x, params['w3'][i], d, d), 1 + i))
    outs.append(jnp.broadcast_to(jnp.mean(x, axis=(1, 2), keepdims=True),
                                 x.shape))
    cat = jnp.concatenate(outs, axis=-1)
    out = bn_relu(conv(cat, params['wout'], 1, 0), 4)
    return jnp.transpose(out, (0, 3, 1, 2))


if __name__ == "__main__":
    N, CIN, H, W = 2, 4, 16, 16
    CH = 32                                # "channels" (small synthetic size)
    FEAT = CH * (len(DILATIONS) + 1) + CIN

    key = jax.random.PRNGKey(0)
    k = jax.random.split(key, 8)
    params = {
        'w1': 0.10 * jax.random.normal(k[0], (1, 1, CIN, CH), jnp.float32),
        'w3': 0.05 * jax.random.normal(k[1], (3, 3, 3, CIN, CH), jnp.float32),
        'wout': 0.05 * jax.random.normal(k[2], (1, 1, FEAT, CH), jnp.float32),
        'bn_gamma': 1.0 + 0.1 * jax.random.normal(k[3], (5, CH), jnp.float32),
        'bn_beta': 0.1 * jax.random.normal(k[4], (5, CH), jnp.float32),
        'bn_mean': 0.1 * jax.random.normal(k[5], (5, CH), jnp.float32),
        'bn_var': 0.5 + jnp.abs(jax.random.normal(k[6], (5, CH), jnp.float32)),
    }
    x = jax.random.normal(k[7], (N, CIN, H, W), jnp.float32)

    # tile_h=4 -> 4 grid steps, exercising the H-tiled pipeline.
    out = jax.block_until_ready(assp3_pallas(x, params, tile_h=4))
    ref = jax.block_until_ready(assp3_reference(x, params))

    assert out.shape == (N, CH, H, W), out.shape
    # bf16 MXU operands with f32 accumulation -> slightly looser tolerance.
    np.testing.assert_allclose(np.asarray(out), np.asarray(ref),
                               rtol=2e-2, atol=2e-2)
    print("KERNEL_OK")
</pallas_src>

<mosaic_0001>
module attributes {stable_mosaic.version = 11 : i64} {
  func.func @assp3_kernel(%arg0: i32, %arg1: memref<2x52x52x4xf32, #tpu.memory_space<vmem>>, %arg2: memref<4x32xbf16, #tpu.memory_space<vmem>>, %arg3: memref<3x9x4x32xbf16, #tpu.memory_space<vmem>>, %arg4: memref<128x32xbf16, #tpu.memory_space<vmem>>, %arg5: memref<2x1x32xf32, #tpu.memory_space<vmem>>, %arg6: memref<5x32xf32, #tpu.memory_space<vmem>>, %arg7: memref<2x64x32xf32, #tpu.memory_space<vmem>>) attributes {dimension_semantics = [#tpu.dimension_semantics<parallel>], iteration_bounds = array<i64: 4>, scalar_prefetch = 0 : i64, scratch_operands = 0 : i64, tpu.core_type = #tpu.core_type<tc>, window_params = [{pipeline_mode = #tpu.pipeline_mode<synchronous>, transform_indices = @transform_0, window_bounds = array<i64: 2, 52, 52, 4>}, {pipeline_mode = #tpu.pipeline_mode<synchronous>, transform_indices = @transform_1, window_bounds = array<i64: 4, 32>}, {pipeline_mode = #tpu.pipeline_mode<synchronous>, transform_indices = @transform_2, window_bounds = array<i64: 3, 9, 4, 32>}, {pipeline_mode = #tpu.pipeline_mode<synchronous>, transform_indices = @transform_3, window_bounds = array<i64: 128, 32>}, {pipeline_mode = #tpu.pipeline_mode<synchronous>, transform_indices = @transform_4, window_bounds = array<i64: 2, 1, 32>}, {pipeline_mode = #tpu.pipeline_mode<synchronous>, transform_indices = @transform_5, window_bounds = array<i64: 5, 32>}, {transform_indices = @transform_6, window_bounds = array<i64: 2, 64, 32>}]} {
    %c4_i32 = arith.constant 4 : i32
    %0 = arith.muli %arg0, %c4_i32 : i32
    %1 = tpu.assume_multiple %0, 4 : i32
    %c0 = arith.constant 0 : index
    %c0_0 = arith.constant 0 : index
    %2 = vector.load %arg6[%c0, %c0_0] : memref<5x32xf32, #tpu.memory_space<vmem>>, vector<5x32xf32>
    %c18_i32 = arith.constant 18 : i32
    %3 = arith.addi %1, %c18_i32 : i32
    %c0_1 = arith.constant 0 : index
    %4 = arith.index_cast %3 : i32 to index
    %c18 = arith.constant 18 : index
    %c0_2 = arith.constant 0 : index
    %5 = vector.load %arg1[%c0_1, %4, %c18, %c0_2] : memref<2x52x52x4xf32, #tpu.memory_space<vmem>>, vector<2x4x16x4xf32>
    %6 = vector.shape_cast %5 : vector<2x4x16x4xf32> to vector<128x4xf32>
    %7 = arith.truncf %6 : vector<128x4xf32> to vector<128x4xbf16>
    %c0_3 = arith.constant 0 : index
    %c0_4 = arith.constant 0 : index
    %8 = vector.load %arg2[%c0_3, %c0_4] : memref<4x32xbf16, #tpu.memory_space<vmem>>, vector<4x32xbf16>
    %cst = arith.constant dense<0.000000e+00> : vector<128x32xf32>
    %9 = tpu.matmul %7, %8, %cst {dimension_numbers = #tpu.dot_dimension_numbers<[1], [0], [0], [1], [0, 0, 1, 1], [], []>} : vector<128x4xbf16>, vector<4x32xbf16>, vector<128x32xf32> -> vector<128x32xf32>
    %10 = vector.extract_strided_slice %2 {offsets = [0, 0], sizes = [1, 32], strides = [1, 1]} : vector<5x32xf32> to vector<1x32xf32>
    %11 = vector.broadcast %10 : vector<1x32xf32> to vector<128x32xf32>
    %12 = arith.addf %9, %11 : vector<128x32xf32>
    %cst_5 = arith.constant 0.000000e+00 : f32
    %13 = vector.broadcast %cst_5 : f32 to vector<128x32xf32>
    %14 = arith.maximumf %12, %13 : vector<128x32xf32>
    %cst_6 = arith.constant 0.000000e+00 : f32
    %15 = vector.broadcast %cst_6 : f32 to vector<128x32xf32>
    %c12_i32 = arith.constant 12 : i32
    %16 = arith.addi %1, %c12_i32 : i32
    %c0_7 = arith.constant 0 : index
    %17 = arith.index_cast %16 : i32 to index
    %c12 = arith.constant 12 : index
    %c0_8 = arith.constant 0 : index
    %18 = vector.load %arg1[%c0_7, %17, %c12, %c0_8] : memref<2x52x52x4xf32, #tpu.memory_space<vmem>>, vector<2x4x16x4xf32>
    %19 = vector.shape_cast %18 : vector<2x4x16x4xf32> to vector<128x4xf32>
    %20 = arith.truncf %19 : vector<128x4xf32> to vector<128x4xbf16>
    %c0_9 = arith.constant 0 : index
    %c0_10 = arith.constant 0 : index
    %c0_11 = arith.constant 0 : index
    %c0_12 = arith.constant 0 : index
    %21 = vector.load %arg3[%c0_9, %c0_10, %c0_11, %c0_12] : memref<3x9x4x32xbf16, #tpu.memory_space<vmem>>, vector<1x1x4x32xbf16>
    %22 = vector.shape_cast %21 : vector<1x1x4x32xbf16> to vector<4x32xbf16>
    %cst_13 = arith.constant dense<0.000000e+00> : vector<128x32xf32>
    %23 = tpu.matmul %20, %22, %cst_13 {dimension_numbers = #tpu.dot_dimension_numbers<[1], [0], [0], [1], [0, 0, 1, 1], [], []>} : vector<128x4xbf16>, vector<4x32xbf16>, vector<128x32xf32> -> vector<128x32xf32>
    %24 = arith.addf %15, %23 : vector<128x32xf32>
    %c12_i32_14 = arith.constant 12 : i32
    %25 = arith.addi %1, %c12_i32_14 : i32
    %c0_15 = arith.constant 0 : index
    %26 = arith.index_cast %25 : i32 to index
    %c18_16 = arith.constant 18 : index
    %c0_17 = arith.constant 0 : index
    %27 = vector.load %arg1[%c0_15, %26, %c18_16, %c0_17] : memref<2x52x52x4xf32, #tpu.memory_space<vmem>>, vector<2x4x16x4xf32>
    %28 = vector.shape_cast %27 : vector<2x4x16x4xf32> to vector<128x4xf32>
    %29 = arith.truncf %28 : vector<128x4xf32> to vector<128x4xbf16>
    %c0_18 = arith.constant 0 : index
    %c1 = arith.constant 1 : index
    %c0_19 = arith.constant 0 : index
    %c0_20 = arith.constant 0 : index
    %30 = vector.load %arg3[%c0_18, %c1, %c0_19, %c0_20] : memref<3x9x4x32xbf16, #tpu.memory_space<vmem>>, vector<1x1x4x32xbf16>
    %31 = vector.shape_cast %30 : vector<1x1x4x32xbf16> to vector<4x32xbf16>
    %cst_21 = arith.constant dense<0.000000e+00> : vector<128x32xf32>
    %32 = tpu.matmul %29, %31, %cst_21 {dimension_numbers = #tpu.dot_dimension_numbers<[1], [0], [0], [1], [0, 0, 1, 1], [], []>} : vector<128x4xbf16>, vector<4x32xbf16>, vector<128x32xf32> -> vector<128x32xf32>
    %33 = arith.addf %24, %32 : vector<128x32xf32>
    %c12_i32_22 = arith.constant 12 : i32
    %34 = arith.addi %1, %c12_i32_22 : i32
    %c0_23 = arith.constant 0 : index
    %35 = arith.index_cast %34 : i32 to index
    %c24 = arith.constant 24 : index
    %c0_24 = arith.constant 0 : index
    %36 = vector.load %arg1[%c0_23, %35, %c24, %c0_24] : memref<2x52x52x4xf32, #tpu.memory_space<vmem>>, vector<2x4x16x4xf32>
    %37 = vector.shape_cast %36 : vector<2x4x16x4xf32> to vector<128x4xf32>
    %38 = arith.truncf %37 : vector<128x4xf32> to vector<128x4xbf16>
    %c0_25 = arith.constant 0 : index
    %c2 = arith.constant 2 : index
    %c0_26 = arith.constant 0 : index
    %c0_27 = arith.constant 0 : index
    %39 = vector.load %arg3[%c0_25, %c2, %c0_26, %c0_27] : memref<3x9x4x32xbf16, #tpu.memory_space<vmem>>, vector<1x1x4x32xbf16>
    %40 = vector.shape_cast %39 : vector<1x1x4x32xbf16> to vector<4x32xbf16>
    %cst_28 = arith.constant dense<0.000000e+00> : vector<128x32xf32>
    %41 = tpu.matmul %38, %40, %cst_28 {dimension_numbers = #tpu.dot_dimension_numbers<[1], [0], [0], [1], [0, 0, 1, 1], [], []>} : vector<128x4xbf16>, vector<4x32xbf16>, vector<128x32xf32> -> vector<128x32xf32>
    %42 = arith.addf %33, %41 : vector<128x32xf32>
    %c18_i32_29 = arith.constant 18 : i32
    %43 = arith.addi %1, %c18_i32_29 : i32
    %c0_30 = arith.constant 0 : index
    %44 = arith.index_cast %43 : i32 to index
    %c12_31 = arith.constant 12 : index
    %c0_32 = arith.constant 0 : index
    %45 = vector.load %arg1[%c0_30, %44, %c12_31, %c0_32] : memref<2x52x52x4xf32, #tpu.memory_space<vmem>>, vector<2x4x16x4xf32>
    %46 = vector.shape_cast %45 : vector<2x4x16x4xf32> to vector<128x4xf32>
    %47 = arith.truncf %46 : vector<128x4xf32> to vector<128x4xbf16>
    %c0_33 = arith.constant 0 : index
    %c3 = arith.constant 3 : index
    %c0_34 = arith.constant 0 : index
    %c0_35 = arith.constant 0 : index
    %48 = vector.load %arg3[%c0_33, %c3, %c0_34, %c0_35] : memref<3x9x4x32xbf16, #tpu.memory_space<vmem>>, vector<1x1x4x32xbf16>
    %49 = vector.shape_cast %48 : vector<1x1x4x32xbf16> to vector<4x32xbf16>
    %cst_36 = arith.constant dense<0.000000e+00> : vector<128x32xf32>
    %50 = tpu.matmul %47, %49, %cst_36 {dimension_numbers = #tpu.dot_dimension_numbers<[1], [0], [0], [1], [0, 0, 1, 1], [], []>} : vector<128x4xbf16>, vector<4x32xbf16>, vector<128x32xf32> -> vector<128x32xf32>
    %51 = arith.addf %42, %50 : vector<128x32xf32>
    %c18_i32_37 = arith.constant 18 : i32
    %52 = arith.addi %1, %c18_i32_37 : i32
    %c0_38 = arith.constant 0 : index
    %53 = arith.index_cast %52 : i32 to index
    %c18_39 = arith.constant 18 : index
    %c0_40 = arith.constant 0 : index
    %54 = vector.load %arg1[%c0_38, %53, %c18_39, %c0_40] : memref<2x52x52x4xf32, #tpu.memory_space<vmem>>, vector<2x4x16x4xf32>
    %55 = vector.shape_cast %54 : vector<2x4x16x4xf32> to vector<128x4xf32>
    %56 = arith.truncf %55 : vector<128x4xf32> to vector<128x4xbf16>
    %c0_41 = arith.constant 0 : index
    %c4 = arith.constant 4 : index
    %c0_42 = arith.constant 0 : index
    %c0_43 = arith.constant 0 : index
    %57 = vector.load %arg3[%c0_41, %c4, %c0_42, %c0_43] : memref<3x9x4x32xbf16, #tpu.memory_space<vmem>>, vector<1x1x4x32xbf16>
    %58 = vector.shape_cast %57 : vector<1x1x4x32xbf16> to vector<4x32xbf16>
    %cst_44 = arith.constant dense<0.000000e+00> : vector<128x32xf32>
    %59 = tpu.matmul %56, %58, %cst_44 {dimension_numbers = #tpu.dot_dimension_numbers<[1], [0], [0], [1], [0, 0, 1, 1], [], []>} : vector<128x4xbf16>, vector<4x32xbf16>, vector<128x32xf32> -> vector<128x32xf32>
    %60 = arith.addf %51, %59 : vector<128x32xf32>
    %c18_i32_45 = arith.constant 18 : i32
    %61 = arith.addi %1, %c18_i32_45 : i32
    %c0_46 = arith.constant 0 : index
    %62 = arith.index_cast %61 : i32 to index
    %c24_47 = arith.constant 24 : index
    %c0_48 = arith.constant 0 : index
    %63 = vector.load %arg1[%c0_46, %62, %c24_47, %c0_48] : memref<2x52x52x4xf32, #tpu.memory_space<vmem>>, vector<2x4x16x4xf32>
    %64 = vector.shape_cast %63 : vector<2x4x16x4xf32> to vector<128x4xf32>
    %65 = arith.truncf %64 : vector<128x4xf32> to vector<128x4xbf16>
    %c0_49 = arith.constant 0 : index
    %c5 = arith.constant 5 : index
    %c0_50 = arith.constant 0 : index
    %c0_51 = arith.constant 0 : index
    %66 = vector.load %arg3[%c0_49, %c5, %c0_50, %c0_51] : memref<3x9x4x32xbf16, #tpu.memory_space<vmem>>, vector<1x1x4x32xbf16>
    %67 = vector.shape_cast %66 : vector<1x1x4x32xbf16> to vector<4x32xbf16>
    %cst_52 = arith.constant dense<0.000000e+00> : vector<128x32xf32>
    %68 = tpu.matmul %65, %67, %cst_52 {dimension_numbers = #tpu.dot_dimension_numbers<[1], [0], [0], [1], [0, 0, 1, 1], [], []>} : vector<128x4xbf16>, vector<4x32xbf16>, vector<128x32xf32> -> vector<128x32xf32>
    %69 = arith.addf %60, %68 : vector<128x32xf32>
    %c24_i32 = arith.constant 24 : i32
    %70 = arith.addi %1, %c24_i32 : i32
    %c0_53 = arith.constant 0 : index
    %71 = arith.index_cast %70 : i32 to index
    %c12_54 = arith.constant 12 : index
    %c0_55 = arith.constant 0 : index
    %72 = vector.load %arg1[%c0_53, %71, %c12_54, %c0_55] : memref<2x52x52x4xf32, #tpu.memory_space<vmem>>, vector<2x4x16x4xf32>
    %73 = vector.shape_cast %72 : vector<2x4x16x4xf32> to vector<128x4xf32>
    %74 = arith.truncf %73 : vector<128x4xf32> to vector<128x4xbf16>
    %c0_56 = arith.constant 0 : index
    %c6 = arith.constant 6 : index
    %c0_57 = arith.constant 0 : index
    %c0_58 = arith.constant 0 : index
    %75 = vector.load %arg3[%c0_56, %c6, %c0_57, %c0_58] : memref<3x9x4x32xbf16, #tpu.memory_space<vmem>>, vector<1x1x4x32xbf16>
    %76 = vector.shape_cast %75 : vector<1x1x4x32xbf16> to vector<4x32xbf16>
    %cst_59 = arith.constant dense<0.000000e+00> : vector<128x32xf32>
    %77 = tpu.matmul %74, %76, %cst_59 {dimension_numbers = #tpu.dot_dimension_numbers<[1], [0], [0], [1], [0, 0, 1, 1], [], []>} : vector<128x4xbf16>, vector<4x32xbf16>, vector<128x32xf32> -> vector<128x32xf32>
    %78 = arith.addf %69, %77 : vector<128x32xf32>
    %c24_i32_60 = arith.constant 24 : i32
    %79 = arith.addi %1, %c24_i32_60 : i32
    %c0_61 = arith.constant 0 : index
    %80 = arith.index_cast %79 : i32 to index
    %c18_62 = arith.constant 18 : index
    %c0_63 = arith.constant 0 : index
    %81 = vector.load %arg1[%c0_61, %80, %c18_62, %c0_63] : memref<2x52x52x4xf32, #tpu.memory_space<vmem>>, vector<2x4x16x4xf32>
    %82 = vector.shape_cast %81 : vector<2x4x16x4xf32> to vector<128x4xf32>
    %83 = arith.truncf %82 : vector<128x4xf32> to vector<128x4xbf16>
    %c0_64 = arith.constant 0 : index
    %c7 = arith.constant 7 : index
    %c0_65 = arith.constant 0 : index
    %c0_66 = arith.constant 0 : index
    %84 = vector.load %arg3[%c0_64, %c7, %c0_65, %c0_66] : memref<3x9x4x32xbf16, #tpu.memory_space<vmem>>, vector<1x1x4x32xbf16>
    %85 = vector.shape_cast %84 : vector<1x1x4x32xbf16> to vector<4x32xbf16>
    %cst_67 = arith.constant dense<0.000000e+00> : vector<128x32xf32>
    %86 = tpu.matmul %83, %85, %cst_67 {dimension_numbers = #tpu.dot_dimension_numbers<[1], [0], [0], [1], [0, 0, 1, 1], [], []>} : vector<128x4xbf16>, vector<4x32xbf16>, vector<128x32xf32> -> vector<128x32xf32>
    %87 = arith.addf %78, %86 : vector<128x32xf32>
    %c24_i32_68 = arith.constant 24 : i32
    %88 = arith.addi %1, %c24_i32_68 : i32
    %c0_69 = arith.constant 0 : index
    %89 = arith.index_cast %88 : i32 to index
    %c24_70 = arith.constant 24 : index
    %c0_71 = arith.constant 0 : index
    %90 = vector.load %arg1[%c0_69, %89, %c24_70, %c0_71] : memref<2x52x52x4xf32, #tpu.memory_space<vmem>>, vector<2x4x16x4xf32>
    %91 = vector.shape_cast %90 : vector<2x4x16x4xf32> to vector<128x4xf32>
    %92 = arith.truncf %91 : vector<128x4xf32> to vector<128x4xbf16>
    %c0_72 = arith.constant 0 : index
    %c8 = arith.constant 8 : index
    %c0_73 = arith.constant 0 : index
    %c0_74 = arith.constant 0 : index
    %93 = vector.load %arg3[%c0_72, %c8, %c0_73, %c0_74] : memref<3x9x4x32xbf16, #tpu.memory_space<vmem>>, vector<1x1x4x32xbf16>
    %94 = vector.shape_cast %93 : vector<1x1x4x32xbf16> to vector<4x32xbf16>
    %cst_75 = arith.constant dense<0.000000e+00> : vector<128x32xf32>
    %95 = tpu.matmul %92, %94, %cst_75 {dimension_numbers = #tpu.dot_dimension_numbers<[1], [0], [0], [1], [0, 0, 1, 1], [], []>} : vector<128x4xbf16>, vector<4x32xbf16>, vector<128x32xf32> -> vector<128x32xf32>
    %96 = arith.addf %87, %95 : vector<128x32xf32>
    %97 = vector.extract_strided_slice %2 {offsets = [1, 0], sizes = [1, 32], strides = [1, 1]} : vector<5x32xf32> to vector<1x32xf32>
    %98 = vector.broadcast %97 : vector<1x32xf32> to vector<128x32xf32>
    %99 = arith.addf %96, %98 : vector<128x32xf32>
    %cst_76 = arith.constant 0.000000e+00 : f32
    %100 = vector.broadcast %cst_76 : f32 to vector<128x32xf32>
    %101 = arith.maximumf %99, %100 : vector<128x32xf32>
    %cst_77 = arith.constant 0.000000e+00 : f32
    %102 = vector.broadcast %cst_77 : f32 to vector<128x32xf32>
    %c6_i32 = arith.constant 6 : i32
    %103 = arith.addi %1, %c6_i32 : i32
    %c0_78 = arith.constant 0 : index
    %104 = arith.index_cast %103 : i32 to index
    %c6_79 = arith.constant 6 : index
    %c0_80 = arith.constant 0 : index
    %105 = vector.load %arg1[%c0_78, %104, %c6_79, %c0_80] : memref<2x52x52x4xf32, #tpu.memory_space<vmem>>, vector<2x4x16x4xf32>
    %106 = vector.shape_cast %105 : vector<2x4x16x4xf32> to vector<128x4xf32>
    %107 = arith.truncf %106 : vector<128x4xf32> to vector<128x4xbf16>
    %c1_81 = arith.constant 1 : index
    %c0_82 = arith.constant 0 : index
    %c0_83 = arith.constant 0 : index
    %c0_84 = arith.constant 0 : index
    %108 = vector.load %arg3[%c1_81, %c0_82, %c0_83, %c0_84] : memref<3x9x4x32xbf16, #tpu.memory_space<vmem>>, vector<1x1x4x32xbf16>
    %109 = vector.shape_cast %108 : vector<1x1x4x32xbf16> to vector<4x32xbf16>
    %cst_85 = arith.constant dense<0.000000e+00> : vector<128x32xf32>
    %110 = tpu.matmul %107, %109, %cst_85 {dimension_numbers = #tpu.dot_dimension_numbers<[1], [0], [0], [1], [0, 0, 1, 1], [], []>} : vector<128x4xbf16>, vector<4x32xbf16>, vector<128x32xf32> -> vector<128x32xf32>
    %111 = arith.addf %102, %110 : vector<128x32xf32>
    %c6_i32_86 = arith.constant 6 : i32
    %112 = arith.addi %1, %c6_i32_86 : i32
    %c0_87 = arith.constant 0 : index
    %113 = arith.index_cast %112 : i32 to index
    %c18_88 = arith.constant 18 : index
    %c0_89 = arith.constant 0 : index
    %114 = vector.load %arg1[%c0_87, %113, %c18_88, %c0_89] : memref<2x52x52x4xf32, #tpu.memory_space<vmem>>, vector<2x4x16x4xf32>
    %115 = vector.shape_cast %114 : vector<2x4x16x4xf32> to vector<128x4xf32>
    %116 = arith.truncf %115 : vector<128x4xf32> to vector<128x4xbf16>
    %c1_90 = arith.constant 1 : index
    %c1_91 = arith.constant 1 : index
    %c0_92 = arith.constant 0 : index
    %c0_93 = arith.constant 0 : index
    %117 = vector.load %arg3[%c1_90, %c1_91, %c0_92, %c0_93] : memref<3x9x4x32xbf16, #tpu.memory_space<vmem>>, vector<1x1x4x32xbf16>
    %118 = vector.shape_cast %117 : vector<1x1x4x32xbf16> to vector<4x32xbf16>
    %cst_94 = arith.constant dense<0.000000e+00> : vector<128x32xf32>
    %119 = tpu.matmul %116, %118, %cst_94 {dimension_numbers = #tpu.dot_dimension_numbers<[1], [0], [0], [1], [0, 0, 1, 1], [], []>} : vector<128x4xbf16>, vector<4x32xbf16>, vector<128x32xf32> -> vector<128x32xf32>
    %120 = arith.addf %111, %119 : vector<128x32xf32>
    %c6_i32_95 = arith.constant 6 : i32
    %121 = arith.addi %1, %c6_i32_95 : i32
    %c0_96 = arith.constant 0 : index
    %122 = arith.index_cast %121 : i32 to index
    %c30 = arith.constant 30 : index
    %c0_97 = arith.constant 0 : index
    %123 = vector.load %arg1[%c0_96, %122, %c30, %c0_97] : memref<2x52x52x4xf32, #tpu.memory_space<vmem>>, vector<2x4x16x4xf32>
    %124 = vector.shape_cast %123 : vector<2x4x16x4xf32> to vector<128x4xf32>
    %125 = arith.truncf %124 : vector<128x4xf32> to vector<128x4xbf16>
    %c1_98 = arith.constant 1 : index
    %c2_99 = arith.constant 2 : index
    %c0_100 = arith.constant 0 : index
    %c0_101 = arith.constant 0 : index
    %126 = vector.load %arg3[%c1_98, %c2_99, %c0_100, %c0_101] : memref<3x9x4x32xbf16, #tpu.memory_space<vmem>>, vector<1x1x4x32xbf16>
    %127 = vector.shape_cast %126 : vector<1x1x4x32xbf16> to vector<4x32xbf16>
    %cst_102 = arith.constant dense<0.000000e+00> : vector<128x32xf32>
    %128 = tpu.matmul %125, %127, %cst_102 {dimension_numbers = #tpu.dot_dimension_numbers<[1], [0], [0], [1], [0, 0, 1, 1], [], []>} : vector<128x4xbf16>, vector<4x32xbf16>, vector<128x32xf32> -> vector<128x32xf32>
    %129 = arith.addf %120, %128 : vector<128x32xf32>
    %c18_i32_103 = arith.constant 18 : i32
    %130 = arith.addi %1, %c18_i32_103 : i32
    %c0_104 = arith.constant 0 : index
    %131 = arith.index_cast %130 : i32 to index
    %c6_105 = arith.constant 6 : index
    %c0_106 = arith.constant 0 : index
    %132 = vector.load %arg1[%c0_104, %131, %c6_105, %c0_106] : memref<2x52x52x4xf32, #tpu.memory_space<vmem>>, vector<2x4x16x4xf32>
    %133 = vector.shape_cast %132 : vector<2x4x16x4xf32> to vector<128x4xf32>
    %134 = arith.truncf %133 : vector<128x4xf32> to vector<128x4xbf16>
    %c1_107 = arith.constant 1 : index
    %c3_108 = arith.constant 3 : index
    %c0_109 = arith.constant 0 : index
    %c0_110 = arith.constant 0 : index
    %135 = vector.load %arg3[%c1_107, %c3_108, %c0_109, %c0_110] : memref<3x9x4x32xbf16, #tpu.memory_space<vmem>>, vector<1x1x4x32xbf16>
    %136 = vector.shape_cast %135 : vector<1x1x4x32xbf16> to vector<4x32xbf16>
    %cst_111 = arith.constant dense<0.000000e+00> : vector<128x32xf32>
    %137 = tpu.matmul %134, %136, %cst_111 {dimension_numbers = #tpu.dot_dimension_numbers<[1], [0], [0], [1], [0, 0, 1, 1], [], []>} : vector<128x4xbf16>, vector<4x32xbf16>, vector<128x32xf32> -> vector<128x32xf32>
    %138 = arith.addf %129, %137 : vector<128x32xf32>
    %c18_i32_112 = arith.constant 18 : i32
    %139 = arith.addi %1, %c18_i32_112 : i32
    %c0_113 = arith.constant 0 : index
    %140 = arith.index_cast %139 : i32 to index
    %c18_114 = arith.constant 18 : index
    %c0_115 = arith.constant 0 : index
    %141 = vector.load %arg1[%c0_113, %140, %c18_114, %c0_115] : memref<2x52x52x4xf32, #tpu.memory_space<vmem>>, vector<2x4x16x4xf32>
    %142 = vector.shape_cast %141 : vector<2x4x16x4xf32> to vector<128x4xf32>
    %143 = arith.truncf %142 : vector<128x4xf32> to vector<128x4xbf16>
    %c1_116 = arith.constant 1 : index
    %c4_117 = arith.constant 4 : index
    %c0_118 = arith.constant 0 : index
    %c0_119 = arith.constant 0 : index
    %144 = vector.load %arg3[%c1_116, %c4_117, %c0_118, %c0_119] : memref<3x9x4x32xbf16, #tpu.memory_space<vmem>>, vector<1x1x4x32xbf16>
    %145 = vector.shape_cast %144 : vector<1x1x4x32xbf16> to vector<4x32xbf16>
    %cst_120 = arith.constant dense<0.000000e+00> : vector<128x32xf32>
    %146 = tpu.matmul %143, %145, %cst_120 {dimension_numbers = #tpu.dot_dimension_numbers<[1], [0], [0], [1], [0, 0, 1, 1], [], []>} : vector<128x4xbf16>, vector<4x32xbf16>, vector<128x32xf32> -> vector<128x32xf32>
    %147 = arith.addf %138, %146 : vector<128x32xf32>
    %c18_i32_121 = arith.constant 18 : i32
    %148 = arith.addi %1, %c18_i32_121 : i32
    %c0_122 = arith.constant 0 : index
    %149 = arith.index_cast %148 : i32 to index
    %c30_123 = arith.constant 30 : index
    %c0_124 = arith.constant 0 : index
    %150 = vector.load %arg1[%c0_122, %149, %c30_123, %c0_124] : memref<2x52x52x4xf32, #tpu.memory_space<vmem>>, vector<2x4x16x4xf32>
    %151 = vector.shape_cast %150 : vector<2x4x16x4xf32> to vector<128x4xf32>
    %152 = arith.truncf %151 : vector<128x4xf32> to vector<128x4xbf16>
    %c1_125 = arith.constant 1 : index
    %c5_126 = arith.constant 5 : index
    %c0_127 = arith.constant 0 : index
    %c0_128 = arith.constant 0 : index
    %153 = vector.load %arg3[%c1_125, %c5_126, %c0_127, %c0_128] : memref<3x9x4x32xbf16, #tpu.memory_space<vmem>>, vector<1x1x4x32xbf16>
    %154 = vector.shape_cast %153 : vector<1x1x4x32xbf16> to vector<4x32xbf16>
    %cst_129 = arith.constant dense<0.000000e+00> : vector<128x32xf32>
    %155 = tpu.matmul %152, %154, %cst_129 {dimension_numbers = #tpu.dot_dimension_numbers<[1], [0], [0], [1], [0, 0, 1, 1], [], []>} : vector<128x4xbf16>, vector<4x32xbf16>, vector<128x32xf32> -> vector<128x32xf32>
    %156 = arith.addf %147, %155 : vector<128x32xf32>
    %c30_i32 = arith.constant 30 : i32
    %157 = arith.addi %1, %c30_i32 : i32
    %c0_130 = arith.constant 0 : index
    %158 = arith.index_cast %157 : i32 to index
    %c6_131 = arith.constant 6 : index
    %c0_132 = arith.constant 0 : index
    %159 = vector.load %arg1[%c0_130, %158, %c6_131, %c0_132] : memref<2x52x52x4xf32, #tpu.memory_space<vmem>>, vector<2x4x16x4xf32>
    %160 = vector.shape_cast %159 : vector<2x4x16x4xf32> to vector<128x4xf32>
    %161 = arith.truncf %160 : vector<128x4xf32> to vector<128x4xbf16>
    %c1_133 = arith.constant 1 : index
    %c6_134 = arith.constant 6 : index
    %c0_135 = arith.constant 0 : index
    %c0_136 = arith.constant 0 : index
    %162 = vector.load %arg3[%c1_133, %c6_134, %c0_135, %c0_136] : memref<3x9x4x32xbf16, #tpu.memory_space<vmem>>, vector<1x1x4x32xbf16>
    %163 = vector.shape_cast %162 : vector<1x1x4x32xbf16> to vector<4x32xbf16>
    %cst_137 = arith.constant dense<0.000000e+00> : vector<128x32xf32>
    %164 = tpu.matmul %161, %163, %cst_137 {dimension_numbers = #tpu.dot_dimension_numbers<[1], [0], [0], [1], [0, 0, 1, 1], [], []>} : vector<128x4xbf16>, vector<4x32xbf16>, vector<128x32xf32> -> vector<128x32xf32>
    %165 = arith.addf %156, %164 : vector<128x32xf32>
    %c30_i32_138 = arith.constant 30 : i32
    %166 = arith.addi %1, %c30_i32_138 : i32
    %c0_139 = arith.constant 0 : index
    %167 = arith.index_cast %166 : i32 to index
    %c18_140 = arith.constant 18 : index
    %c0_141 = arith.constant 0 : index
    %168 = vector.load %arg1[%c0_139, %167, %c18_140, %c0_141] : memref<2x52x52x4xf32, #tpu.memory_space<vmem>>, vector<2x4x16x4xf32>
    %169 = vector.shape_cast %168 : vector<2x4x16x4xf32> to vector<128x4xf32>
    %170 = arith.truncf %169 : vector<128x4xf32> to vector<128x4xbf16>
    %c1_142 = arith.constant 1 : index
    %c7_143 = arith.constant 7 : index
    %c0_144 = arith.constant 0 : index
    %c0_145 = arith.constant 0 : index
    %171 = vector.load %arg3[%c1_142, %c7_143, %c0_144, %c0_145] : memref<3x9x4x32xbf16, #tpu.memory_space<vmem>>, vector<1x1x4x32xbf16>
    %172 = vector.shape_cast %171 : vector<1x1x4x32xbf16> to vector<4x32xbf16>
    %cst_146 = arith.constant dense<0.000000e+00> : vector<128x32xf32>
    %173 = tpu.matmul %170, %172, %cst_146 {dimension_numbers = #tpu.dot_dimension_numbers<[1], [0], [0], [1], [0, 0, 1, 1], [], []>} : vector<128x4xbf16>, vector<4x32xbf16>, vector<128x32xf32> -> vector<128x32xf32>
    %174 = arith.addf %165, %173 : vector<128x32xf32>
    %c30_i32_147 = arith.constant 30 : i32
    %175 = arith.addi %1, %c30_i32_147 : i32
    %c0_148 = arith.constant 0 : index
    %176 = arith.index_cast %175 : i32 to index
    %c30_149 = arith.constant 30 : index
    %c0_150 = arith.constant 0 : index
    %177 = vector.load %arg1[%c0_148, %176, %c30_149, %c0_150] : memref<2x52x52x4xf32, #tpu.memory_space<vmem>>, vector<2x4x16x4xf32>
    %178 = vector.shape_cast %177 : vector<2x4x16x4xf32> to vector<128x4xf32>
    %179 = arith.truncf %178 : vector<128x4xf32> to vector<128x4xbf16>
    %c1_151 = arith.constant 1 : index
    %c8_152 = arith.constant 8 : index
    %c0_153 = arith.constant 0 : index
    %c0_154 = arith.constant 0 : index
    %180 = vector.load %arg3[%c1_151, %c8_152, %c0_153, %c0_154] : memref<3x9x4x32xbf16, #tpu.memory_space<vmem>>, vector<1x1x4x32xbf16>
    %181 = vector.shape_cast %180 : vector<1x1x4x32xbf16> to vector<4x32xbf16>
    %cst_155 = arith.constant dense<0.000000e+00> : vector<128x32xf32>
    %182 = tpu.matmul %179, %181, %cst_155 {dimension_numbers = #tpu.dot_dimension_numbers<[1], [0], [0], [1], [0, 0, 1, 1], [], []>} : vector<128x4xbf16>, vector<4x32xbf16>, vector<128x32xf32> -> vector<128x32xf32>
    %183 = arith.addf %174, %182 : vector<128x32xf32>
    %184 = vector.extract_strided_slice %2 {offsets = [2, 0], sizes = [1, 32], strides = [1, 1]} : vector<5x32xf32> to vector<1x32xf32>
    %185 = vector.broadcast %184 : vector<1x32xf32> to vector<128x32xf32>
    %186 = arith.addf %183, %185 : vector<128x32xf32>
    %cst_156 = arith.constant 0.000000e+00 : f32
    %187 = vector.broadcast %cst_156 : f32 to vector<128x32xf32>
    %188 = arith.maximumf %186, %187 : vector<128x32xf32>
    %cst_157 = arith.constant 0.000000e+00 : f32
    %189 = vector.broadcast %cst_157 : f32 to vector<128x32xf32>
    %c0_i32 = arith.constant 0 : i32
    %190 = arith.addi %1, %c0_i32 : i32
    %c0_158 = arith.constant 0 : index
    %191 = arith.index_cast %190 : i32 to index
    %c0_159 = arith.constant 0 : index
    %c0_160 = arith.constant 0 : index
    %192 = vector.load %arg1[%c0_158, %191, %c0_159, %c0_160] : memref<2x52x52x4xf32, #tpu.memory_space<vmem>>, vector<2x4x16x4xf32>
    %193 = vector.shape_cast %192 : vector<2x4x16x4xf32> to vector<128x4xf32>
    %194 = arith.truncf %193 : vector<128x4xf32> to vector<128x4xbf16>
    %c2_161 = arith.constant 2 : index
    %c0_162 = arith.constant 0 : index
    %c0_163 = arith.constant 0 : index
    %c0_164 = arith.constant 0 : index
    %195 = vector.load %arg3[%c2_161, %c0_162, %c0_163, %c0_164] : memref<3x9x4x32xbf16, #tpu.memory_space<vmem>>, vector<1x1x4x32xbf16>
    %196 = vector.shape_cast %195 : vector<1x1x4x32xbf16> to vector<4x32xbf16>
    %cst_165 = arith.constant dense<0.000000e+00> : vector<128x32xf32>
    %197 = tpu.matmul %194, %196, %cst_165 {dimension_numbers = #tpu.dot_dimension_numbers<[1], [0], [0], [1], [0, 0, 1, 1], [], []>} : vector<128x4xbf16>, vector<4x32xbf16>, vector<128x32xf32> -> vector<128x32xf32>
    %198 = arith.addf %189, %197 : vector<128x32xf32>
    %c0_i32_166 = arith.constant 0 : i32
    %199 = arith.addi %1, %c0_i32_166 : i32
    %c0_167 = arith.constant 0 : index
    %200 = arith.index_cast %199 : i32 to index
    %c18_168 = arith.constant 18 : index
    %c0_169 = arith.constant 0 : index
    %201 = vector.load %arg1[%c0_167, %200, %c18_168, %c0_169] : memref<2x52x52x4xf32, #tpu.memory_space<vmem>>, vector<2x4x16x4xf32>
    %202 = vector.shape_cast %201 : vector<2x4x16x4xf32> to vector<128x4xf32>
    %203 = arith.truncf %202 : vector<128x4xf32> to vector<128x4xbf16>
    %c2_170 = arith.constant 2 : index
    %c1_171 = arith.constant 1 : index
    %c0_172 = arith.constant 0 : index
    %c0_173 = arith.constant 0 : index
    %204 = vector.load %arg3[%c2_170, %c1_171, %c0_172, %c0_173] : memref<3x9x4x32xbf16, #tpu.memory_space<vmem>>, vector<1x1x4x32xbf16>
    %205 = vector.shape_cast %204 : vector<1x1x4x32xbf16> to vector<4x32xbf16>
    %cst_174 = arith.constant dense<0.000000e+00> : vector<128x32xf32>
    %206 = tpu.matmul %203, %205, %cst_174 {dimension_numbers = #tpu.dot_dimension_numbers<[1], [0], [0], [1], [0, 0, 1, 1], [], []>} : vector<128x4xbf16>, vector<4x32xbf16>, vector<128x32xf32> -> vector<128x32xf32>
    %207 = arith.addf %198, %206 : vector<128x32xf32>
    %c0_i32_175 = arith.constant 0 : i32
    %208 = arith.addi %1, %c0_i32_175 : i32
    %c0_176 = arith.constant 0 : index
    %209 = arith.index_cast %208 : i32 to index
    %c36 = arith.constant 36 : index
    %c0_177 = arith.constant 0 : index
    %210 = vector.load %arg1[%c0_176, %209, %c36, %c0_177] : memref<2x52x52x4xf32, #tpu.memory_space<vmem>>, vector<2x4x16x4xf32>
    %211 = vector.shape_cast %210 : vector<2x4x16x4xf32> to vector<128x4xf32>
    %212 = arith.truncf %211 : vector<128x4xf32> to vector<128x4xbf16>
    %c2_178 = arith.constant 2 : index
    %c2_179 = arith.constant 2 : index
    %c0_180 = arith.constant 0 : index
    %c0_181 = arith.constant 0 : index
    %213 = vector.load %arg3[%c2_178, %c2_179, %c0_180, %c0_181] : memref<3x9x4x32xbf16, #tpu.memory_space<vmem>>, vector<1x1x4x32xbf16>
    %214 = vector.shape_cast %213 : vector<1x1x4x32xbf16> to vector<4x32xbf16>
    %cst_182 = arith.constant dense<0.000000e+00> : vector<128x32xf32>
    %215 = tpu.matmul %212, %214, %cst_182 {dimension_numbers = #tpu.dot_dimension_numbers<[1], [0], [0], [1], [0, 0, 1, 1], [], []>} : vector<128x4xbf16>, vector<4x32xbf16>, vector<128x32xf32> -> vector<128x32xf32>
    %216 = arith.addf %207, %215 : vector<128x32xf32>
    %c18_i32_183 = arith.constant 18 : i32
    %217 = arith.addi %1, %c18_i32_183 : i32
    %c0_184 = arith.constant 0 : index
    %218 = arith.index_cast %217 : i32 to index
    %c0_185 = arith.constant 0 : index
    %c0_186 = arith.constant 0 : index
    %219 = vector.load %arg1[%c0_184, %218, %c0_185, %c0_186] : memref<2x52x52x4xf32, #tpu.memory_space<vmem>>, vector<2x4x16x4xf32>
    %220 = vector.shape_cast %219 : vector<2x4x16x4xf32> to vector<128x4xf32>
    %221 = arith.truncf %220 : vector<128x4xf32> to vector<128x4xbf16>
    %c2_187 = arith.constant 2 : index
    %c3_188 = arith.constant 3 : index
    %c0_189 = arith.constant 0 : index
    %c0_190 = arith.constant 0 : index
    %222 = vector.load %arg3[%c2_187, %c3_188, %c0_189, %c0_190] : memref<3x9x4x32xbf16, #tpu.memory_space<vmem>>, vector<1x1x4x32xbf16>
    %223 = vector.shape_cast %222 : vector<1x1x4x32xbf16> to vector<4x32xbf16>
    %cst_191 = arith.constant dense<0.000000e+00> : vector<128x32xf32>
    %224 = tpu.matmul %221, %223, %cst_191 {dimension_numbers = #tpu.dot_dimension_numbers<[1], [0], [0], [1], [0, 0, 1, 1], [], []>} : vector<128x4xbf16>, vector<4x32xbf16>, vector<128x32xf32> -> vector<128x32xf32>
    %225 = arith.addf %216, %224 : vector<128x32xf32>
    %c18_i32_192 = arith.constant 18 : i32
    %226 = arith.addi %1, %c18_i32_192 : i32
    %c0_193 = arith.constant 0 : index
    %227 = arith.index_cast %226 : i32 to index
    %c18_194 = arith.constant 18 : index
    %c0_195 = arith.constant 0 : index
    %228 = vector.load %arg1[%c0_193, %227, %c18_194, %c0_195] : memref<2x52x52x4xf32, #tpu.memory_space<vmem>>, vector<2x4x16x4xf32>
    %229 = vector.shape_cast %228 : vector<2x4x16x4xf32> to vector<128x4xf32>
    %230 = arith.truncf %229 : vector<128x4xf32> to vector<128x4xbf16>
    %c2_196 = arith.constant 2 : index
    %c4_197 = arith.constant 4 : index
    %c0_198 = arith.constant 0 : index
    %c0_199 = arith.constant 0 : index
    %231 = vector.load %arg3[%c2_196, %c4_197, %c0_198, %c0_199] : memref<3x9x4x32xbf16, #tpu.memory_space<vmem>>, vector<1x1x4x32xbf16>
    %232 = vector.shape_cast %231 : vector<1x1x4x32xbf16> to vector<4x32xbf16>
    %cst_200 = arith.constant dense<0.000000e+00> : vector<128x32xf32>
    %233 = tpu.matmul %230, %232, %cst_200 {dimension_numbers = #tpu.dot_dimension_numbers<[1], [0], [0], [1], [0, 0, 1, 1], [], []>} : vector<128x4xbf16>, vector<4x32xbf16>, vector<128x32xf32> -> vector<128x32xf32>
    %234 = arith.addf %225, %233 : vector<128x32xf32>
    %c18_i32_201 = arith.constant 18 : i32
    %235 = arith.addi %1, %c18_i32_201 : i32
    %c0_202 = arith.constant 0 : index
    %236 = arith.index_cast %235 : i32 to index
    %c36_203 = arith.constant 36 : index
    %c0_204 = arith.constant 0 : index
    %237 = vector.load %arg1[%c0_202, %236, %c36_203, %c0_204] : memref<2x52x52x4xf32, #tpu.memory_space<vmem>>, vector<2x4x16x4xf32>
    %238 = vector.shape_cast %237 : vector<2x4x16x4xf32> to vector<128x4xf32>
    %239 = arith.truncf %238 : vector<128x4xf32> to vector<128x4xbf16>
    %c2_205 = arith.constant 2 : index
    %c5_206 = arith.constant 5 : index
    %c0_207 = arith.constant 0 : index
    %c0_208 = arith.constant 0 : index
    %240 = vector.load %arg3[%c2_205, %c5_206, %c0_207, %c0_208] : memref<3x9x4x32xbf16, #tpu.memory_space<vmem>>, vector<1x1x4x32xbf16>
    %241 = vector.shape_cast %240 : vector<1x1x4x32xbf16> to vector<4x32xbf16>
    %cst_209 = arith.constant dense<0.000000e+00> : vector<128x32xf32>
    %242 = tpu.matmul %239, %241, %cst_209 {dimension_numbers = #tpu.dot_dimension_numbers<[1], [0], [0], [1], [0, 0, 1, 1], [], []>} : vector<128x4xbf16>, vector<4x32xbf16>, vector<128x32xf32> -> vector<128x32xf32>
    %243 = arith.addf %234, %242 : vector<128x32xf32>
    %c36_i32 = arith.constant 36 : i32
    %244 = arith.addi %1, %c36_i32 : i32
    %c0_210 = arith.constant 0 : index
    %245 = arith.index_cast %244 : i32 to index
    %c0_211 = arith.constant 0 : index
    %c0_212 = arith.constant 0 : index
    %246 = vector.load %arg1[%c0_210, %245, %c0_211, %c0_212] : memref<2x52x52x4xf32, #tpu.memory_space<vmem>>, vector<2x4x16x4xf32>
    %247 = vector.shape_cast %246 : vector<2x4x16x4xf32> to vector<128x4xf32>
    %248 = arith.truncf %247 : vector<128x4xf32> to vector<128x4xbf16>
    %c2_213 = arith.constant 2 : index
    %c6_214 = arith.constant 6 : index
    %c0_215 = arith.constant 0 : index
    %c0_216 = arith.constant 0 : index
    %249 = vector.load %arg3[%c2_213, %c6_214, %c0_215, %c0_216] : memref<3x9x4x32xbf16, #tpu.memory_space<vmem>>, vector<1x1x4x32xbf16>
    %250 = vector.shape_cast %249 : vector<1x1x4x32xbf16> to vector<4x32xbf16>
    %cst_217 = arith.constant dense<0.000000e+00> : vector<128x32xf32>
    %251 = tpu.matmul %248, %250, %cst_217 {dimension_numbers = #tpu.dot_dimension_numbers<[1], [0], [0], [1], [0, 0, 1, 1], [], []>} : vector<128x4xbf16>, vector<4x32xbf16>, vector<128x32xf32> -> vector<128x32xf32>
    %252 = arith.addf %243, %251 : vector<128x32xf32>
    %c36_i32_218 = arith.constant 36 : i32
    %253 = arith.addi %1, %c36_i32_218 : i32
    %c0_219 = arith.constant 0 : index
    %254 = arith.index_cast %253 : i32 to index
    %c18_220 = arith.constant 18 : index
    %c0_221 = arith.constant 0 : index
    %255 = vector.load %arg1[%c0_219, %254, %c18_220, %c0_221] : memref<2x52x52x4xf32, #tpu.memory_space<vmem>>, vector<2x4x16x4xf32>
    %256 = vector.shape_cast %255 : vector<2x4x16x4xf32> to vector<128x4xf32>
    %257 = arith.truncf %256 : vector<128x4xf32> to vector<128x4xbf16>
    %c2_222 = arith.constant 2 : index
    %c7_223 = arith.constant 7 : index
    %c0_224 = arith.constant 0 : index
    %c0_225 = arith.constant 0 : index
    %258 = vector.load %arg3[%c2_222, %c7_223, %c0_224, %c0_225] : memref<3x9x4x32xbf16, #tpu.memory_space<vmem>>, vector<1x1x4x32xbf16>
    %259 = vector.shape_cast %258 : vector<1x1x4x32xbf16> to vector<4x32xbf16>
    %cst_226 = arith.constant dense<0.000000e+00> : vector<128x32xf32>
    %260 = tpu.matmul %257, %259, %cst_226 {dimension_numbers = #tpu.dot_dimension_numbers<[1], [0], [0], [1], [0, 0, 1, 1], [], []>} : vector<128x4xbf16>, vector<4x32xbf16>, vector<128x32xf32> -> vector<128x32xf32>
    %261 = arith.addf %252, %260 : vector<128x32xf32>
    %c36_i32_227 = arith.constant 36 : i32
    %262 = arith.addi %1, %c36_i32_227 : i32
    %c0_228 = arith.constant 0 : index
    %263 = arith.index_cast %262 : i32 to index
    %c36_229 = arith.constant 36 : index
    %c0_230 = arith.constant 0 : index
    %264 = vector.load %arg1[%c0_228, %263, %c36_229, %c0_230] : memref<2x52x52x4xf32, #tpu.memory_space<vmem>>, vector<2x4x16x4xf32>
    %265 = vector.shape_cast %264 : vector<2x4x16x4xf32> to vector<128x4xf32>
    %266 = arith.truncf %265 : vector<128x4xf32> to vector<128x4xbf16>
    %c2_231 = arith.constant 2 : index
    %c8_232 = arith.constant 8 : index
    %c0_233 = arith.constant 0 : index
    %c0_234 = arith.constant 0 : index
    %267 = vector.load %arg3[%c2_231, %c8_232, %c0_233, %c0_234] : memref<3x9x4x32xbf16, #tpu.memory_space<vmem>>, vector<1x1x4x32xbf16>
    %268 = vector.shape_cast %267 : vector<1x1x4x32xbf16> to vector<4x32xbf16>
    %cst_235 = arith.constant dense<0.000000e+00> : vector<128x32xf32>
    %269 = tpu.matmul %266, %268, %cst_235 {dimension_numbers = #tpu.dot_dimension_numbers<[1], [0], [0], [1], [0, 0, 1, 1], [], []>} : vector<128x4xbf16>, vector<4x32xbf16>, vector<128x32xf32> -> vector<128x32xf32>
    %270 = arith.addf %261, %269 : vector<128x32xf32>
    %271 = vector.extract_strided_slice %2 {offsets = [3, 0], sizes = [1, 32], strides = [1, 1]} : vector<5x32xf32> to vector<1x32xf32>
    %272 = vector.broadcast %271 : vector<1x32xf32> to vector<128x32xf32>
    %273 = arith.addf %270, %272 : vector<128x32xf32>
    %cst_236 = arith.constant 0.000000e+00 : f32
    %274 = vector.broadcast %cst_236 : f32 to vector<128x32xf32>
    %275 = arith.maximumf %273, %274 : vector<128x32xf32>
    %276 = arith.truncf %14 : vector<128x32xf32> to vector<128x32xbf16>
    %277 = arith.truncf %101 : vector<128x32xf32> to vector<128x32xbf16>
    %278 = arith.truncf %188 : vector<128x32xf32> to vector<128x32xbf16>
    %279 = arith.truncf %275 : vector<128x32xf32> to vector<128x32xbf16>
    %280 = tpu.concatenate %276, %277, %278, %279 in 1 : vector<128x32xbf16>, vector<128x32xbf16>, vector<128x32xbf16>, vector<128x32xbf16> -> vector<128x128xbf16>
    %c0_237 = arith.constant 0 : index
    %c0_238 = arith.constant 0 : index
    %281 = vector.load %arg4[%c0_237, %c0_238] : memref<128x32xbf16, #tpu.memory_space<vmem>>, vector<128x32xbf16>
    %cst_239 = arith.constant dense<0.000000e+00> : vector<128x32xf32>
    %282 = tpu.matmul %280, %281, %cst_239 {dimension_numbers = #tpu.dot_dimension_numbers<[1], [0], [0], [1], [0, 0, 1, 1], [], []>} : vector<128x128xbf16>, vector<128x32xbf16>, vector<128x32xf32> -> vector<128x32xf32>
    %283 = vector.shape_cast %282 : vector<128x32xf32> to vector<2x64x32xf32>
    %c0_240 = arith.constant 0 : index
    %c0_241 = arith.constant 0 : index
    %c0_242 = arith.constant 0 : index
    %284 = vector.load %arg5[%c0_240, %c0_241, %c0_242] : memref<2x1x32xf32, #tpu.memory_space<vmem>>, vector<2x1x32xf32>
    %285 = vector.broadcast %284 : vector<2x1x32xf32> to vector<2x64x32xf32>
    %286 = arith.addf %283, %285 : vector<2x64x32xf32>
    %287 = vector.extract_strided_slice %2 {offsets = [4, 0], sizes = [1, 32], strides = [1, 1]} : vector<5x32xf32> to vector<1x32xf32>
    %288 = vector.shape_cast %287 : vector<1x32xf32> to vector<1x1x32xf32>
    %289 = vector.broadcast %288 : vector<1x1x32xf32> to vector<2x64x32xf32>
    %290 = arith.addf %286, %289 : vector<2x64x32xf32>
    %cst_243 = arith.constant 0.000000e+00 : f32
    %291 = vector.broadcast %cst_243 : f32 to vector<2x64x32xf32>
    %292 = arith.maximumf %290, %291 : vector<2x64x32xf32>
    %c0_244 = arith.constant 0 : index
    %c0_245 = arith.constant 0 : index
    %c0_246 = arith.constant 0 : index
    %293 = vector.load %arg7[%c0_244, %c0_245, %c0_246] : memref<2x64x32xf32, #tpu.memory_space<vmem>>, vector<2x64x32xf32>
    tpu.vector_store %arg7[%c0_244, %c0_245, %c0_246], %292 {strides = array<i32>} : memref<2x64x32xf32, #tpu.memory_space<vmem>>, vector<2x64x32xf32>,
    return
  }
  func.func @transform_0(%arg0: i32) -> (i32, i32, i32, i32) {
    %c0_i32 = arith.constant 0 : i32
    %c0_i32_0 = arith.constant 0 : i32
    %c0_i32_1 = arith.constant 0 : i32
    %c0_i32_2 = arith.constant 0 : i32
    %c0_i32_3 = arith.constant 0 : i32
    return %c0_i32, %c0_i32_0, %c0_i32_1, %c0_i32_2 : i32, i32, i32, i32
  }
  func.func @transform_1(%arg0: i32) -> (i32, i32) {
    %c0_i32 = arith.constant 0 : i32
    %c0_i32_0 = arith.constant 0 : i32
    %c0_i32_1 = arith.constant 0 : i32
    return %c0_i32, %c0_i32_0 : i32, i32
  }
  func.func @transform_2(%arg0: i32) -> (i32, i32, i32, i32) {
    %c0_i32 = arith.constant 0 : i32
    %c0_i32_0 = arith.constant 0 : i32
    %c0_i32_1 = arith.constant 0 : i32
    %c0_i32_2 = arith.constant 0 : i32
    %c0_i32_3 = arith.constant 0 : i32
    return %c0_i32, %c0_i32_0, %c0_i32_1, %c0_i32_2 : i32, i32, i32, i32
  }
  func.func @transform_3(%arg0: i32) -> (i32, i32) {
    %c0_i32 = arith.constant 0 : i32
    %c0_i32_0 = arith.constant 0 : i32
    %c0_i32_1 = arith.constant 0 : i32
    return %c0_i32, %c0_i32_0 : i32, i32
  }
  func.func @transform_4(%arg0: i32) -> (i32, i32, i32) {
    %c0_i32 = arith.constant 0 : i32
    %c0_i32_0 = arith.constant 0 : i32
    %c0_i32_1 = arith.constant 0 : i32
    %c0_i32_2 = arith.constant 0 : i32
    return %c0_i32, %c0_i32_0, %c0_i32_1 : i32, i32, i32
  }
  func.func @transform_5(%arg0: i32) -> (i32, i32) {
    %c0_i32 = arith.constant 0 : i32
    %c0_i32_0 = arith.constant 0 : i32
    %c0_i32_1 = arith.constant 0 : i32
    return %c0_i32, %c0_i32_0 : i32, i32
  }
  func.func @transform_6(%arg0: i32) -> (i32, i32, i32) {
    %c0_i32 = arith.constant 0 : i32
    %c0_i32_0 = arith.constant 0 : i32
    %c0_i32_1 = arith.constant 0 : i32
    return %c0_i32, %arg0, %c0_i32_0 : i32, i32, i32
  }
}

</mosaic_0001>

<bundles_post_ra>
// kernel: tpu_custom_call.1
= control target key start
LH: loop header
LB: loop body
LE: loop exit
PB: predicated region body
PF: predicated region fallthrough
CT: control target
= control target key end

     0   :  { %s7304_s21 = smov 0   ;;  %s7306_s22 = smov 0   ;;  %s8540_s0 = inlined_call_operand.vmem [shape: f32[2,52,52,4], index: 0, kind: input, shape index: {}]   ;;  %s8541_s1 = inlined_call_operand.vmem [shape: bf16[4,32], index: 1, kind: input, shape index: {}]   ;;  %s8542_s2 = inlined_call_operand.vmem [shape: bf16[3,9,4,32], index: 2, kind: input, shape index: {}]   ;;  %s8543_s3 = inlined_call_operand.vmem [shape: bf16[128,32], index: 3, kind: input, shape index: {}]   ;;  %s8544_s4 = inlined_call_operand.vmem [shape: f32[2,1,32], index: 4, kind: input, shape index: {}]   ;;  %s8545_s5 = inlined_call_operand.vmem [shape: f32[5,32], index: 5, kind: input, shape index: {}]   ;;  %s8546_s6 = inlined_call_operand.vmem [shape: f32[2,256,32], index: 6, kind: output, shape index: {}]  }
   0x1   :  { %s7308_s23 = smov 0  }
   0x2 LB: > { %s7317_s24 = sadd.s32 4294967295, %s7264_s23   ;;  %s7319_s25 = sadd.s32 1, %s7264_s23   ;;  %s7264_s23 = sphi %s7308_s23, %s8550_s23   ;;  %s7260_s22 = sphi %s7306_s22, %s8549_s22   ;;  %s7256_s21 = sphi %s7304_s21, %s8548_s21  }
   0x3   : > { %s146_s26 = ssub.s32 %s7264_s23, %s7319_s25  ;;  %s149_s27 = sadd.s32 1, %s7260_s22 }
   0x4   : > { %p147_p0 = scmp.eq.s32.totalorder %s146_s26, 0  ;;  %p159_p1 = scmp.ne.s32.totalorder %s7260_s22, %s7256_s21 }
   0x5   : > { %p160_p2 = scmp.eq.s32.totalorder %s7317_s24, 3  ;;  %p5353_p3 = scmp.ge.s32.totalorder %s7264_s23, 1 }
   0x6   : > { %s7327_s28 = scalar_select %p147_p0, %s7260_s22, %s149_s27  }
   0x7   : > { %p7329_p4 = por %p160_p2, %p159_p1  ;;  %p202_p5 = scmp.lt.s32.totalorder %s7264_s23, 5 }
   0x9   : > { %p203_p6 = pnand %p5353_p3, %p202_p5 }
   0xa   : > { %vm287_vm0 = vcmask (!%p203_p6), 1041408   ;;  %v7336_v0 = vld [vmem:[%s8542_s2 + $0x6] sm:$0x3] (!%p203_p6)  ;;  %v257_v1 = vld [vmem:[%s8541_s1] sm:$0x3] (!%p203_p6)  ;;  %s5357_s10 = smul.u32 (!%p203_p6), 224, %s7317_s24 }
   0xb   : > { %206 = sbr.rel (%p203_p6) target bundleno = 1043 (0x413), region = 44  ;;  %7182 = vmatprep.subr.msk.bf16.mxu1 (!%p203_p6), %vm287_vm0, %v7336_v0  ;;  %7177 = vmatprep.subr.msk.bf16.mxu0 (!%p203_p6), %vm287_vm0, %v257_v1  ;;  %v7347_v2 = vsel (!%p203_p6), %vm287_vm0, %v7336_v0, 0  ;;  %v289_v3 = vsel (!%p203_p6), %vm287_vm0, %v257_v1, 0  ;;  %v5483_v4 = vld [vmem:[%s8542_s2 + $0x8] sm:$0x3] (!%p203_p6)  ;;  %vm262_vm1 = vcmask (!%p203_p6), 31744  }
   0xc   : > { %6792 = vmatpush3.bf16.msra.mxu1 (!%p203_p6), %v7347_v2  ;;  %6256 = vmatpush3.bf16.msra.mxu0 (!%p203_p6), %v289_v3  ;;  %s7357_s15 = scalar_lea.vmem (!%p203_p6), %s8540_s0, %s5357_s10  ;;  %v5416_v5 = vld [vmem:[%s8542_s2 + $0x2] sm:$0x3] (!%p203_p6)  ;;  %v1041_v20 = vsel (!%p203_p6), %vm287_vm0, %v5483_v4, 0  ;;  %v5508_v26 = vld [vmem:[%s8542_s2 + $0xa] sm:$0x3] (!%p203_p6)  ;;  %s7266_s14 = smov (!%p203_p6), 32  }
   0xd   : > { %v5358_v6 = vld [vmem:[%s7357_s15 + $0x402] sm:$0xff] (!%p203_p6)  ;;  %v5359_v7 = vld [vmem:[%s7357_s15 + $0x40a] sm:$0xff] (!%p203_p6)  ;;  %7183 = vmatprep.subr.msk.bf16.mxu1 (!%p203_p6), %vm287_vm0, %v5483_v4  ;;  %7178 = vmatprep.subr.msk.bf16.mxu0 (!%p203_p6), %vm287_vm0, %v5416_v5  ;;  %v5360_v11 = vld [vmem:[%s7357_s15 + $0x43a] sm:$0xff] (!%p203_p6)  ;;  %v483_v18 = vsel (!%p203_p6), %vm287_vm0, %v5416_v5, 0  ;;  %v1207_v43 = vsel (!%p203_p6), %vm287_vm0, %v5508_v26, 0  ;;  %s7267_s9 = smov (!%p203_p6), 64  }
   0xe   : > { %v5466_v8 = vld [vmem:[%s7357_s15 + $0xf5c] sm:$0xff] (!%p203_p6)  ;;  %v7367_v9 = vpack.c.bf16 (!%p203_p6), %v5359_v7, %v5358_v6  ;;  %v5467_v10 = vld [vmem:[%s7357_s15 + $0xf64] sm:$0xff] (!%p203_p6)  ;;  %v5468_v15 = vld [vmem:[%s7357_s15 + $0xf94] sm:$0xff] (!%p203_p6)  ;;  %s7268_s20 = smov (!%p203_p6), 96   ;;  %vm4874_vm2 = vcmask (!%p203_p6), 261120   ;;  %vm4899_vm3 = vcmask (!%p203_p6), 523264  }
   0xf   : > { %v5361_v12 = vld [vmem:[%s7357_s15 + $0x442] sm:$0xff] (!%p203_p6)  ;;  %v892_v13 = vpack.c.bf16 (!%p203_p6), %v5467_v10, %v5466_v8  ;;  %v5362_v17 = vld [vmem:[%s7357_s15 + $0x472] sm:$0xff] (!%p203_p6)  ;;  %v5363_v21 = vld [vmem:[%s7357_s15 + $0x47a] sm:$0xff] (!%p203_p6)  ;;  %vm4916_vm4 = vcmask (!%p203_p6), 785408  }
  0x10   : > { %v7372_v14 = vpack.c.bf16 (!%p203_p6), %v5361_v12, %v5360_v11  ;;  %v5469_v16 = vld [vmem:[%s7357_s15 + $0xf9c] sm:$0xff] (!%p203_p6)  ;;  %6257 = vmatprep.mubr.msk.bf16.mxu0 (!%p203_p6), %vm262_vm1, %v7367_v9  ;;  %v5470_v22 = vld [vmem:[%s7357_s15 + $0xfcc] sm:$0xff] (!%p203_p6)  ;;  %v5471_v23 = vld [vmem:[%s7357_s15 + $0xfd4] sm:$0xff] (!%p203_p6)  ;;  %v7387_v24 = vpack.c.bf16 (!%p203_p6), %v5363_v21, %v5362_v17 }
  0x11   : > { %v893_v19 = vpack.c.bf16 (!%p203_p6), %v5469_v16, %v5468_v15  ;;  %6337 = vmatprep.mubr.msk.bf16.mxu1 (!%p203_p6), %vm262_vm1, %v892_v13  ;;  %v894_v25 = vpack.c.bf16 (!%p203_p6), %v5471_v23, %v5470_v22  ;;  %v5364_v27 = vld [vmem:[%s7357_s15 + $0x4aa] sm:$0xff] (!%p203_p6)  ;;  %v5365_v28 = vld [vmem:[%s7357_s15 + $0x4b2] sm:$0xff] (!%p203_p6)  ;;  %v5366_v31 = vld [vmem:[%s7357_s15 + $0xf62] sm:$0xff] (!%p203_p6) }
  0x12   : > { %6258 = vmatmul.mubr.msk.bf16.vlgmr.msra.gmra.mrb[0].mxu0 %vm262_vm1, %v7372_v14  ;;  %v5472_v29 = vld [vmem:[%s7357_s15 + $0x1004] sm:$0xff]  ;;  %v5473_v30 = vld [vmem:[%s7357_s15 + $0x100c] sm:$0xff]  ;;  %v7403_v33 = vpack.c.bf16 %v5365_v28, %v5364_v27  ;;  %v5368_v36 = vld [vmem:[%s7357_s15 + $0xf9a] sm:$0xff]  ;;  %s5986_s7 = sshll.u32 (%p7329_p4), %s7317_s24, 6 }
  0x13   : > { %6338 = vmatmul.mubr.msk.bf16.vlgmr.msra.gmra.mrb[0].mxu1 %vm262_vm1, %v893_v19  ;;  %6274 = vmatpush3.bf16.msra.mxu0 %v483_v18  ;;  %v5367_v32 = vld [vmem:[%s7357_s15 + $0xf6a] sm:$0xff]  ;;  %v895_v34 = vpack.c.bf16 %v5473_v30, %v5472_v29  ;;  %v5369_v37 = vld [vmem:[%s7357_s15 + $0xfa2] sm:$0xff]  ;;  %v431_v38 = vld [vmem:[%s8542_s2] sm:$0x3]  ;;  %s5193_s10 = scalar_lea.vmem (%p7329_p4), %s8546_s6, %s5986_s7 }
  0x14   : > { %6346 = vmatpush3.bf16.msra.mxu1 %v1041_v20  ;;  %6261 = vmatprep.mubr.msk.bf16.mxu0 %vm262_vm1, %v7387_v24  ;;  %v7405_v35 = vpack.c.bf16 %v5367_v32, %v5366_v31  ;;  %v5370_v39 = vld [vmem:[%s7357_s15 + $0xfd2] sm:$0xff]  ;;  %v5371_v40 = vld [vmem:[%s7357_s15 + $0xfda] sm:$0xff]  ;;  %v7422_v41 = vpack.c.bf16 %v5369_v37, %v5368_v36  ;;  %v5535_v44 = vld [vmem:[%s8542_s2 + $0xc] sm:$0x3]  ;;  %v607_v57 = vsel %vm287_vm0, %v431_v38, 0 }
  0x15   : > { %6341 = vmatprep.mubr.msk.bf16.mxu1 %vm262_vm1, %v894_v25  ;;  %7184 = vmatprep.subr.msk.bf16.mxu1 %vm287_vm0, %v5508_v26  ;;  %v7424_v42 = vpack.c.bf16 %v5371_v40, %v5370_v39  ;;  %v5372_v45 = vld [vmem:[%s7357_s15 + $0x100a] sm:$0xff]  ;;  %v5373_v46 = vld [vmem:[%s7357_s15 + $0x1012] sm:$0xff]  ;;  %v5401_v48 = vld [vmem:[%s7357_s15 + $0x2ba] sm:$0xff]  ;;  %v1376_v20 = vsel %vm287_vm0, %v5535_v44, 0 }
  0x16   : > { %7179 = vmatprep.subr.msk.bf16.mxu0 %vm287_vm0, %v431_v38  ;;  %v5400_v47 = vld [vmem:[%s7357_s15 + $0x2b2] sm:$0xff]  ;;  %v7443_v49 = vpack.c.bf16 %v5373_v46, %v5372_v45  ;;  %v5402_v51 = vld [vmem:[%s7357_s15 + $0x2ea] sm:$0xff]  ;;  %v5404_v53 = vld [vmem:[%s7357_s15 + $0x322] sm:$0xff] }
  0x17   : > { %v448_v50 = vpack.c.bf16 %v5401_v48, %v5400_v47  ;;  %v5403_v52 = vld [vmem:[%s7357_s15 + $0x2f2] sm:$0xff]  ;;  %v5405_v54 = vld [vmem:[%s7357_s15 + $0x32a] sm:$0xff]  ;;  %v7461_v58 = vld [vmem:[%s8542_s2 + $0x4] sm:$0x3] }
  0x18   : > { %v449_v55 = vpack.c.bf16 %v5403_v52, %v5402_v51  ;;  %v450_v56 = vpack.c.bf16 %v5405_v54, %v5404_v53  ;;  %v5406_v59 = vld [vmem:[%s7357_s15 + $0x35a] sm:$0xff]  ;;  %v5407_v60 = vld [vmem:[%s7357_s15 + $0x362] sm:$0xff]  ;;  %v5408_v61 = vld [vmem:[%s7357_s15 + $0xe12] sm:$0xff]  ;;  %v757_v52 = vsel %vm287_vm0, %v7461_v58, 0 }
  0x19   : > { %v5409_v62 = vld [vmem:[%s7357_s15 + $0xe1a] sm:$0xff]  ;;  %v5492_v63 = vld [vmem:[%s7357_s15 + $0x408] sm:$0xff]  ;;  %v5493_v1 = vld [vmem:[%s7357_s15 + $0x410] sm:$0xff]  ;;  %v451_v3 = vpack.c.bf16 %v5407_v60, %v5406_v59 }
  0x1a   : > { %6262 = vmatmul.mubr.msk.bf16.gmra.mrb[4].mxu0 %vm262_vm1, %v7403_v33  ;;  %v452_v4 = vpack.c.bf16 %v5409_v62, %v5408_v61  ;;  %v1172_v5 = vpack.c.bf16 %v5493_v1, %v5492_v63  ;;  %v5410_v6 = vld [vmem:[%s7357_s15 + $0xe4a] sm:$0xff]  ;;  %v5411_v7 = vld [vmem:[%s7357_s15 + $0xe52] sm:$0xff]  ;;  %v5494_v8 = vld [vmem:[%s7357_s15 + $0x440] sm:$0xff] }
  0x1b   : > { %6342 = vmatmul.mubr.msk.bf16.gmra.mrb[4].mxu1 %vm262_vm1, %v895_v34  ;;  %6265 = vmatprep.mubr.msk.bf16.mxu0 %vm262_vm1, %v7405_v35  ;;  %v5495_v10 = vld [vmem:[%s7357_s15 + $0x448] sm:$0xff]  ;;  %v5496_v13 = vld [vmem:[%s7357_s15 + $0x478] sm:$0xff]  ;;  %v5497_v15 = vld [vmem:[%s7357_s15 + $0x480] sm:$0xff]  ;;  %v453_v16 = vpack.c.bf16 %v5411_v7, %v5410_v6 }
  0x1c   : > { %6347 = vmatprep.mubr.msk.bf16.mxu1 %vm262_vm1, %v7367_v9  ;;  %v5412_v11 = vld [vmem:[%s7357_s15 + $0xe82] sm:$0xff]  ;;  %v5413_v12 = vld [vmem:[%s7357_s15 + $0xe8a] sm:$0xff]  ;;  %v1173_v17 = vpack.c.bf16 %v5495_v10, %v5494_v8  ;;  %v1174_v19 = vpack.c.bf16 %v5497_v15, %v5496_v13  ;;  %v5414_v22 = vld [vmem:[%s7357_s15 + $0xeba] sm:$0xff] }
  0x1d   : > { %v454_v18 = vpack.c.bf16 %v5413_v12, %v5412_v11  ;;  %v7494_v21 = vld [vmem:[%s8542_s2 + $0xe] sm:$0x3]  ;;  %v5415_v23 = vld [vmem:[%s7357_s15 + $0xec2] sm:$0xff]  ;;  %v5498_v25 = vld [vmem:[%s7357_s15 + $0x4b0] sm:$0xff] }
  0x1e   : > { %v5499_v26 = vld [vmem:[%s7357_s15 + $0x4b8] sm:$0xff]  ;;  %v5384_v27 = vld [vmem:[%s7357_s15 + $0x2ac] sm:$0xff]  ;;  %v455_v31 = vpack.c.bf16 %v5415_v23, %v5414_v22  ;;  %v5386_v37 = vld [vmem:[%s7357_s15 + $0x2e4] sm:$0xff] }
  0x1f   : > { %v5385_v28 = vld [vmem:[%s7357_s15 + $0x2b4] sm:$0xff]  ;;  %v5500_v29 = vld [vmem:[%s7357_s15 + $0xf68] sm:$0xff]  ;;  %v1175_v32 = vpack.c.bf16 %v5499_v26, %v5498_v25  ;;  %v5502_v39 = vld [vmem:[%s7357_s15 + $0xfa0] sm:$0xff] }
  0x20   : > { %v5501_v30 = vld [vmem:[%s7357_s15 + $0xf70] sm:$0xff]  ;;  %v423_v34 = vpack.c.bf16 %v5385_v28, %v5384_v27  ;;  %v5503_v40 = vld [vmem:[%s7357_s15 + $0xfa8] sm:$0xff]  ;;  %v5504_v45 = vld [vmem:[%s7357_s15 + $0xfd8] sm:$0xff] }
  0x21   : > { %v1176_v36 = vpack.c.bf16 %v5501_v30, %v5500_v29  ;;  %v5387_v38 = vld [vmem:[%s7357_s15 + $0x2ec] sm:$0xff]  ;;  %v5505_v46 = vld [vmem:[%s7357_s15 + $0xfe0] sm:$0xff]  ;;  %v1177_v48 = vpack.c.bf16 %v5503_v40, %v5502_v39  ;;  %v5390_v53 = vld [vmem:[%s7357_s15 + $0x354] sm:$0xff] }
  0x22   : > { %6266 = vmatmul.mubr.msk.bf16.gmra.mrb[8].mxu0 %vm262_vm1, %v7422_v41  ;;  %v424_v47 = vpack.c.bf16 %v5387_v38, %v5386_v37  ;;  %v1178_v51 = vpack.c.bf16 %v5505_v46, %v5504_v45  ;;  %v5391_v54 = vld [vmem:[%s7357_s15 + $0x35c] sm:$0xff]  ;;  %v5393_v59 = vld [vmem:[%s7357_s15 + $0xe14] sm:$0xff]  ;;  %v5519_v60 = vld [vmem:[%s7357_s15 + $0x54c] sm:$0xff] }
  0x23   : > { %6348 = vmatmul.mubr.msk.bf16.vlgmr.msra.gmra.mrb[8].mxu1 %vm262_vm1, %v7372_v14  ;;  %6269 = vmatprep.mubr.msk.bf16.mxu0 %vm262_vm1, %v7424_v42  ;;  %v426_v61 = vpack.c.bf16 %v5391_v54, %v5390_v53  ;;  %v5522_v6 = vld [vmem:[%s7357_s15 + $0x58c] sm:$0xff]  ;;  %v5397_v7 = vld [vmem:[%s7357_s15 + $0xe84] sm:$0xff]  ;;  %v5523_v8 = vld [vmem:[%s7357_s15 + $0x5bc] sm:$0xff] }
  0x24   : > { %6364 = vmatpush3.bf16.msra.mxu1 %v1207_v43  ;;  %6351 = vmatprep.mubr.msk.bf16.mxu1 %vm262_vm1, %v7387_v24  ;;  %v5388_v43 = vld [vmem:[%s7357_s15 + $0x31c] sm:$0xff]  ;;  %v5524_v10 = vld [vmem:[%s7357_s15 + $0x5c4] sm:$0xff]  ;;  %v5527_v25 = vld [vmem:[%s7357_s15 + $0x10ac] sm:$0xff] }
  0x25   : > { %7185 = vmatprep.subr.msk.bf16.mxu1 %vm287_vm0, %v5535_v44  ;;  %v5389_v44 = vld [vmem:[%s7357_s15 + $0x324] sm:$0xff]  ;;  %v1343_v15 = vpack.c.bf16 %v5524_v10, %v5523_v8  ;;  %v5433_v22 = vld [vmem:[%s7357_s15 + $0x2b8] sm:$0xff]  ;;  %v5438_v38 = vld [vmem:[%s7357_s15 + $0x330] sm:$0xff] }
  0x26   : > { %v5434_v23 = vld [vmem:[%s7357_s15 + $0x2c0] sm:$0xff]  ;;  %v5528_v26 = vld [vmem:[%s7357_s15 + $0x10b4] sm:$0xff]  ;;  %v5437_v37 = vld [vmem:[%s7357_s15 + $0x328] sm:$0xff] }
  0x27   : > { %v722_v29 = vpack.c.bf16 %v5434_v23, %v5433_v22  ;;  %v1345_v30 = vpack.c.bf16 %v5528_v26, %v5527_v25  ;;  %v5531_v39 = vld [vmem:[%s7357_s15 + $0x111c] sm:$0xff]  ;;  %v5532_v40 = vld [vmem:[%s7357_s15 + $0x1124] sm:$0xff]  ;;  %v724_v45 = vpack.c.bf16 %v5438_v38, %v5437_v37  ;;  %v5460_v26 = vld [vmem:[%s7357_s15 + $0x434] sm:$0xff] }
  0x28   : > { %v1347_v46 = vpack.c.bf16 %v5532_v40, %v5531_v39  ;;  %v5441_v53 = vld [vmem:[%s7357_s15 + $0xe18] sm:$0xff]  ;;  %v5442_v54 = vld [vmem:[%s7357_s15 + $0xe20] sm:$0xff] }
  0x2a   : > { %6270 = vmatmul.mubr.msk.bf16.gmra.mrb[12].mxu0 %vm262_vm1, %v7443_v49 }
  0x2b   : > { %6352 = vmatmul.mubr.msk.bf16.gmra.mrb[12].mxu1 %vm262_vm1, %v7403_v33  ;;  %6275 = vmatprep.mubr.msk.bf16.mxu0 %vm262_vm1, %v448_v50  ;;  %v425_v50 = vpack.c.bf16 %v5389_v44, %v5388_v43 }
  0x2c   : > { %6355 = vmatprep.mubr.msk.bf16.mxu1 %vm262_vm1, %v7405_v35 }
  0x32   : > { %6276 = vmatmul.mubr.msk.bf16.vlgmr.msra.gmra.mrb[16].mxu0 %vm262_vm1, %v449_v55  ;;  %v5506_v55 = vld [vmem:[%s7357_s15 + $0x1010] sm:$0xff] }
  0x33   : > { %6356 = vmatmul.mubr.msk.bf16.gmra.mrb[0].mxu1 %vm262_vm1, %v7422_v41  ;;  %6279 = vmatprep.mubr.msk.bf16.mxu0 %vm262_vm1, %v450_v56  ;;  %v5507_v56 = vld [vmem:[%s7357_s15 + $0x1018] sm:$0xff] }
  0x34   : > { %6359 = vmatprep.mubr.msk.bf16.mxu1 %vm262_vm1, %v7424_v42  ;;  %6292 = vmatpush3.bf16.msra.mxu0 %v607_v57  ;;  %v5392_v57 = vld [vmem:[%s7357_s15 + $0xe0c] sm:$0xff]  ;;  %v1179_v62 = vpack.c.bf16 %v5507_v56, %v5506_v55  ;;  %v5545_v56 = vld [vmem:[%s7357_s15 + $0x55a] sm:$0xff] }
  0x35   : > { %7180 = vmatprep.subr.msk.bf16.mxu0 %vm287_vm0, %v7461_v58  ;;  %v5520_v58 = vld [vmem:[%s7357_s15 + $0x554] sm:$0xff]  ;;  %v427_v63 = vpack.c.bf16 %v5393_v59, %v5392_v57 }
  0x36   : > { %v1341_v1 = vpack.c.bf16 %v5520_v58, %v5519_v60  ;;  %v5544_v55 = vld [vmem:[%s7357_s15 + $0x552] sm:$0xff]  ;;  %v726_v60 = vpack.c.bf16 %v5442_v54, %v5441_v53 }
  0x37   : > { %v1507_v58 = vpack.c.bf16 %v5545_v56, %v5544_v55 }
  0x3a   : > { %6280 = vmatmul.mubr.msk.bf16.gmra.mrb[20].mxu0 %vm262_vm1, %v451_v3  ;;  %v5394_v3 = vld [vmem:[%s7357_s15 + $0xe44] sm:$0xff] }
  0x3b   : > { %6360 = vmatmul.mubr.msk.bf16.gmra.mrb[4].mxu1 %vm262_vm1, %v7443_v49  ;;  %6283 = vmatprep.mubr.msk.bf16.mxu0 %vm262_vm1, %v452_v4  ;;  %v5395_v4 = vld [vmem:[%s7357_s15 + $0xe4c] sm:$0xff] }
  0x3c   : > { %6365 = vmatprep.mubr.msk.bf16.mxu1 %vm262_vm1, %v1172_v5  ;;  %v5521_v5 = vld [vmem:[%s7357_s15 + $0x584] sm:$0xff]  ;;  %v428_v11 = vpack.c.bf16 %v5395_v4, %v5394_v3  ;;  %v5446_v3 = vld [vmem:[%s7357_s15 + $0xe90] sm:$0xff] }
  0x3d   : > { %v1342_v12 = vpack.c.bf16 %v5522_v6, %v5521_v5  ;;  %v5548_v4 = vld [vmem:[%s7357_s15 + $0x5c2] sm:$0xff]  ;;  %v5549_v5 = vld [vmem:[%s7357_s15 + $0x5ca] sm:$0xff] }
  0x3e   : > { %v1509_v8 = vpack.c.bf16 %v5549_v5, %v5548_v4 }
  0x42   : > { %6284 = vmatmul.mubr.msk.bf16.gmra.mrb[24].mxu0 %vm262_vm1, %v453_v16  ;;  %v1542_v16 = vsel %vm287_vm0, %v7494_v21, 0 }
  0x43   : > { %6366 = vmatmul.mubr.msk.bf16.vlgmr.msra.gmra.mrb[8].mxu1 %vm262_vm1, %v1173_v17  ;;  %6287 = vmatprep.mubr.msk.bf16.mxu0 %vm262_vm1, %v454_v18  ;;  %v7555_v17 = vld [vmem:[%s8542_s2 + $0x10] sm:$0x3]  ;;  %v5398_v18 = vld [vmem:[%s7357_s15 + $0xeb4] sm:$0xff] }
  0x44   : > { %6382 = vmatpush3.bf16.msra.mxu1 %v1376_v20  ;;  %6369 = vmatprep.mubr.msk.bf16.mxu1 %vm262_vm1, %v1174_v19  ;;  %v5399_v19 = vld [vmem:[%s7357_s15 + $0xebc] sm:$0xff]  ;;  %v5525_v20 = vld [vmem:[%s7357_s15 + $0x5f4] sm:$0xff]  ;;  %v1708_v10 = vsel %vm287_vm0, %v7555_v17, 0 }
  0x45   : > { %7186 = vmatprep.subr.msk.bf16.mxu1 %vm287_vm0, %v7494_v21  ;;  %v5526_v21 = vld [vmem:[%s7357_s15 + $0x5fc] sm:$0xff]  ;;  %v430_v27 = vpack.c.bf16 %v5399_v19, %v5398_v18  ;;  %v5459_v18 = vld [vmem:[%s7357_s15 + $0x404] sm:$0xff]  ;;  %v5552_v19 = vld [vmem:[%s7357_s15 + $0x10b2] sm:$0xff] }
  0x46   : > { %v1344_v28 = vpack.c.bf16 %v5526_v21, %v5525_v20  ;;  %v5553_v20 = vld [vmem:[%s7357_s15 + $0x10ba] sm:$0xff] }
  0x47   : > { %v1511_v25 = vpack.c.bf16 %v5553_v20, %v5552_v19 }
  0x4a   : > { %6288 = vmatmul.mubr.msk.bf16.gmra.mrb[28].mxu0 %vm262_vm1, %v455_v31  ;;  %v5435_v31 = vld [vmem:[%s7357_s15 + $0x2f0] sm:$0xff] }
  0x4b   : > { %6370 = vmatmul.mubr.msk.bf16.gmra.mrb[12].mxu1 %vm262_vm1, %v1175_v32  ;;  %6293 = vmatprep.mubr.msk.bf16.mxu0 %vm262_vm1, %v423_v34  ;;  %v5436_v32 = vld [vmem:[%s7357_s15 + $0x2f8] sm:$0xff]  ;;  %v5529_v34 = vld [vmem:[%s7357_s15 + $0x10e4] sm:$0xff] }
  0x4c   : > { %6373 = vmatprep.mubr.msk.bf16.mxu1 %vm262_vm1, %v1176_v36  ;;  %v5530_v36 = vld [vmem:[%s7357_s15 + $0x10ec] sm:$0xff]  ;;  %v723_v43 = vpack.c.bf16 %v5436_v32, %v5435_v31  ;;  %v5463_v31 = vld [vmem:[%s7357_s15 + $0x474] sm:$0xff]  ;;  %v5556_v32 = vld [vmem:[%s7357_s15 + $0x1122] sm:$0xff] }
  0x4d   : > { %v1346_v44 = vpack.c.bf16 %v5530_v36, %v5529_v34  ;;  %v5557_v34 = vld [vmem:[%s7357_s15 + $0x112a] sm:$0xff] }
  0x4e   : > { %v1513_v39 = vpack.c.bf16 %v5557_v34, %v5556_v32 }
  0x52   : > { %6294 = vmatmul.mubr.msk.bf16.vlgmr.msra.gmra.mrb[16].mxu0 %vm262_vm1, %v424_v47  ;;  %v7586_v47 = vld [vmem:[%s8542_s2 + $0x14] sm:$0x3] }
  0x53   : > { %6374 = vmatmul.mubr.msk.bf16.gmra.mrb[0].mxu1 %vm262_vm1, %v1177_v48  ;;  %6297 = vmatprep.mubr.msk.bf16.mxu0 %vm262_vm1, %v425_v50  ;;  %v5439_v48 = vld [vmem:[%s7357_s15 + $0x360] sm:$0xff]  ;;  %v5440_v50 = vld [vmem:[%s7357_s15 + $0x368] sm:$0xff]  ;;  %v1939_v40 = vsel %vm287_vm0, %v7586_v47, 0 }
  0x54   : > { %6377 = vmatprep.mubr.msk.bf16.mxu1 %vm262_vm1, %v1178_v51  ;;  %6310 = vmatpush3.bf16.msra.mxu0 %v757_v52  ;;  %v5533_v51 = vld [vmem:[%s7357_s15 + $0x1154] sm:$0xff]  ;;  %v5534_v52 = vld [vmem:[%s7357_s15 + $0x115c] sm:$0xff]  ;;  %v725_v57 = vpack.c.bf16 %v5440_v50, %v5439_v48  ;;  %v5614_v50 = vld [vmem:[%s7357_s15 + $0x16a] sm:$0xff] }
  0x55   : > { %7181 = vmatprep.subr.msk.bf16.mxu0 %vm287_vm0, %v7336_v0  ;;  %v5396_v0 = vld [vmem:[%s7357_s15 + $0xe7c] sm:$0xff]  ;;  %v1348_v59 = vpack.c.bf16 %v5534_v52, %v5533_v51 }
  0x56   : > { %v429_v13 = vpack.c.bf16 %v5397_v7, %v5396_v0  ;;  %v5559_v48 = vld [vmem:[%s7357_s15 + $0x1162] sm:$0xff]  ;;  %v5569_v51 = vld [vmem:[%s7357_s15 + $0x558] sm:$0xff] }
  0x57   : > { %v5570_v52 = vld [vmem:[%s7357_s15 + $0x560] sm:$0xff] }
  0x58   : > { %v1673_v56 = vpack.c.bf16 %v5570_v52, %v5569_v51 }
  0x5a   : > { %6298 = vmatmul.mubr.msk.bf16.gmra.mrb[20].mxu0 %vm262_vm1, %v426_v61  ;;  %v5444_v61 = vld [vmem:[%s7357_s15 + $0xe58] sm:$0xff] }
  0x5b   : > { %6378 = vmatmul.mubr.msk.bf16.gmra.mrb[4].mxu1 %vm262_vm1, %v1179_v62  ;;  %6301 = vmatprep.mubr.msk.bf16.mxu0 %vm262_vm1, %v427_v63  ;;  %v5546_v62 = vld [vmem:[%s7357_s15 + $0x58a] sm:$0xff]  ;;  %v5547_v63 = vld [vmem:[%s7357_s15 + $0x592] sm:$0xff] }
  0x5c   : > { %6383 = vmatprep.mubr.msk.bf16.mxu1 %vm262_vm1, %v1341_v1  ;;  %v5445_v1 = vld [vmem:[%s7357_s15 + $0xe88] sm:$0xff]  ;;  %v1508_v0 = vpack.c.bf16 %v5547_v63, %v5546_v62  ;;  %v5574_v63 = vld [vmem:[%s7357_s15 + $0x5d0] sm:$0xff] }
  0x5d   : > { %v728_v7 = vpack.c.bf16 %v5446_v3, %v5445_v1  ;;  %v5573_v62 = vld [vmem:[%s7357_s15 + $0x5c8] sm:$0xff] }
  0x5e   : > { %v1675_v5 = vpack.c.bf16 %v5574_v63, %v5573_v62 }
  0x62   : > { %6302 = vmatmul.mubr.msk.bf16.gmra.mrb[24].mxu0 %vm262_vm1, %v428_v11  ;;  %v7620_v11 = vld [vmem:[%s8542_s2 + $0x26] sm:$0x3] }
  0x63   : > { %6384 = vmatmul.mubr.msk.bf16.vlgmr.msra.gmra.mrb[8].mxu1 %vm262_vm1, %v1342_v12  ;;  %6305 = vmatprep.mubr.msk.bf16.mxu0 %vm262_vm1, %v429_v13  ;;  %v5447_v12 = vld [vmem:[%s7357_s15 + $0xec0] sm:$0xff]  ;;  %v5448_v13 = vld [vmem:[%s7357_s15 + $0xec8] sm:$0xff] }
  0x64   : > { %6400 = vmatpush3.bf16.msra.mxu1 %v1542_v16  ;;  %6387 = vmatprep.mubr.msk.bf16.mxu1 %vm262_vm1, %v1343_v15  ;;  %v5550_v15 = vld [vmem:[%s7357_s15 + $0x5fa] sm:$0xff]  ;;  %v5551_v16 = vld [vmem:[%s7357_s15 + $0x602] sm:$0xff]  ;;  %v729_v21 = vpack.c.bf16 %v5448_v13, %v5447_v12  ;;  %v5620_v12 = vld [vmem:[%s7357_s15 + $0x212] sm:$0xff] }
  0x65   : > { %7187 = vmatprep.subr.msk.bf16.mxu1 %vm287_vm0, %v7555_v17  ;;  %v5458_v17 = vld [vmem:[%s7357_s15 + $0x3fc] sm:$0xff]  ;;  %v1510_v22 = vpack.c.bf16 %v5551_v16, %v5550_v15  ;;  %v5576_v13 = vld [vmem:[%s7357_s15 + $0x608] sm:$0xff] }
  0x66   : > { %v888_v23 = vpack.c.bf16 %v5459_v18, %v5458_v17  ;;  %v5621_v15 = vld [vmem:[%s7357_s15 + $0xcc2] sm:$0xff]  ;;  %v5622_v16 = vld [vmem:[%s7357_s15 + $0xcca] sm:$0xff]  ;;  %v5577_v17 = vld [vmem:[%s7357_s15 + $0x10b8] sm:$0xff] }
  0x67   : > { %v5578_v18 = vld [vmem:[%s7357_s15 + $0x10c0] sm:$0xff] }
  0x6a   : > { %6306 = vmatmul.mubr.msk.bf16.gmra.mrb[28].mxu0 %vm262_vm1, %v430_v27  ;;  %v5461_v27 = vld [vmem:[%s7357_s15 + $0x43c] sm:$0xff] }
  0x6b   : > { %6388 = vmatmul.mubr.msk.bf16.gmra.mrb[12].mxu1 %vm262_vm1, %v1344_v28  ;;  %6311 = vmatprep.mubr.msk.bf16.mxu0 %vm262_vm1, %v722_v29  ;;  %v5554_v28 = vld [vmem:[%s7357_s15 + $0x10ea] sm:$0xff]  ;;  %v5555_v29 = vld [vmem:[%s7357_s15 + $0x10f2] sm:$0xff]  ;;  %v889_v36 = vpack.c.bf16 %v5461_v27, %v5460_v26  ;;  %v5624_v26 = vld [vmem:[%s7357_s15 + $0xd02] sm:$0xff] }
  0x6c   : > { %6391 = vmatprep.mubr.msk.bf16.mxu1 %vm262_vm1, %v1345_v30  ;;  %v5462_v30 = vld [vmem:[%s7357_s15 + $0x46c] sm:$0xff]  ;;  %v1512_v37 = vpack.c.bf16 %v5555_v29, %v5554_v28  ;;  %v5580_v27 = vld [vmem:[%s7357_s15 + $0x10f8] sm:$0xff] }
  0x6d   : > { %v890_v38 = vpack.c.bf16 %v5463_v31, %v5462_v30  ;;  %v5625_v28 = vld [vmem:[%s7357_s15 + $0xd32] sm:$0xff]  ;;  %v5626_v29 = vld [vmem:[%s7357_s15 + $0xd3a] sm:$0xff]  ;;  %v5581_v30 = vld [vmem:[%s7357_s15 + $0x1128] sm:$0xff] }
  0x6e   : > { %v5582_v31 = vld [vmem:[%s7357_s15 + $0x1130] sm:$0xff] }
  0x72   : > { %6312 = vmatmul.mubr.msk.bf16.vlgmr.msra.gmra.mrb[16].mxu0 %vm262_vm1, %v723_v43  ;;  %v5612_v43 = vld [vmem:[%s8542_s2 + $0x12] sm:$0x3] }
  0x73   : > { %6392 = vmatmul.mubr.msk.bf16.gmra.mrb[0].mxu1 %vm262_vm1, %v1346_v44  ;;  %6315 = vmatprep.mubr.msk.bf16.mxu0 %vm262_vm1, %v724_v45  ;;  %v5464_v44 = vld [vmem:[%s7357_s15 + $0x4a4] sm:$0xff]  ;;  %v5465_v45 = vld [vmem:[%s7357_s15 + $0x4ac] sm:$0xff] }
  0x74   : > { %6395 = vmatprep.mubr.msk.bf16.mxu1 %vm262_vm1, %v1347_v46  ;;  %6328 = vmatpush3.bf16.msra.mxu0 %v7347_v2  ;;  %v5443_v2 = vld [vmem:[%s7357_s15 + $0xe50] sm:$0xff]  ;;  %v5558_v46 = vld [vmem:[%s7357_s15 + $0x115a] sm:$0xff]  ;;  %v891_v53 = vpack.c.bf16 %v5465_v45, %v5464_v44 }
  0x75   : > { %7188 = vmatprep.subr.msk.bf16.mxu0 %vm287_vm0, %v7586_v47  ;;  %v727_v6 = vpack.c.bf16 %v5444_v61, %v5443_v2  ;;  %v5613_v47 = vld [vmem:[%s7357_s15 + $0x162] sm:$0xff]  ;;  %v1514_v54 = vpack.c.bf16 %v5559_v48, %v5558_v46  ;;  %v5617_v2 = vld [vmem:[%s7357_s15 + $0x1d2] sm:$0xff]  ;;  %v5618_v61 = vld [vmem:[%s7357_s15 + $0x1da] sm:$0xff] }
  0x76   : > { %v1904_v55 = vpack.c.bf16 %v5614_v50, %v5613_v47  ;;  %v1906_v4 = vpack.c.bf16 %v5618_v61, %v5617_v2  ;;  %v5596_v44 = vld [vmem:[%s7357_s15 + $0x156] sm:$0xff]  ;;  %v5597_v45 = vld [vmem:[%s7357_s15 + $0x15e] sm:$0xff] }
  0x77   : > { %v3343_v46 = vld [vmem:[%s7357_s15 + $0x12] sm:$0xff]  ;;  %v3344_v48 = vld [vmem:[%s7357_s15 + $0x1a] sm:$0xff]  ;;  %v1878_v51 = vpack.c.bf16 %v5597_v45, %v5596_v44  ;;  %v258_v45 = vlaneseq }
  0x78   : > { %v3359_v52 = vpack.c.bf16 %v3344_v48, %v3343_v46 }
  0x7a   : > { %6316 = vmatmul.mubr.msk.bf16.gmra.mrb[20].mxu0 %vm262_vm1, %v725_v57  ;;  %v5571_v57 = vld [vmem:[%s7357_s15 + $0x590] sm:$0xff] }
  0x7b   : > { %6396 = vmatmul.mubr.msk.bf16.gmra.mrb[4].mxu1 %vm262_vm1, %v1348_v59  ;;  %6319 = vmatprep.mubr.msk.bf16.mxu0 %vm262_vm1, %v726_v60  ;;  %v5615_v59 = vld [vmem:[%s7357_s15 + $0x19a] sm:$0xff]  ;;  %v5616_v60 = vld [vmem:[%s7357_s15 + $0x1a2] sm:$0xff] }
  0x7c   : > { %6401 = vmatprep.mubr.msk.bf16.mxu1 %vm262_vm1, %v1507_v58  ;;  %v5572_v58 = vld [vmem:[%s7357_s15 + $0x598] sm:$0xff]  ;;  %v1905_v1 = vpack.c.bf16 %v5616_v60, %v5615_v59  ;;  %v5601_v59 = vld [vmem:[%s7357_s15 + $0x1ce] sm:$0xff]  ;;  %v3347_v60 = vld [vmem:[%s7357_s15 + $0x82] sm:$0xff] }
  0x7d   : > { %v1674_v3 = vpack.c.bf16 %v5572_v58, %v5571_v57  ;;  %v5600_v57 = vld [vmem:[%s7357_s15 + $0x1c6] sm:$0xff] }
  0x7e   : > { %v3348_v58 = vld [vmem:[%s7357_s15 + $0x8a] sm:$0xff]  ;;  %v1880_v62 = vpack.c.bf16 %v5601_v59, %v5600_v57  ;;  %v3322_v59 = vld [vmem:[%s7357_s15 + $0x78] sm:$0xff] }
  0x7f   : > { %v3361_v63 = vpack.c.bf16 %v3348_v58, %v3347_v60  ;;  %v3321_v57 = vld [vmem:[%s7357_s15 + $0x70] sm:$0xff] }
  0x82   : > { %6320 = vmatmul.mubr.msk.bf16.gmra.mrb[24].mxu0 %vm262_vm1, %v727_v6  ;;  %v3394_v6 = vsel %vm287_vm0, %v7620_v11, 0 }
  0x83   : > { %6402 = vmatmul.mubr.msk.bf16.vlgmr.msra.gmra.mrb[8].mxu1 %vm262_vm1, %v1508_v0  ;;  %6323 = vmatprep.mubr.msk.bf16.mxu0 %vm262_vm1, %v728_v7  ;;  %v5575_v0 = vld [vmem:[%s7357_s15 + $0x600] sm:$0xff]  ;;  %v2063_v7 = vsel %vm287_vm0, %v5612_v43, 0 }
  0x84   : > { %6418 = vmatpush3.bf16.msra.mxu1 %v1708_v10  ;;  %6405 = vmatprep.mubr.msk.bf16.mxu1 %vm262_vm1, %v1509_v8  ;;  %v7685_v8 = vld [vmem:[%s8542_s2 + $0x24] sm:$0x3]  ;;  %v5619_v10 = vld [vmem:[%s7357_s15 + $0x20a] sm:$0xff]  ;;  %v1676_v20 = vpack.c.bf16 %v5576_v13, %v5575_v0  ;;  %v3349_v0 = vld [vmem:[%s7357_s15 + $0xba] sm:$0xff] }
  0x85   : > { %7197 = vmatprep.subr.msk.bf16.mxu1 %vm287_vm0, %v7620_v11  ;;  %v7694_v11 = vld [vmem:[%s8542_s2 + $0x16] sm:$0x3]  ;;  %v1907_v19 = vpack.c.bf16 %v5620_v12, %v5619_v10  ;;  %v5605_v12 = vld [vmem:[%s7357_s15 + $0xcbe] sm:$0xff] }
  0x86   : > { %v5604_v10 = vld [vmem:[%s7357_s15 + $0xcb6] sm:$0xff] }
  0x87   : > { %v3352_v13 = vld [vmem:[%s7357_s15 + $0xb7a] sm:$0xff] }
  0x8a   : > { %6324 = vmatmul.mubr.msk.bf16.gmra.mrb[28].mxu0 %vm262_vm1, %v729_v21  ;;  %v1908_v21 = vpack.c.bf16 %v5622_v16, %v5621_v15 }
  0x8b   : > { %6406 = vmatmul.mubr.msk.bf16.gmra.mrb[12].mxu1 %vm262_vm1, %v1510_v22  ;;  %6329 = vmatprep.mubr.msk.bf16.mxu0 %vm262_vm1, %v888_v23  ;;  %v1677_v22 = vpack.c.bf16 %v5578_v18, %v5577_v17  ;;  %v5579_v23 = vld [vmem:[%s7357_s15 + $0x10f0] sm:$0xff]  ;;  %v1882_v17 = vpack.c.bf16 %v5605_v12, %v5604_v10  ;;  %v7837_v10 = vld [vmem:[%s8542_s2 + $0x1a] sm:$0x3] }
  0x8c   : > { %6409 = vmatprep.mubr.msk.bf16.mxu1 %vm262_vm1, %v1511_v25  ;;  %v5623_v25 = vld [vmem:[%s7357_s15 + $0xcfa] sm:$0xff]  ;;  %v1678_v34 = vpack.c.bf16 %v5580_v27, %v5579_v23  ;;  %v5608_v23 = vld [vmem:[%s7357_s15 + $0xd26] sm:$0xff]  ;;  %v5654_v12 = vld [vmem:[%s7357_s15 + $0xcce] sm:$0xff] }
  0x8d   : > { %v1909_v32 = vpack.c.bf16 %v5624_v26, %v5623_v25  ;;  %v5609_v25 = vld [vmem:[%s7357_s15 + $0xd2e] sm:$0xff]  ;;  %v3355_v26 = vld [vmem:[%s7357_s15 + $0xbe2] sm:$0xff] }
  0x8e   : > { %v3356_v27 = vld [vmem:[%s7357_s15 + $0xbea] sm:$0xff] }
  0x92   : > { %6330 = vmatmul.mubr.msk.bf16.vlgmr.msra.gmra.mrb[16].mxu0 %vm262_vm1, %v889_v36  ;;  %v1910_v36 = vpack.c.bf16 %v5626_v29, %v5625_v28 }
  0x93   : > { %6410 = vmatmul.mubr.msk.bf16.gmra.mrb[0].mxu1 %vm262_vm1, %v1512_v37  ;;  %6333 = vmatprep.mubr.msk.bf16.mxu0 %vm262_vm1, %v890_v38  ;;  %v1679_v37 = vpack.c.bf16 %v5582_v31, %v5581_v30  ;;  %v5583_v38 = vld [vmem:[%s7357_s15 + $0x1160] sm:$0xff]  ;;  %v1884_v30 = vpack.c.bf16 %v5609_v25, %v5608_v23  ;;  %v3365_v31 = vpack.c.bf16 %v3356_v27, %v3355_v26 }
  0x94   : > { %6413 = vmatprep.mubr.msk.bf16.mxu1 %vm262_vm1, %v1513_v39  ;;  %6436 = vmatpush3.bf16.msra.mxu0 %v1939_v40  ;;  %v5627_v39 = vld [vmem:[%s7357_s15 + $0xd6a] sm:$0xff]  ;;  %v5628_v40 = vld [vmem:[%s7357_s15 + $0xd72] sm:$0xff] }
  0x95   : > { %7189 = vmatprep.subr.msk.bf16.mxu0 %vm287_vm0, %v5612_v43  ;;  %v5584_v43 = vld [vmem:[%s7357_s15 + $0x1168] sm:$0xff]  ;;  %v1911_v47 = vpack.c.bf16 %v5628_v40, %v5627_v39  ;;  %v5647_v39 = vld [vmem:[%s7357_s15 + $0x176] sm:$0xff]  ;;  %v3317_v40 = vld [vmem:[%s7357_s15] sm:$0xff] }
  0x96   : > { %v1680_v50 = vpack.c.bf16 %v5584_v43, %v5583_v38  ;;  %v5646_v38 = vld [vmem:[%s7357_s15 + $0x16e] sm:$0xff] }
  0x97   : > { %v3318_v43 = vld [vmem:[%s7357_s15 + $0x8] sm:$0xff]  ;;  %v2178_v48 = vpack.c.bf16 %v5647_v39, %v5646_v38  ;;  %v3328_v38 = vld [vmem:[%s7357_s15 + $0xba0] sm:$0xff] }
  0x9a   : > { %6334 = vmatmul.mubr.msk.bf16.gmra.mrb[20].mxu0 %vm262_vm1, %v891_v53  ;;  %v5598_v53 = vld [vmem:[%s7357_s15 + $0x18e] sm:$0xff] }
  0x9b   : > { %6414 = vmatmul.mubr.msk.bf16.gmra.mrb[4].mxu1 %vm262_vm1, %v1514_v54  ;;  %6437 = vmatprep.mubr.msk.bf16.mxu0 %vm262_vm1, %v1904_v55  ;;  %v5599_v54 = vld [vmem:[%s7357_s15 + $0x196] sm:$0xff]  ;;  %v3345_v55 = vld [vmem:[%s7357_s15 + $0x4a] sm:$0xff] }
  0x9c   : > { %6419 = vmatprep.mubr.msk.bf16.mxu1 %vm262_vm1, %v1673_v56  ;;  %v3346_v56 = vld [vmem:[%s7357_s15 + $0x52] sm:$0xff]  ;;  %v1879_v2 = vpack.c.bf16 %v5599_v54, %v5598_v53  ;;  %v3320_v54 = vld [vmem:[%s7357_s15 + $0x40] sm:$0xff] }
  0x9d   : > { %v3360_v61 = vpack.c.bf16 %v3346_v56, %v3345_v55  ;;  %v3319_v53 = vld [vmem:[%s7357_s15 + $0x38] sm:$0xff]  ;;  %v5651_v56 = vld [vmem:[%s7357_s15 + $0x1e6] sm:$0xff] }
  0x9e   : > { %v5650_v55 = vld [vmem:[%s7357_s15 + $0x1de] sm:$0xff] }
  0xa2   : > { %6438 = vmatmul.mubr.msk.bf16.vlgmr.msra.gmra.mrb[32].mxu0 %vm262_vm1, %v1905_v1  ;;  %v3518_v1 = vsel %vm287_vm0, %v7685_v8, 0 }
  0xa3   : > { %6420 = vmatmul.mubr.msk.bf16.vlgmr.msra.gmra.mrb[8].mxu1 %vm262_vm1, %v1674_v3  ;;  %6441 = vmatprep.mubr.msk.bf16.mxu0 %vm262_vm1, %v1906_v4  ;;  %v5602_v3 = vld [vmem:[%s7357_s15 + $0x1fe] sm:$0xff]  ;;  %v2213_v4 = vsel %vm287_vm0, %v7694_v11, 0 }
  0xa4   : > { %6598 = vmatpush3.bf16.msra.mxu1 %v3394_v6  ;;  %6423 = vmatprep.mubr.msk.bf16.mxu1 %vm262_vm1, %v1675_v5  ;;  %v7751_v5 = vld [vmem:[%s8542_s2 + $0x28] sm:$0x3] }
  0xa5   : > { %6454 = vmatpush3.bf16.msra.mxu0 %v2063_v7  ;;  %7198 = vmatprep.subr.msk.bf16.mxu1 %vm287_vm0, %v7685_v8  ;;  %v5603_v6 = vld [vmem:[%s7357_s15 + $0x206] sm:$0xff]  ;;  %v7760_v7 = vld [vmem:[%s8542_s2 + $0x18] sm:$0x3] }
  0xa6   : > { %7190 = vmatprep.subr.msk.bf16.mxu0 %vm287_vm0, %v7694_v11  ;;  %v3350_v8 = vld [vmem:[%s7357_s15 + $0xc2] sm:$0xff]  ;;  %v3351_v11 = vld [vmem:[%s7357_s15 + $0xb72] sm:$0xff]  ;;  %v1881_v15 = vpack.c.bf16 %v5603_v6, %v5602_v3  ;;  %v2379_v6 = vsel %vm287_vm0, %v7760_v7, 0 }
  0xa7   : > { %v3362_v16 = vpack.c.bf16 %v3350_v8, %v3349_v0  ;;  %v3363_v18 = vpack.c.bf16 %v3352_v13, %v3351_v11  ;;  %v5652_v3 = vld [vmem:[%s7357_s15 + $0x216] sm:$0xff]  ;;  %v7828_v0 = vld [vmem:[%s8542_s2 + $0x2a] sm:$0x3]  ;;  %v3325_v13 = vld [vmem:[%s7357_s15 + $0xb60] sm:$0xff] }
  0xa8   : > { %v3323_v8 = vld [vmem:[%s7357_s15 + $0xa8] sm:$0xff]  ;;  %v5655_v11 = vld [vmem:[%s7357_s15 + $0xcd6] sm:$0xff] }
  0xaa   : > { %6442 = vmatmul.mubr.msk.bf16.gmra.mrb[36].mxu0 %vm262_vm1, %v1907_v19  ;;  %v5606_v19 = vld [vmem:[%s7357_s15 + $0xcee] sm:$0xff] }
  0xab   : > { %6424 = vmatmul.mubr.msk.bf16.gmra.mrb[12].mxu1 %vm262_vm1, %v1676_v20  ;;  %6445 = vmatprep.mubr.msk.bf16.mxu0 %vm262_vm1, %v1908_v21  ;;  %v5607_v20 = vld [vmem:[%s7357_s15 + $0xcf6] sm:$0xff]  ;;  %v3353_v21 = vld [vmem:[%s7357_s15 + $0xbaa] sm:$0xff] }
  0xac   : > { %6427 = vmatprep.mubr.msk.bf16.mxu1 %vm262_vm1, %v1677_v22  ;;  %v3354_v22 = vld [vmem:[%s7357_s15 + $0xbb2] sm:$0xff]  ;;  %v1883_v28 = vpack.c.bf16 %v5607_v20, %v5606_v19 }
  0xad   : > { %v3364_v29 = vpack.c.bf16 %v3354_v22, %v3353_v21  ;;  %v2182_v21 = vpack.c.bf16 %v5655_v11, %v5654_v12  ;;  %v5671_v12 = vld [vmem:[%s7357_s15 + $0x3f6] sm:$0xff]  ;;  %v5672_v11 = vld [vmem:[%s7357_s15 + $0x3fe] sm:$0xff] }
  0xb2   : > { %6446 = vmatmul.mubr.msk.bf16.gmra.mrb[40].mxu0 %vm262_vm1, %v1909_v32  ;;  %v5610_v32 = vld [vmem:[%s7357_s15 + $0xd5e] sm:$0xff] }
  0xb3   : > { %6428 = vmatmul.mubr.msk.bf16.gmra.mrb[0].mxu1 %vm262_vm1, %v1678_v34  ;;  %6449 = vmatprep.mubr.msk.bf16.mxu0 %vm262_vm1, %v1910_v36  ;;  %v5611_v34 = vld [vmem:[%s7357_s15 + $0xd66] sm:$0xff]  ;;  %v3357_v36 = vld [vmem:[%s7357_s15 + $0xc1a] sm:$0xff] }
  0xb4   : > { %6431 = vmatprep.mubr.msk.bf16.mxu1 %vm262_vm1, %v1679_v37  ;;  %v3358_v37 = vld [vmem:[%s7357_s15 + $0xc22] sm:$0xff]  ;;  %v1885_v44 = vpack.c.bf16 %v5611_v34, %v5610_v32  ;;  %v5657_v34 = vld [vmem:[%s7357_s15 + $0xd0e] sm:$0xff] }
  0xb5   : > { %v3366_v46 = vpack.c.bf16 %v3358_v37, %v3357_v36  ;;  %v5656_v32 = vld [vmem:[%s7357_s15 + $0xd06] sm:$0xff]  ;;  %v3327_v36 = vld [vmem:[%s7357_s15 + $0xb98] sm:$0xff] }
  0xba   : > { %6450 = vmatmul.mubr.msk.bf16.gmra.mrb[44].mxu0 %vm262_vm1, %v1911_v47  ;;  %v3333_v47 = vpack.c.bf16 %v3318_v43, %v3317_v40  ;;  %v5658_v40 = vld [vmem:[%s7357_s15 + $0xd3e] sm:$0xff]  ;;  %v5659_v43 = vld [vmem:[%s7357_s15 + $0xd46] sm:$0xff] }
  0xbb   : > { %6432 = vmatmul.mubr.msk.bf16.gmra.mrb[4].mxu1 %vm262_vm1, %v1680_v50  ;;  %6455 = vmatprep.mubr.msk.bf16.mxu0 %vm262_vm1, %v1878_v51  ;;  %v7797_v50 = vshrl.u32 %v258_v45, 7  ;;  %v5648_v51 = vld [vmem:[%s7357_s15 + $0x1a6] sm:$0xff]  ;;  %v3329_v45 = vld [vmem:[%s7357_s15 + $0xbd0] sm:$0xff] }
  0xbc   : > { %6599 = vmatprep.mubr.msk.bf16.mxu1 %vm262_vm1, %v3359_v52  ;;  %v5649_v52 = vld [vmem:[%s7357_s15 + $0x1ae] sm:$0xff] }
  0xbd   : > { %v2179_v60 = vpack.c.bf16 %v5649_v52, %v5648_v51  ;;  %v260_v58 = vsub.s32 0, %v7797_v50 }
  0xc2   : > { %6456 = vmatmul.mubr.msk.bf16.vlgmr.msra.gmra.mrb[32].mxu0 %vm262_vm1, %v1879_v2  ;;  %v3334_v2 = vpack.c.bf16 %v3320_v54, %v3319_v53  ;;  %v3338_v53 = vpack.c.bf16 %v3328_v38, %v3327_v36  ;;  %v2184_v54 = vpack.c.bf16 %v5659_v43, %v5658_v40  ;;  %v5674_v36 = vld [vmem:[%s7357_s15 + $0x436] sm:$0xff]  ;;  %v3620_v40 = vld [vmem:[%s7357_s15 + $0x64] sm:$0xff] }
  0xc3   : > { %6600 = vmatmul.mubr.msk.bf16.vlgmr.msra.gmra.mrb[16].mxu1 %vm262_vm1, %v3360_v61  ;;  %6459 = vmatprep.mubr.msk.bf16.mxu0 %vm262_vm1, %v1880_v62  ;;  %v2180_v61 = vpack.c.bf16 %v5651_v56, %v5650_v55  ;;  %v7814_v62 = vld [vmem:[%s8545_s5] sm:$0x1f] }
  0xc4   : > { %6616 = vmatpush3.bf16.msra.mxu1 %v3518_v1  ;;  %6603 = vmatprep.mubr.msk.bf16.mxu1 %vm262_vm1, %v3361_v63  ;;  %v3335_v63 = vpack.c.bf16 %v3322_v59, %v3321_v57  ;;  %v3668_v1 = vsel %vm287_vm0, %v7751_v5, 0 }
  0xc5   : > { %6472 = vmatpush3.bf16.msra.mxu0 %v2213_v4  ;;  %7199 = vmatprep.subr.msk.bf16.mxu1 %vm287_vm0, %v7751_v5  ;;  %v7821_v4 = vrot.slane %v7814_v62, %v260_v58  ;;  %v5653_v5 = vld [vmem:[%s7357_s15 + $0x21e] sm:$0xff] }
  0xc6   : > { %7191 = vmatprep.subr.msk.bf16.mxu0 %vm287_vm0, %v7760_v7  ;;  %v3324_v7 = vld [vmem:[%s7357_s15 + $0xb0] sm:$0xff] }
  0xc7   : > { %v3336_v20 = vpack.c.bf16 %v3324_v7, %v3323_v8  ;;  %v3332_v8 = vld [vmem:[%s7357_s15 + $0xc10] sm:$0xff] }
  0xca   : > { %6460 = vmatmul.mubr.msk.bf16.gmra.mrb[36].mxu0 %vm262_vm1, %v1881_v15  ;;  %v3326_v15 = vld [vmem:[%s7357_s15 + $0xb68] sm:$0xff] }
  0xcb   : > { %6604 = vmatmul.mubr.msk.bf16.gmra.mrb[20].mxu1 %vm262_vm1, %v3362_v16  ;;  %6463 = vmatprep.mubr.msk.bf16.mxu0 %vm262_vm1, %v1882_v17  ;;  %v2181_v17 = vpack.c.bf16 %v5653_v5, %v5652_v3  ;;  %v3337_v25 = vpack.c.bf16 %v3326_v15, %v3325_v13  ;;  %v5661_v3 = vld [vmem:[%s7357_s15 + $0xd7e] sm:$0xff] }
  0xcc   : > { %6607 = vmatprep.mubr.msk.bf16.mxu1 %vm262_vm1, %v3363_v18  ;;  %v3617_v15 = vld [vmem:[%s7357_s15 + $0x24] sm:$0xff] }
  0xd2   : > { %6464 = vmatmul.mubr.msk.bf16.gmra.mrb[40].mxu0 %vm262_vm1, %v1883_v28 }
  0xd3   : > { %6608 = vmatmul.mubr.msk.bf16.gmra.mrb[24].mxu1 %vm262_vm1, %v3364_v29  ;;  %6467 = vmatprep.mubr.msk.bf16.mxu0 %vm262_vm1, %v1884_v30 }
  0xd4   : > { %6611 = vmatprep.mubr.msk.bf16.mxu1 %vm262_vm1, %v3365_v31 }
  0xda   : > { %6468 = vmatmul.mubr.msk.bf16.gmra.mrb[44].mxu0 %vm262_vm1, %v1885_v44 }
  0xdb   : > { %6612 = vmatmul.mubr.msk.bf16.gmra.mrb[28].mxu1 %vm262_vm1, %v3366_v46  ;;  %6473 = vmatprep.mubr.msk.bf16.mxu0 %vm262_vm1, %v2178_v48  ;;  %v3330_v46 = vld [vmem:[%s7357_s15 + $0xbd8] sm:$0xff] }
  0xdc   : > { %6617 = vmatprep.mubr.msk.bf16.mxu1 %vm262_vm1, %v3333_v47  ;;  %v2183_v47 = vpack.c.bf16 %v5657_v34, %v5656_v32  ;;  %v3339_v57 = vpack.c.bf16 %v3330_v46, %v3329_v45  ;;  %v5673_v34 = vld [vmem:[%s7357_s15 + $0x42e] sm:$0xff]  ;;  %v5675_v45 = vld [vmem:[%s7357_s15 + $0x466] sm:$0xff] }
  0xdd   : > { %v5676_v46 = vld [vmem:[%s7357_s15 + $0x46e] sm:$0xff] }
  0xe2   : > { %6474 = vmatmul.mubr.msk.bf16.vlgmr.msra.gmra.mrb[32].mxu0 %vm262_vm1, %v2179_v60 }
  0xe3   : > { %6618 = vmatmul.mubr.msk.bf16.vlgmr.msra.gmra.mrb[16].mxu1 %vm262_vm1, %v3334_v2  ;;  %6477 = vmatprep.mubr.msk.bf16.mxu0 %vm262_vm1, %v2180_v61 }
  0xe4   : > { %6634 = vmatpush3.bf16.msra.mxu1 %v3668_v1  ;;  %6621 = vmatprep.mubr.msk.bf16.mxu1 %vm262_vm1, %v3335_v63  ;;  %v5660_v1 = vld [vmem:[%s7357_s15 + $0xd76] sm:$0xff] }
  0xe5   : > { %v6259_v16 = vpop.f32.mrb[0].mxu0  ;;  %6490 = vmatpush3.bf16.msra.mxu0 %v2379_v6  ;;  %7200 = vmatprep.subr.msk.bf16.mxu1 %vm287_vm0, %v7828_v0  ;;  %v3331_v6 = vld [vmem:[%s7357_s15 + $0xc08] sm:$0xff] }
  0xe6   : > { %v334_v18 = vadd.f32 %v6259_v16, %v7821_v4  ;;  %v325_v19 = vpop.f32.mrb[1].mxu0  ;;  %7192 = vmatprep.subr.msk.bf16.mxu0 %vm287_vm0, %v7837_v10  ;;  %v3618_v16 = vld [vmem:[%s7357_s15 + $0x2c] sm:$0xff] }
  0xe7   : > { %v326_v22 = vadd.f32 %v325_v19, %v7821_v4  ;;  %v6260_v23 = vpop.f32.mrb[2].mxu0 }
  0xe8   : > { %v390_v26 = vmax.f32 %v334_v18, 0.0  ;;  %v337_v27 = vadd.f32 %v6260_v23, %v7821_v4  ;;  %v328_v28 = vpop.f32.mrb[3].mxu0  ;;  %v2185_v18 = vpack.c.bf16 %v5661_v3, %v5660_v1  ;;  %v3834_v1 = vsel %vm287_vm0, %v7828_v0, 0  ;;  %v3623_v0 = vld [vmem:[%s7357_s15 + $0xcc] sm:$0xff] }
  0xe9   : > { %v388_v29 = vmax.f32 %v326_v22, 0.0  ;;  %v329_v30 = vadd.f32 %v328_v28, %v7821_v4  ;;  %v2344_v22 = vpack.c.bf16 %v5672_v11, %v5671_v12  ;;  %v2497_v12 = vsel %vm287_vm0, %v7837_v10, 0  ;;  %v5860_v11 = vld [vmem:[%s8542_s2 + $0x2c] sm:$0x3]  ;;  %v3624_v10 = vld [vmem:[%s7357_s15 + $0xd4] sm:$0xff] }
  0xea   : > { %6478 = vmatmul.mubr.msk.bf16.gmra.mrb[36].mxu0 %vm262_vm1, %v2181_v17  ;;  %v391_v31 = vmax.f32 %v337_v27, 0.0 }
  0xeb   : > { %6622 = vmatmul.mubr.msk.bf16.gmra.mrb[20].mxu1 %vm262_vm1, %v3336_v20  ;;  %6481 = vmatprep.mubr.msk.bf16.mxu0 %vm262_vm1, %v2182_v21  ;;  %v389_v37 = vmax.f32 %v329_v30, 0.0  ;;  %v3340_v21 = vpack.c.bf16 %v3332_v8, %v3331_v6 }
  0xec   : > { %6625 = vmatprep.mubr.msk.bf16.mxu1 %vm262_vm1, %v3337_v25  ;;  %v7861_v39 = vpack.c.bf16 %v391_v31, %v390_v26  ;;  %v3633_v26 = vpack.c.bf16 %v3618_v16, %v3617_v15  ;;  %v5721_v16 = vld [vmem:[%s8542_s2 + $0x1c] sm:$0x3] }
  0xed   : > { %v7865_v44 = vpack.c.bf16 %v389_v37, %v388_v29  ;;  %v6263_v48 = vpop.f32.mrb[4].mxu0  ;;  %v3619_v37 = vld [vmem:[%s7357_s15 + $0x5c] sm:$0xff] }
  0xee   : > { %v350_v51 = vadd.f32 %v6263_v48, %v7821_v4  ;;  %v341_v52 = vpop.f32.mrb[5].mxu0 }
  0xef   : > { %v342_v55 = vadd.f32 %v341_v52, %v7821_v4  ;;  %v6264_v56 = vpop.f32.mrb[6].mxu0 }
  0xf0   : > { %v394_v59 = vmax.f32 %v350_v51, 0.0  ;;  %v353_v60 = vadd.f32 %v6264_v56, %v7821_v4  ;;  %v344_v58 = vpop.f32.mrb[7].mxu0  ;;  %v3622_v51 = vld [vmem:[%s7357_s15 + $0x9c] sm:$0xff]  ;;  %v3634_v56 = vpack.c.bf16 %v3620_v40, %v3619_v37 }
  0xf1   : > { %v392_v2 = vmax.f32 %v342_v55, 0.0  ;;  %v345_v61 = vadd.f32 %v344_v58, %v7821_v4  ;;  %v3630_v37 = vld [vmem:[%s7357_s15 + $0xbfc] sm:$0xff] }
  0xf2   : > { %6482 = vmatmul.mubr.msk.bf16.gmra.mrb[40].mxu0 %vm262_vm1, %v2183_v47  ;;  %v395_v63 = vmax.f32 %v353_v60, 0.0  ;;  %v3621_v47 = vld [vmem:[%s7357_s15 + $0x94] sm:$0xff] }
  0xf3   : > { %6626 = vmatmul.mubr.msk.bf16.gmra.mrb[24].mxu1 %vm262_vm1, %v3338_v53  ;;  %6485 = vmatprep.mubr.msk.bf16.mxu0 %vm262_vm1, %v2184_v54  ;;  %v393_v5 = vmax.f32 %v345_v61, 0.0  ;;  %v2345_v53 = vpack.c.bf16 %v5674_v36, %v5673_v34  ;;  %v3635_v58 = vpack.c.bf16 %v3622_v51, %v3621_v47  ;;  %v5684_v34 = vld [vmem:[%s7357_s15 + $0xfce] sm:$0xff]  ;;  %v5685_v47 = vld [vmem:[%s7357_s15 + $0xffe] sm:$0xff]  ;;  %v5686_v51 = vld [vmem:[%s7357_s15 + $0x1006] sm:$0xff] }
  0xf4   : > { %6629 = vmatprep.mubr.msk.bf16.mxu1 %vm262_vm1, %v3339_v57  ;;  %v7881_v7 = vpack.c.bf16 %v395_v63, %v394_v59  ;;  %v2346_v57 = vpack.c.bf16 %v5676_v46, %v5675_v45  ;;  %v3629_v36 = vld [vmem:[%s7357_s15 + $0xbf4] sm:$0xff] }
  0xf5   : > { %v7885_v13 = vpack.c.bf16 %v393_v5, %v392_v2  ;;  %v6267_v17 = vpop.f32.mrb[8].mxu0  ;;  %v5677_v5 = vld [vmem:[%s7357_s15 + $0x49e] sm:$0xff]  ;;  %v3639_v46 = vpack.c.bf16 %v3630_v37, %v3629_v36  ;;  %v5710_v36 = vld [vmem:[%s7357_s15 + $0x486] sm:$0xff] }
  0xf6   : > { %v366_v19 = vadd.f32 %v6267_v17, %v7821_v4  ;;  %v357_v20 = vpop.f32.mrb[9].mxu0 }
  0xf7   : > { %v358_v23 = vadd.f32 %v357_v20, %v7821_v4  ;;  %v6268_v25 = vpop.f32.mrb[10].mxu0 }
  0xf8   : > { %v398_v27 = vmax.f32 %v366_v19, 0.0  ;;  %v369_v28 = vadd.f32 %v6268_v25, %v7821_v4  ;;  %v360_v29 = vpop.f32.mrb[11].mxu0  ;;  %v5680_v19 = vld [vmem:[%s7357_s15 + $0xf5e] sm:$0xff]  ;;  %v3636_v25 = vpack.c.bf16 %v3624_v10, %v3623_v0  ;;  %v5845_v10 = vld [vmem:[%s7357_s15 + $0xf88] sm:$0xff] }
  0xf9   : > { %v396_v30 = vmax.f32 %v358_v23, 0.0  ;;  %v361_v31 = vadd.f32 %v360_v29, %v7821_v4  ;;  %v5682_v29 = vld [vmem:[%s7357_s15 + $0xf96] sm:$0xff] }
  0xfa   : > { %6486 = vmatmul.mubr.msk.bf16.gmra.mrb[44].mxu0 %vm262_vm1, %v2185_v18  ;;  %v399_v32 = vmax.f32 %v369_v28, 0.0  ;;  %v5679_v18 = vld [vmem:[%s7357_s15 + $0xf56] sm:$0xff]  ;;  %v5681_v28 = vld [vmem:[%s7357_s15 + $0xf8e] sm:$0xff] }
  0xfb   : > { %6630 = vmatmul.mubr.msk.bf16.gmra.mrb[28].mxu1 %vm262_vm1, %v3340_v21  ;;  %6491 = vmatprep.mubr.msk.bf16.mxu0 %vm262_vm1, %v2344_v22  ;;  %v397_v38 = vmax.f32 %v361_v31, 0.0  ;;  %v3625_v21 = vld [vmem:[%s7357_s15 + $0xb84] sm:$0xff]  ;;  %v3626_v22 = vld [vmem:[%s7357_s15 + $0xb8c] sm:$0xff]  ;;  %v5844_v0 = vld [vmem:[%s7357_s15 + $0xf58] sm:$0xff] }
  0xfc   : > { %6635 = vmatprep.mubr.msk.bf16.mxu1 %vm262_vm1, %v3633_v26  ;;  %v7901_v43 = vpack.c.bf16 %v399_v32, %v398_v27  ;;  %v2348_v26 = vpack.c.bf16 %v5680_v19, %v5679_v18  ;;  %v3637_v27 = vpack.c.bf16 %v3626_v22, %v3625_v21  ;;  %v3628_v31 = vld [vmem:[%s7357_s15 + $0xbc4] sm:$0xff]  ;;  %v5846_v18 = vld [vmem:[%s7357_s15 + $0xf90] sm:$0xff] }
  0xfd   : > { %v7905_v48 = vpack.c.bf16 %v397_v38, %v396_v30  ;;  %v6271_v52 = vpop.f32.mrb[12].mxu0  ;;  %v3627_v30 = vld [vmem:[%s7357_s15 + $0xbbc] sm:$0xff]  ;;  %v5683_v32 = vld [vmem:[%s7357_s15 + $0xfc6] sm:$0xff]  ;;  %v2349_v38 = vpack.c.bf16 %v5682_v29, %v5681_v28  ;;  %v3804_v22 = vpack.c.bf16 %v5846_v18, %v5845_v10 }
  0xfe   : > { %v382_v54 = vadd.f32 %v6271_v52, %v7821_v4  ;;  %v373_v55 = vpop.f32.mrb[13].mxu0  ;;  %v3638_v40 = vpack.c.bf16 %v3628_v31, %v3627_v30  ;;  %v2350_v45 = vpack.c.bf16 %v5684_v34, %v5683_v32  ;;  %v3631_v52 = vld [vmem:[%s7357_s15 + $0xc2c] sm:$0xff]  ;;  %v5847_v19 = vld [vmem:[%s7357_s15 + $0xfc0] sm:$0xff]  ;;  %v5706_v28 = vld [vmem:[%s7357_s15 + $0x416] sm:$0xff] }
  0xff   : > { %v374_v59 = vadd.f32 %v373_v55, %v7821_v4  ;;  %v6272_v60 = vpop.f32.mrb[14].mxu0  ;;  %v5836_v55 = vld [vmem:[%s7357_s15 + $0x3f8] sm:$0xff]  ;;  %v5848_v21 = vld [vmem:[%s7357_s15 + $0xfc8] sm:$0xff] }
 0x100   : > { %v402_v2 = vmax.f32 %v382_v54, 0.0  ;;  %v385_v61 = vadd.f32 %v6272_v60, %v7821_v4  ;;  %v376_v63 = vpop.f32.mrb[15].mxu0  ;;  %v5835_v54 = vld [vmem:[%s7357_s15 + $0x3f0] sm:$0xff]  ;;  %v5837_v60 = vld [vmem:[%s7357_s15 + $0x428] sm:$0xff]  ;;  %v5709_v34 = vld [vmem:[%s7357_s15 + $0x47e] sm:$0xff] }
 0x101   : > { %v400_v3 = vmax.f32 %v374_v59, 0.0  ;;  %v377_v6 = vadd.f32 %v376_v63, %v7821_v4  ;;  %v5678_v4 = vld [vmem:[%s7357_s15 + $0x4a6] sm:$0xff]  ;;  %v3799_v59 = vpack.c.bf16 %v5836_v55, %v5835_v54  ;;  %v5708_v32 = vld [vmem:[%s7357_s15 + $0x44e] sm:$0xff] }
 0x102   : > { %6492 = vmatmul.mubr.msk.bf16.vlgmr.msra.gmra.mrb[32].mxu0 %vm262_vm1, %v2345_v53  ;;  %v403_v8 = vmax.f32 %v385_v61, 0.0  ;;  %v2347_v23 = vpack.c.bf16 %v5678_v4, %v5677_v5  ;;  %v3632_v53 = vld [vmem:[%s7357_s15 + $0xc34] sm:$0xff]  ;;  %v5840_v61 = vld [vmem:[%s7357_s15 + $0x468] sm:$0xff] }
 0x103   : > { %6636 = vmatmul.mubr.msk.bf16.vlgmr.msra.gmra.mrb[16].mxu1 %vm262_vm1, %v3634_v56  ;;  %6495 = vmatprep.mubr.msk.bf16.mxu0 %vm262_vm1, %v2346_v57  ;;  %v401_v15 = vmax.f32 %v377_v6, 0.0  ;;  %v2351_v56 = vpack.c.bf16 %v5686_v51, %v5685_v47  ;;  %v3640_v57 = vpack.c.bf16 %v3632_v53, %v3631_v52  ;;  %v2663_v6 = vsel %vm287_vm0, %v5721_v16, 0  ;;  %v5885_v5 = vld [vmem:[%s8542_s2 + $0x2e] sm:$0x3]  ;;  %v5843_v4 = vld [vmem:[%s7357_s15 + $0xf50] sm:$0xff]  ;;  %v5707_v31 = vld [vmem:[%s7357_s15 + $0x446] sm:$0xff] }
 0x104   : > { %6652 = vmatpush3.bf16.msra.mxu1 %v3834_v1  ;;  %6639 = vmatprep.mubr.msk.bf16.mxu1 %vm262_vm1, %v3635_v58  ;;  %v7931_v17 = vpack.c.bf16 %v403_v8, %v402_v2  ;;  %v5838_v58 = vld [vmem:[%s7357_s15 + $0x430] sm:$0xff]  ;;  %v5839_v2 = vld [vmem:[%s7357_s15 + $0x460] sm:$0xff]  ;;  %v5748_v8 = vld [vmem:[%s8542_s2 + $0x1e] sm:$0x3]  ;;  %v2629_v37 = vpack.c.bf16 %v5708_v32, %v5707_v31 }
 0x105   : > { %v7935_v20 = vpack.c.bf16 %v401_v15, %v400_v3  ;;  %6508 = vmatpush3.bf16.msra.mxu0 %v2497_v12  ;;  %7201 = vmatprep.subr.msk.bf16.mxu1 %vm287_vm0, %v5860_v11  ;;  %v3800_v63 = vpack.c.bf16 %v5838_v58, %v5837_v60  ;;  %v3801_v1 = vpack.c.bf16 %v5840_v61, %v5839_v2  ;;  %v3952_v3 = vsel %vm287_vm0, %v5860_v11, 0  ;;  %v5841_v12 = vld [vmem:[%s7357_s15 + $0x498] sm:$0xff]  ;;  %v5842_v11 = vld [vmem:[%s7357_s15 + $0x4a0] sm:$0xff]  ;;  %v5713_v52 = vld [vmem:[%s7357_s15 + $0xf6e] sm:$0xff] }
 0x106   : > { %7193 = vmatprep.subr.msk.bf16.mxu0 %vm287_vm0, %v5721_v16  ;;  %v3802_v15 = vpack.c.bf16 %v5842_v11, %v5841_v12  ;;  %v3803_v16 = vpack.c.bf16 %v5844_v0, %v5843_v4  ;;  %v5712_v47 = vld [vmem:[%s7357_s15 + $0x4be] sm:$0xff]  ;;  %v5714_v53 = vld [vmem:[%s7357_s15 + $0xf76] sm:$0xff]  ;;  %v5716_v55 = vld [vmem:[%s7357_s15 + $0xfae] sm:$0xff] }
 0x107   : > { %v5773_v51 = vld [vmem:[%s8542_s2 + $0x20] sm:$0x3]  ;;  %v2632_v54 = vpack.c.bf16 %v5714_v53, %v5713_v52  ;;  %v5732_v2 = vld [vmem:[%s7357_s15 + $0x696] sm:$0xff]  ;;  %v5734_v12 = vld [vmem:[%s7357_s15 + $0x6ce] sm:$0xff] }
 0x108   : > { %v5720_v58 = vld [vmem:[%s7357_s15 + $0x101e] sm:$0xff]  ;;  %v5735_v11 = vld [vmem:[%s7357_s15 + $0x6d6] sm:$0xff]  ;;  %v5871_v4 = vld [vmem:[%s7357_s15 + $0x44c] sm:$0xff] }
 0x109   : > { %v5872_v0 = vld [vmem:[%s7357_s15 + $0x454] sm:$0xff]  ;;  %v5873_v18 = vld [vmem:[%s7357_s15 + $0x484] sm:$0xff]  ;;  %v8100_v31 = vld [vmem:[%s8542_s2 + $0x32] sm:$0x3] }
 0x10a   : > { %6496 = vmatmul.mubr.msk.bf16.gmra.mrb[36].mxu0 %vm262_vm1, %v2347_v23  ;;  %v3805_v23 = vpack.c.bf16 %v5848_v21, %v5847_v19  ;;  %v5874_v19 = vld [vmem:[%s7357_s15 + $0x48c] sm:$0xff] }
 0x10b   : > { %6640 = vmatmul.mubr.msk.bf16.gmra.mrb[20].mxu1 %vm262_vm1, %v3636_v25  ;;  %6499 = vmatprep.mubr.msk.bf16.mxu0 %vm262_vm1, %v2348_v26  ;;  %v5849_v25 = vld [vmem:[%s7357_s15 + $0xff8] sm:$0xff]  ;;  %v5850_v26 = vld [vmem:[%s7357_s15 + $0x1000] sm:$0xff] }
 0x10c   : > { %6643 = vmatprep.mubr.msk.bf16.mxu1 %vm262_vm1, %v3637_v27  ;;  %v5705_v27 = vld [vmem:[%s7357_s15 + $0x40e] sm:$0xff]  ;;  %v3806_v29 = vpack.c.bf16 %v5850_v26, %v5849_v25  ;;  %v5739_v32 = vld [vmem:[%s7357_s15 + $0x746] sm:$0xff] }
 0x10d   : > { %v2628_v30 = vpack.c.bf16 %v5706_v28, %v5705_v27  ;;  %v4085_v27 = vpack.c.bf16 %v5874_v19, %v5873_v18  ;;  %v5884_v18 = vld [vmem:[%s7357_s15 + $0x1024] sm:$0xff] }
 0x10e   : > { %v5757_v19 = vld [vmem:[%s7357_s15 + $0x6a2] sm:$0xff] }
 0x112   : > { %6500 = vmatmul.mubr.msk.bf16.gmra.mrb[40].mxu0 %vm262_vm1, %v2349_v38  ;;  %v2630_v38 = vpack.c.bf16 %v5710_v36, %v5709_v34  ;;  %v5875_v34 = vld [vmem:[%s7357_s15 + $0x4bc] sm:$0xff] }
 0x113   : > { %6644 = vmatmul.mubr.msk.bf16.gmra.mrb[24].mxu1 %vm262_vm1, %v3638_v40  ;;  %6503 = vmatprep.mubr.msk.bf16.mxu0 %vm262_vm1, %v2350_v45  ;;  %v4118_v40 = vsel %vm287_vm0, %v5885_v5, 0  ;;  %v2832_v45 = vsel %vm287_vm0, %v5748_v8, 0  ;;  %v8109_v36 = vld [vmem:[%s8542_s2 + $0x22] sm:$0x3] }
 0x114   : > { %6647 = vmatprep.mubr.msk.bf16.mxu1 %vm262_vm1, %v3639_v46  ;;  %v5912_v46 = vld [vmem:[%s8542_s2 + $0x30] sm:$0x3] }
 0x115   : > { %v4287_v28 = vsel %vm287_vm0, %v5912_v46, 0 }
 0x11a   : > { %6504 = vmatmul.mubr.msk.bf16.gmra.mrb[44].mxu0 %vm262_vm1, %v2351_v56  ;;  %v5717_v56 = vld [vmem:[%s7357_s15 + $0xfde] sm:$0xff] }
 0x11b   : > { %6648 = vmatmul.mubr.msk.bf16.gmra.mrb[28].mxu1 %vm262_vm1, %v3640_v57  ;;  %6509 = vmatprep.mubr.msk.bf16.mxu0 %vm262_vm1, %v7367_v9  ;;  %v5718_v57 = vld [vmem:[%s7357_s15 + $0xfe6] sm:$0xff] }
 0x11c   : > { %6653 = vmatprep.mubr.msk.bf16.mxu1 %vm262_vm1, %v3799_v59  ;;  %v2634_v60 = vpack.c.bf16 %v5718_v57, %v5717_v56  ;;  %v5743_v56 = vld [vmem:[%s7357_s15 + $0x1236] sm:$0xff]  ;;  %v5879_v57 = vld [vmem:[%s7357_s15 + $0xfac] sm:$0xff] }
 0x122   : > { %6510 = vmatmul.mubr.msk.bf16.vlgmr.msra.gmra.mrb[32].mxu0 %vm262_vm1, %v7372_v14 }
 0x123   : > { %6654 = vmatmul.mubr.msk.bf16.vlgmr.msra.gmra.mrb[16].mxu1 %vm262_vm1, %v3800_v63  ;;  %6513 = vmatprep.mubr.msk.bf16.mxu0 %vm262_vm1, %v7387_v24  ;;  %v5869_v63 = vld [vmem:[%s7357_s15 + $0x414] sm:$0xff] }
 0x124   : > { %6670 = vmatpush3.bf16.msra.mxu1 %v3952_v3  ;;  %6657 = vmatprep.mubr.msk.bf16.mxu1 %vm262_vm1, %v3801_v1  ;;  %v5870_v1 = vld [vmem:[%s7357_s15 + $0x41c] sm:$0xff] }
 0x125   : > { %6526 = vmatpush3.bf16.msra.mxu0 %v2663_v6  ;;  %7202 = vmatprep.subr.msk.bf16.mxu1 %vm287_vm0, %v5885_v5 }
 0x126   : > { %7194 = vmatprep.subr.msk.bf16.mxu0 %vm287_vm0, %v5748_v8  ;;  %v4083_v8 = vpack.c.bf16 %v5870_v1, %v5869_v63 }
 0x12a   : > { %6514 = vmatmul.mubr.msk.bf16.gmra.mrb[36].mxu0 %vm262_vm1, %v7403_v33 }
 0x12b   : > { %6658 = vmatmul.mubr.msk.bf16.gmra.mrb[20].mxu1 %vm262_vm1, %v3802_v15  ;;  %6517 = vmatprep.mubr.msk.bf16.mxu0 %vm262_vm1, %v7405_v35  ;;  %v5736_v15 = vld [vmem:[%s7357_s15 + $0x706] sm:$0xff] }
 0x12c   : > { %6661 = vmatprep.mubr.msk.bf16.mxu1 %vm262_vm1, %v3803_v16  ;;  %v5737_v16 = vld [vmem:[%s7357_s15 + $0x70e] sm:$0xff] }
 0x12d   : > { %v2799_v25 = vpack.c.bf16 %v5737_v16, %v5736_v15  ;;  %v5747_v15 = vld [vmem:[%s7357_s15 + $0x12a6] sm:$0xff]  ;;  %v5883_v16 = vld [vmem:[%s7357_s15 + $0x101c] sm:$0xff] }
 0x132   : > { %6518 = vmatmul.mubr.msk.bf16.gmra.mrb[40].mxu0 %vm262_vm1, %v7422_v41 }
 0x133   : > { %6662 = vmatmul.mubr.msk.bf16.gmra.mrb[24].mxu1 %vm262_vm1, %v3804_v22  ;;  %6521 = vmatprep.mubr.msk.bf16.mxu0 %vm262_vm1, %v7424_v42 }
 0x134   : > { %6665 = vmatprep.mubr.msk.bf16.mxu1 %vm262_vm1, %v3805_v23  ;;  %v4084_v23 = vpack.c.bf16 %v5872_v0, %v5871_v4  ;;  %v1825_v4 = vsub.s32 1, %v7797_v50  ;;  %v5746_v0 = vld [vmem:[%s7357_s15 + $0x129e] sm:$0xff] }
 0x13a   : > { %6522 = vmatmul.mubr.msk.bf16.gmra.mrb[44].mxu0 %vm262_vm1, %v7443_v49 }
 0x13b   : > { %6666 = vmatmul.mubr.msk.bf16.gmra.mrb[28].mxu1 %vm262_vm1, %v3806_v29  ;;  %6527 = vmatprep.mubr.msk.bf16.mxu0 %vm262_vm1, %v2628_v30  ;;  %v5738_v29 = vld [vmem:[%s7357_s15 + $0x73e] sm:$0xff]  ;;  %v2998_v30 = vsel %vm287_vm0, %v5773_v51, 0 }
 0x13c   : > { %6671 = vmatprep.mubr.msk.bf16.mxu1 %vm262_vm1, %v7367_v9  ;;  %v5711_v9 = vld [vmem:[%s7357_s15 + $0x4b6] sm:$0xff] }
 0x142   : > { %6528 = vmatmul.mubr.msk.bf16.vlgmr.msra.gmra.mrb[32].mxu0 %vm262_vm1, %v2629_v37  ;;  %v5876_v37 = vld [vmem:[%s7357_s15 + $0x4c4] sm:$0xff] }
 0x143   : > { %6672 = vmatmul.mubr.msk.bf16.vlgmr.msra.gmra.mrb[16].mxu1 %vm262_vm1, %v7372_v14  ;;  %6531 = vmatprep.mubr.msk.bf16.mxu0 %vm262_vm1, %v2630_v38  ;;  %v2631_v14 = vpack.c.bf16 %v5712_v47, %v5711_v9  ;;  %v5740_v38 = vld [vmem:[%s7357_s15 + $0x11f6] sm:$0xff]  ;;  %v4086_v53 = vpack.c.bf16 %v5876_v37, %v5875_v34  ;;  %v4090_v34 = vpack.c.bf16 %v5884_v18, %v5883_v16 }
 0x144   : > { %6688 = vmatpush3.bf16.msra.mxu1 %v4118_v40  ;;  %6675 = vmatprep.mubr.msk.bf16.mxu1 %vm262_vm1, %v7387_v24  ;;  %v5715_v24 = vld [vmem:[%s7357_s15 + $0xfa6] sm:$0xff]  ;;  %v5741_v40 = vld [vmem:[%s7357_s15 + $0x11fe] sm:$0xff] }
 0x145   : > { %6544 = vmatpush3.bf16.msra.mxu0 %v2832_v45  ;;  %7203 = vmatprep.subr.msk.bf16.mxu1 %vm287_vm0, %v5912_v46  ;;  %v2633_v59 = vpack.c.bf16 %v5716_v55, %v5715_v24  ;;  %v5877_v46 = vld [vmem:[%s7357_s15 + $0xf74] sm:$0xff]  ;;  %v5878_v9 = vld [vmem:[%s7357_s15 + $0xf7c] sm:$0xff] }
 0x146   : > { %7195 = vmatprep.subr.msk.bf16.mxu0 %vm287_vm0, %v5773_v51  ;;  %v2800_v51 = vpack.c.bf16 %v5739_v32, %v5738_v29  ;;  %v4087_v24 = vpack.c.bf16 %v5878_v9, %v5877_v46  ;;  %v5742_v55 = vld [vmem:[%s7357_s15 + $0x122e] sm:$0xff]  ;;  %v2804_v29 = vpack.c.bf16 %v5747_v15, %v5746_v0 }
 0x147   : > { %v2802_v1 = vpack.c.bf16 %v5743_v56, %v5742_v55  ;;  %v5898_v55 = vld [vmem:[%s7357_s15 + $0x818] sm:$0xff] }
 0x14a   : > { %6532 = vmatmul.mubr.msk.bf16.gmra.mrb[36].mxu0 %vm262_vm1, %v2631_v14  ;;  %v2801_v14 = vpack.c.bf16 %v5741_v40, %v5740_v38 }
 0x14b   : > { %6676 = vmatmul.mubr.msk.bf16.gmra.mrb[20].mxu1 %vm262_vm1, %v7403_v33  ;;  %6535 = vmatprep.mubr.msk.bf16.mxu0 %vm262_vm1, %v2632_v54  ;;  %v5719_v33 = vld [vmem:[%s7357_s15 + $0x1016] sm:$0xff] }
 0x14c   : > { %6679 = vmatprep.mubr.msk.bf16.mxu1 %vm262_vm1, %v7405_v35  ;;  %v5733_v35 = vld [vmem:[%s7357_s15 + $0x69e] sm:$0xff]  ;;  %v2635_v3 = vpack.c.bf16 %v5720_v58, %v5719_v33  ;;  %v5745_v33 = vld [vmem:[%s7357_s15 + $0x126e] sm:$0xff] }
 0x14d   : > { %v2797_v5 = vpack.c.bf16 %v5733_v35, %v5732_v2  ;;  %v5881_v2 = vld [vmem:[%s7357_s15 + $0xfe4] sm:$0xff]  ;;  %v5882_v35 = vld [vmem:[%s7357_s15 + $0xfec] sm:$0xff] }
 0x152   : > { %6536 = vmatmul.mubr.msk.bf16.gmra.mrb[40].mxu0 %vm262_vm1, %v2633_v59  ;;  %v5880_v59 = vld [vmem:[%s7357_s15 + $0xfb4] sm:$0xff] }
 0x153   : > { %6680 = vmatmul.mubr.msk.bf16.gmra.mrb[24].mxu1 %vm262_vm1, %v7422_v41  ;;  %6539 = vmatprep.mubr.msk.bf16.mxu0 %vm262_vm1, %v2634_v60  ;;  %v5744_v60 = vld [vmem:[%s7357_s15 + $0x1266] sm:$0xff] }
 0x154   : > { %6683 = vmatprep.mubr.msk.bf16.mxu1 %vm262_vm1, %v7424_v42 }
 0x155   : > { %v8062_v61 = vpop.f32.mrb[24].mxu0 }
 0x156   : > { %v8066_v41 = vpop.f32.mrb[25].mxu0 }
 0x157   : > { %v8068_v6 = vpop.f32.mrb[26].mxu0 }
 0x158   : > { %v8070_v42 = vpop.f32.mrb[27].mxu0 }
 0x15a   : > { %6540 = vmatmul.mubr.msk.bf16.gmra.mrb[44].mxu0 %vm262_vm1, %v2635_v3 }
 0x15b   : > { %6684 = vmatmul.mubr.msk.bf16.gmra.mrb[28].mxu1 %vm262_vm1, %v7443_v49  ;;  %6545 = vmatprep.mubr.msk.bf16.mxu0 %vm262_vm1, %v2797_v5  ;;  %v2798_v49 = vpack.c.bf16 %v5735_v11, %v5734_v12  ;;  %v4088_v5 = vpack.c.bf16 %v5880_v59, %v5879_v57  ;;  %v4089_v11 = vpack.c.bf16 %v5882_v35, %v5881_v2  ;;  %v5761_v57 = vld [vmem:[%s7357_s15 + $0x712] sm:$0xff]  ;;  %v5762_v59 = vld [vmem:[%s7357_s15 + $0x71a] sm:$0xff] }
 0x15c   : > { %6689 = vmatprep.mubr.msk.bf16.mxu1 %vm262_vm1, %v4083_v8  ;;  %v2803_v8 = vpack.c.bf16 %v5745_v33, %v5744_v60  ;;  %v5900_v33 = vld [vmem:[%s7357_s15 + $0x850] sm:$0xff]  ;;  %v5901_v2 = vld [vmem:[%s7357_s15 + $0x858] sm:$0xff]  ;;  %v2965_v16 = vpack.c.bf16 %v5762_v59, %v5761_v57 }
 0x15d   : > { %v8083_v10 = vpop.f32.mrb[28].mxu0 }
 0x15e   : > { %v8087_v21 = vpop.f32.mrb[29].mxu0 }
 0x15f   : > { %v8089_v22 = vpop.f32.mrb[30].mxu0 }
 0x160   : > { %v8091_v26 = vpop.f32.mrb[31].mxu0 }
 0x162   : > { %6546 = vmatmul.mubr.msk.bf16.vlgmr.msra.gmra.mrb[32].mxu0 %vm262_vm1, %v2798_v49  ;;  %v5758_v49 = vld [vmem:[%s7357_s15 + $0x6aa] sm:$0xff] }
 0x163   : > { %6690 = vmatmul.mubr.msk.bf16.vlgmr.msra.gmra.mrb[16].mxu1 %vm262_vm1, %v4084_v23  ;;  %6549 = vmatprep.mubr.msk.bf16.mxu0 %vm262_vm1, %v2799_v25  ;;  %v8149_v23 = vrot.slane %v7814_v62, %v1825_v4  ;;  %v5896_v25 = vld [vmem:[%s7357_s15 + $0x7e0] sm:$0xff]  ;;  %v2963_v37 = vpack.c.bf16 %v5758_v49, %v5757_v19 }
 0x164   : > { %6706 = vmatpush3.bf16.msra.mxu1 %v4287_v28  ;;  %6693 = vmatprep.mubr.msk.bf16.mxu1 %vm262_vm1, %v4085_v27  ;;  %v5897_v27 = vld [vmem:[%s7357_s15 + $0x7e8] sm:$0xff] }
 0x165   : > { %v6331_v45 = vpop.f32.mrb[16].mxu0  ;;  %6562 = vmatpush3.bf16.msra.mxu0 %v2998_v30  ;;  %7204 = vmatprep.subr.msk.bf16.mxu1 %vm287_vm0, %v8100_v31  ;;  %v4252_v46 = vpack.c.bf16 %v5897_v27, %v5896_v25  ;;  %v4254_v25 = vpack.c.bf16 %v5901_v2, %v5900_v33 }
 0x166   : > { %v959_v47 = vpop.f32.mrb[17].mxu0  ;;  %7196 = vmatprep.subr.msk.bf16.mxu0 %vm287_vm0, %v8109_v36 }
 0x167   : > { %v6332_v52 = vpop.f32.mrb[18].mxu0 }
 0x168   : > { %v962_v54 = vpop.f32.mrb[19].mxu0 }
 0x16a   : > { %6550 = vmatmul.mubr.msk.bf16.gmra.mrb[36].mxu0 %vm262_vm1, %v2800_v51 }
 0x16b   : > { %6694 = vmatmul.mubr.msk.bf16.gmra.mrb[20].mxu1 %vm262_vm1, %v4086_v53  ;;  %6553 = vmatprep.mubr.msk.bf16.mxu0 %vm262_vm1, %v2801_v14 }
 0x16c   : > { %6697 = vmatprep.mubr.msk.bf16.mxu1 %vm262_vm1, %v4087_v24  ;;  %v5760_v24 = vld [vmem:[%s7357_s15 + $0x6e2] sm:$0xff] }
 0x16d   : > { %v6335_v58 = vpop.f32.mrb[20].mxu0 }
 0x16e   : > { %v975_v63 = vpop.f32.mrb[21].mxu0 }
 0x16f   : > { %v8133_v3 = vpop.f32.mrb[22].mxu0 }
 0x170   : > { %v8135_v12 = vpop.f32.mrb[23].mxu0 }
 0x172   : > { %6554 = vmatmul.mubr.msk.bf16.gmra.mrb[40].mxu0 %vm262_vm1, %v2802_v1 }
 0x173   : > { %6698 = vmatmul.mubr.msk.bf16.gmra.mrb[24].mxu1 %vm262_vm1, %v4088_v5  ;;  %6557 = vmatprep.mubr.msk.bf16.mxu0 %vm262_vm1, %v2803_v8 }
 0x174   : > { %6701 = vmatprep.mubr.msk.bf16.mxu1 %vm262_vm1, %v4089_v11 }
 0x176   : > { %v6421_v28 = vpop.f32.mrb[8].mxu1 }
 0x177   : > { %v6793_v30 = vadd.f32 %v6421_v28, %v6331_v45  ;;  %v1744_v32 = vpop.f32.mrb[9].mxu1 }
 0x178   : > { %v6794_v38 = vadd.f32 %v1744_v32, %v959_v47  ;;  %v6422_v40 = vpop.f32.mrb[10].mxu1  ;;  %v5759_v47 = vld [vmem:[%s7357_s15 + $0x6da] sm:$0xff]  ;;  %v5763_v32 = vld [vmem:[%s7357_s15 + $0x74a] sm:$0xff] }
 0x179   : > { %v1829_v9 = vadd.f32 %v6793_v30, %v8149_v23  ;;  %v6795_v62 = vadd.f32 %v6422_v40, %v6332_v52  ;;  %v1747_v51 = vpop.f32.mrb[11].mxu1  ;;  %v5899_v52 = vld [vmem:[%s7357_s15 + $0x820] sm:$0xff]  ;;  %v2964_v8 = vpack.c.bf16 %v5760_v24, %v5759_v47 }
 0x17a   : > { %v1827_v53 = vadd.f32 %v6794_v38, %v8149_v23  ;;  %v6796_v45 = vadd.f32 %v1747_v51, %v962_v54  ;;  %6558 = vmatmul.mubr.msk.bf16.gmra.mrb[44].mxu0 %vm262_vm1, %v2804_v29  ;;  %v4253_v15 = vpack.c.bf16 %v5899_v52, %v5898_v55  ;;  %v5765_v40 = vld [vmem:[%s7357_s15 + $0x1202] sm:$0xff] }
 0x17b   : > { %v1830_v14 = vadd.f32 %v6795_v62, %v8149_v23  ;;  %6702 = vmatmul.mubr.msk.bf16.gmra.mrb[28].mxu1 %vm262_vm1, %v4090_v34  ;;  %6563 = vmatprep.mubr.msk.bf16.mxu0 %vm262_vm1, %v2963_v37  ;;  %v1845_v54 = vmax.f32 %v1829_v9, 0.0  ;;  %v5902_v37 = vld [vmem:[%s7357_s15 + $0x888] sm:$0xff]  ;;  %v5904_v51 = vld [vmem:[%s7357_s15 + $0x1340] sm:$0xff] }
 0x17c   : > { %v1828_v56 = vadd.f32 %v6796_v45, %v8149_v23  ;;  %6707 = vmatprep.mubr.msk.bf16.mxu1 %vm262_vm1, %v4252_v46  ;;  %v1843_v35 = vmax.f32 %v1827_v53, 0.0  ;;  %v5766_v46 = vld [vmem:[%s7357_s15 + $0x120a] sm:$0xff] }
 0x17d   : > { %v1846_v60 = vmax.f32 %v1830_v14, 0.0  ;;  %v5905_v53 = vld [vmem:[%s7357_s15 + $0x1348] sm:$0xff]  ;;  %v2967_v59 = vpack.c.bf16 %v5766_v46, %v5765_v40 }
 0x17e   : > { %v1844_v1 = vmax.f32 %v1828_v56, 0.0  ;;  %v6425_v5 = vpop.f32.mrb[12].mxu1  ;;  %v4256_v2 = vpack.c.bf16 %v5905_v53, %v5904_v51  ;;  %v5772_v51 = vld [vmem:[%s7357_s15 + $0x12b2] sm:$0xff]  ;;  %v5910_v53 = vld [vmem:[%s7357_s15 + $0x13e8] sm:$0xff] }
 0x17f   : > { %v6797_v11 = vadd.f32 %v6425_v5, %v6335_v58  ;;  %v1760_v4 = vpop.f32.mrb[13].mxu1  ;;  %v4779_v0 = vpack.c.bf16 %v1846_v60, %v1845_v54  ;;  %v4453_v58 = vsel %vm287_vm0, %v8100_v31, 0  ;;  %v5764_v31 = vld [vmem:[%s7357_s15 + $0x752] sm:$0xff] }
 0x180   : > { %v6798_v18 = vadd.f32 %v1760_v4, %v975_v63  ;;  %v6426_v19 = vpop.f32.mrb[14].mxu1  ;;  %v4778_v49 = vpack.c.bf16 %v1844_v1, %v1843_v35  ;;  %v2966_v24 = vpack.c.bf16 %v5764_v31, %v5763_v32  ;;  %v5906_v4 = vld [vmem:[%s7357_s15 + $0x1378] sm:$0xff] }
 0x181   : > { %v1833_v27 = vadd.f32 %v6797_v11, %v8149_v23  ;;  %v6799_v28 = vadd.f32 %v6426_v19, %v8133_v3  ;;  %v1763_v29 = vpop.f32.mrb[15].mxu1  ;;  %4812 = vrot.lane.b32.xlu0 %v4779_v0, %s7266_s14  ;;  %v3164_v3 = vsel %vm287_vm0, %v8109_v36, 0  ;;  %v5903_v36 = vld [vmem:[%s7357_s15 + $0x890] sm:$0xff]  ;;  %v5768_v11 = vld [vmem:[%s7357_s15 + $0x1242] sm:$0xff] }
 0x182   : > { %v1831_v63 = vadd.f32 %v6798_v18, %v8149_v23  ;;  %v6800_v30 = vadd.f32 %v1763_v29, %v8135_v12  ;;  %6564 = vmatmul.mubr.msk.bf16.vlgmr.msra.gmra.mrb[32].mxu0 %vm262_vm1, %v2964_v8  ;;  %v8188_v12 = vld [vmem:[%s8542_s2 + $0x34] sm:$0x3]  ;;  %v4255_v57 = vpack.c.bf16 %v5903_v36, %v5902_v37 }
 0x183   : > { %v1834_v34 = vadd.f32 %v6799_v28, %v8149_v23  ;;  %6708 = vmatmul.mubr.msk.bf16.vlgmr.msra.gmra.mrb[16].mxu1 %vm262_vm1, %v4253_v15  ;;  %6567 = vmatprep.mubr.msk.bf16.mxu0 %vm262_vm1, %v2965_v16  ;;  %v1849_v9 = vmax.f32 %v1833_v27, 0.0  ;;  %v5769_v15 = vld [vmem:[%s7357_s15 + $0x1272] sm:$0xff]  ;;  %v5770_v16 = vld [vmem:[%s7357_s15 + $0x127a] sm:$0xff] }
 0x184   : > { %v1832_v38 = vadd.f32 %v6800_v30, %v8149_v23  ;;  %6724 = vmatpush3.bf16.msra.mxu1 %v4453_v58  ;;  %6711 = vmatprep.mubr.msk.bf16.mxu1 %vm262_vm1, %v4254_v25  ;;  %v1847_v45 = vmax.f32 %v1831_v63, 0.0  ;;  %v5909_v25 = vld [vmem:[%s7357_s15 + $0x13b8] sm:$0xff] }
 0x185   : > { %v1850_v62 = vmax.f32 %v1834_v34, 0.0  ;;  %4810 = vrot.lane.b32.xlu0 %v4778_v49, %s7266_s14  ;;  %6580 = vmatpush3.bf16.msra.mxu0 %v3164_v3  ;;  %v5908_v49 = vld [vmem:[%s7357_s15 + $0x13b0] sm:$0xff]  ;;  %v2969_v34 = vpack.c.bf16 %v5770_v16, %v5769_v15 }
 0x186   : > { %v1848_v14 = vmax.f32 %v1832_v38, 0.0  ;;  %v6429_v47 = vpop.f32.mrb[0].mxu1  ;;  %7205 = vmatprep.subr.msk.bf16.mxu1 %vm287_vm0, %v8188_v12  ;;  %v4258_v36 = vpack.c.bf16 %v5909_v25, %v5908_v49  ;;  %v5789_v49 = vld [vmem:[%s7357_s15 + $0x75e] sm:$0xff] }
 0x187   : > { %v6801_v55 = vadd.f32 %v6429_v47, %v8062_v61  ;;  %v1776_v56 = vpop.f32.mrb[1].mxu1  ;;  %v4781_v52 = vpack.c.bf16 %v1850_v62, %v1849_v9  ;;  %v5783_v47 = vld [vmem:[%s7357_s15 + $0x6b6] sm:$0xff] }
 0x188   : > { %v6802_v54 = vadd.f32 %v1776_v56, %v8066_v41  ;;  %v6430_v60 = vpop.f32.mrb[2].mxu1  ;;  %v4780_v33 = vpack.c.bf16 %v1848_v14, %v1847_v45  ;;  %v5782_v14 = vld [vmem:[%s7357_s15 + $0x6ae] sm:$0xff]  ;;  %v5927_v25 = vld [vmem:[%s7357_s15 + $0x89a] sm:$0xff] }
 0x189   : > { %v1837_v35 = vadd.f32 %v6801_v55, %v8149_v23  ;;  %v6803_v1 = vadd.f32 %v6430_v60, %v8068_v6  ;;  %v1779_v5 = vpop.f32.mrb[3].mxu1  ;;  %4816 = vrot.lane.b32.xlu1 %v4781_v52, %s7266_s14  ;;  %v5767_v6 = vld [vmem:[%s7357_s15 + $0x123a] sm:$0xff]  ;;  %v5921_v56 = vld [vmem:[%s7357_s15 + $0x7f2] sm:$0xff]  ;;  %v3129_v60 = vpack.c.bf16 %v5783_v47, %v5782_v14  ;;  %v5946_v14 = vld [vmem:[%s7357_s15 + $0x804] sm:$0xff] }
 0x18a   : > { %v1835_v61 = vadd.f32 %v6802_v54, %v8149_v23  ;;  %v6804_v8 = vadd.f32 %v1779_v5, %v8070_v42  ;;  %4814 = vrot.lane.b32.xlu0 %v4780_v33, %s7266_s14  ;;  %6568 = vmatmul.mubr.msk.bf16.gmra.mrb[36].mxu0 %vm262_vm1, %v2966_v24  ;;  %v5907_v42 = vld [vmem:[%s7357_s15 + $0x1380] sm:$0xff]  ;;  %v2968_v58 = vpack.c.bf16 %v5768_v11, %v5767_v6  ;;  %v5785_v5 = vld [vmem:[%s7357_s15 + $0x6ee] sm:$0xff] }
 0x18b   : > { %v1838_v41 = vadd.f32 %v6803_v1, %v8149_v23  ;;  %6712 = vmatmul.mubr.msk.bf16.gmra.mrb[20].mxu1 %vm262_vm1, %v4255_v57  ;;  %6571 = vmatprep.mubr.msk.bf16.mxu0 %vm262_vm1, %v2967_v59  ;;  %v1853_v18 = vmax.f32 %v1837_v35, 0.0  ;;  %v4257_v3 = vpack.c.bf16 %v5907_v42, %v5906_v4  ;;  %v5922_v52 = vld [vmem:[%s7357_s15 + $0x7fa] sm:$0xff]  ;;  %v5784_v1 = vld [vmem:[%s7357_s15 + $0x6e6] sm:$0xff] }
 0x18c   : > { %v1836_v0 = vadd.f32 %v6804_v8, %v8149_v23  ;;  %6715 = vmatprep.mubr.msk.bf16.mxu1 %vm262_vm1, %v4256_v2  ;;  %v1851_v27 = vmax.f32 %v1835_v61, 0.0  ;;  %v4418_v2 = vpack.c.bf16 %v5922_v52, %v5921_v56  ;;  %v5923_v61 = vld [vmem:[%s7357_s15 + $0x82a] sm:$0xff]  ;;  %v5924_v8 = vld [vmem:[%s7357_s15 + $0x832] sm:$0xff]  ;;  %v5925_v11 = vld [vmem:[%s7357_s15 + $0x862] sm:$0xff] }
 0x18d   : > { %v1854_v19 = vmax.f32 %v1838_v41, 0.0  ;;  %v5786_v41 = vld [vmem:[%s7357_s15 + $0x71e] sm:$0xff]  ;;  %v5787_v6 = vld [vmem:[%s7357_s15 + $0x726] sm:$0xff]  ;;  %v4419_v42 = vpack.c.bf16 %v5924_v8, %v5923_v61 }
 0x18e   : > { %v1852_v28 = vmax.f32 %v1836_v0, 0.0  ;;  %v6433_v29 = vpop.f32.mrb[4].mxu1  ;;  %v5926_v4 = vld [vmem:[%s7357_s15 + $0x86a] sm:$0xff]  ;;  %v3130_v0 = vpack.c.bf16 %v5785_v5, %v5784_v1  ;;  %v3131_v15 = vpack.c.bf16 %v5787_v6, %v5786_v41  ;;  %v5948_v52 = vld [vmem:[%s7357_s15 + $0x83c] sm:$0xff]  ;;  %v5953_v1 = vld [vmem:[%s7357_s15 + $0x8b4] sm:$0xff] }
 0x18f   : > { %v6805_v63 = vadd.f32 %v6433_v29, %v8083_v10  ;;  %v1792_v30 = vpop.f32.mrb[5].mxu1  ;;  %v4783_v32 = vpack.c.bf16 %v1854_v19, %v1853_v18  ;;  %v4420_v16 = vpack.c.bf16 %v5926_v4, %v5925_v11  ;;  %v4619_v18 = vsel %vm287_vm0, %v8188_v12, 0  ;;  %v5788_v19 = vld [vmem:[%s7357_s15 + $0x756] sm:$0xff]  ;;  %v5947_v47 = vld [vmem:[%s7357_s15 + $0x80c] sm:$0xff]  ;;  %v5954_v5 = vld [vmem:[%s7357_s15 + $0x1364] sm:$0xff] }
 0x190   : > { %v6806_v31 = vadd.f32 %v1792_v30, %v8087_v21  ;;  %v6434_v37 = vpop.f32.mrb[6].mxu1  ;;  %v4782_v38 = vpack.c.bf16 %v1852_v28, %v1851_v27  ;;  %v5928_v27 = vld [vmem:[%s7357_s15 + $0x8a2] sm:$0xff]  ;;  %v5790_v28 = vld [vmem:[%s7357_s15 + $0x120e] sm:$0xff]  ;;  %v5791_v12 = vld [vmem:[%s7357_s15 + $0x1216] sm:$0xff]  ;;  %v4584_v56 = vpack.c.bf16 %v5947_v47, %v5946_v14 }
 0x191   : > { %v1841_v40 = vadd.f32 %v6805_v63, %v8149_v23  ;;  %v6807_v46 = vadd.f32 %v6434_v37, %v8089_v22  ;;  %v1795_v9 = vpop.f32.mrb[7].mxu1  ;;  %4820 = vrot.lane.b32.xlu1 %v4783_v32, %s7266_s14  ;;  %v5771_v22 = vld [vmem:[%s7357_s15 + $0x12aa] sm:$0xff]  ;;  %v5929_v29 = vld [vmem:[%s7357_s15 + $0x1352] sm:$0xff]  ;;  %v3132_v63 = vpack.c.bf16 %v5789_v49, %v5788_v19  ;;  %v4421_v30 = vpack.c.bf16 %v5928_v27, %v5927_v25  ;;  %v5956_v6 = vld [vmem:[%s7357_s15 + $0x139c] sm:$0xff] }
 0x192   : > { %v1839_v10 = vadd.f32 %v6806_v31, %v8149_v23  ;;  %v6808_v62 = vadd.f32 %v1795_v9, %v8091_v26  ;;  %4818 = vrot.lane.b32.xlu0 %v4782_v38, %s7266_s14  ;;  %6572 = vmatmul.mubr.msk.bf16.gmra.mrb[40].mxu0 %vm262_vm1, %v2968_v58  ;;  %v5911_v26 = vld [vmem:[%s7357_s15 + $0x13f0] sm:$0xff]  ;;  %v2970_v54 = vpack.c.bf16 %v5772_v51, %v5771_v22  ;;  %v5930_v58 = vld [vmem:[%s7357_s15 + $0x135a] sm:$0xff]  ;;  %v5957_v11 = vld [vmem:[%s7357_s15 + $0x13a4] sm:$0xff]  ;;  %v3281_v49 = vsub.s32 2, %v7797_v50 }
 0x193   : > { %v1842_v21 = vadd.f32 %v6807_v46, %v8149_v23  ;;  %6716 = vmatmul.mubr.msk.bf16.gmra.mrb[24].mxu1 %vm262_vm1, %v4257_v3  ;;  %6575 = vmatprep.mubr.msk.bf16.mxu0 %vm262_vm1, %v2969_v34  ;;  %v1857_v24 = vmax.f32 %v1841_v40, 0.0  ;;  %v3133_v32 = vpack.c.bf16 %v5791_v12, %v5790_v28  ;;  %v4422_v3 = vpack.c.bf16 %v5930_v58, %v5929_v29  ;;  %v5792_v34 = vld [vmem:[%s7357_s15 + $0x1246] sm:$0xff]  ;;  %v5793_v31 = vld [vmem:[%s7357_s15 + $0x124e] sm:$0xff]  ;;  %v5796_v51 = vld [vmem:[%s7357_s15 + $0x12b6] sm:$0xff] }
 0x194   : > { %v1840_v45 = vadd.f32 %v6808_v62, %v8149_v23  ;;  %6719 = vmatprep.mubr.msk.bf16.mxu1 %vm262_vm1, %v4258_v36  ;;  %v1855_v57 = vmax.f32 %v1839_v10, 0.0  ;;  %v4259_v23 = vpack.c.bf16 %v5911_v26, %v5910_v53  ;;  %v5931_v37 = vld [vmem:[%s7357_s15 + $0x138a] sm:$0xff]  ;;  %v5932_v38 = vld [vmem:[%s7357_s15 + $0x1392] sm:$0xff]  ;;  %v5794_v36 = vld [vmem:[%s7357_s15 + $0x127e] sm:$0xff]  ;;  %v3134_v10 = vpack.c.bf16 %v5793_v31, %v5792_v34 }
 0x195   : > { %v1858_v55 = vmax.f32 %v1842_v21, 0.0  ;;  %v5795_v40 = vld [vmem:[%s7357_s15 + $0x1286] sm:$0xff]  ;;  %v4423_v62 = vpack.c.bf16 %v5932_v38, %v5931_v37  ;;  %v5797_v53 = vld [vmem:[%s7357_s15 + $0x12be] sm:$0xff]  ;;  %v5958_v4 = vld [vmem:[%s7357_s15 + $0x13d4] sm:$0xff] }
 0x196   : > { %v1856_v59 = vmax.f32 %v1840_v45, 0.0  ;;  %v5933_v46 = vld [vmem:[%s7357_s15 + $0x13c2] sm:$0xff]  ;;  %v5934_v9 = vld [vmem:[%s7357_s15 + $0x13ca] sm:$0xff]  ;;  %v3135_v21 = vpack.c.bf16 %v5795_v40, %v5794_v36  ;;  %v5935_v45 = vld [vmem:[%s7357_s15 + $0x13fa] sm:$0xff] }
 0x197   : > { %v8244_v33 = vpack.c.bf16 %v1858_v55, %v1857_v24  ;;  %v4424_v22 = vpack.c.bf16 %v5934_v9, %v5933_v46  ;;  %v5936_v26 = vld [vmem:[%s7357_s15 + $0x1402] sm:$0xff]  ;;  %v3136_v24 = vpack.c.bf16 %v5797_v53, %v5796_v51  ;;  %v5955_v61 = vld [vmem:[%s7357_s15 + $0x136c] sm:$0xff]  ;;  %v7236_v40 = vld [vmem:[%s8543_s3 + $0x18] sm:$0xff]  }
 0x198   : > { %v8246_v35 = vpack.c.bf16 %v1856_v59, %v1855_v57  ;;  %v4425_v55 = vpack.c.bf16 %v5936_v26, %v5935_v45  ;;  %v5949_v57 = vld [vmem:[%s7357_s15 + $0x844] sm:$0xff]  ;;  %v5950_v59 = vld [vmem:[%s7357_s15 + $0x874] sm:$0xff]  ;;  %v4588_v41 = vpack.c.bf16 %v5955_v61, %v5954_v5 }
 0x199   : > { %v7233_v25 = vld [vmem:[%s8543_s3] sm:$0xff]   ;;  %v7234_v29 = vld [vmem:[%s8543_s3 + $0x8] sm:$0xff]   ;;  %v7235_v36 = vld [vmem:[%s8543_s3 + $0x10] sm:$0xff]  }
 0x19a   : > { %6576 = vmatmul.mubr.msk.bf16.gmra.mrb[44].mxu0 %vm262_vm1, %v2970_v54  ;;  %v5951_v54 = vld [vmem:[%s7357_s15 + $0x87c] sm:$0xff]  ;;  %6759 = vmatprep.subr.bf16.mxu0 %v7233_v25  ;;  %v7239_v5 = vld [vmem:[%s8543_s3 + $0x30] sm:$0xff]  }
 0x19b   : > { %6720 = vmatmul.mubr.msk.bf16.gmra.mrb[28].mxu1 %vm262_vm1, %v4259_v23  ;;  %6581 = vmatprep.mubr.msk.bf16.mxu0 %vm262_vm1, %v3129_v60  ;;  %v4585_v23 = vpack.c.bf16 %v5949_v57, %v5948_v52  ;;  %v4586_v60 = vpack.c.bf16 %v5951_v54, %v5950_v59  ;;  %v8327_v27 = vld [vmem:[%s8545_s5] sm:$0x1f]  ;;  %v7238_v52 = vld [vmem:[%s8543_s3 + $0x28] sm:$0xff]  }
 0x19c   : > { %6725 = vmatprep.mubr.msk.bf16.mxu1 %vm262_vm1, %v4418_v2  ;;  %v5952_v2 = vld [vmem:[%s7357_s15 + $0x8ac] sm:$0xff]  ;;  %v8330_v28 = vrot.slane %v8327_v27, %v3281_v49  ;;  %v7237_v53 = vld [vmem:[%s8543_s3 + $0x20] sm:$0xff]  }
 0x19d   : > { %v4587_v8 = vpack.c.bf16 %v5953_v1, %v5952_v2 }
 0x1a2   : > { %6582 = vmatmul.mubr.msk.bf16.vlgmr.msra.gmra.mrb[32].mxu0 %vm262_vm1, %v3130_v0  ;;  %v5959_v0 = vld [vmem:[%s7357_s15 + $0x13dc] sm:$0xff] }
 0x1a3   : > { %6726 = vmatmul.mubr.msk.bf16.vlgmr.msra.gmra.mrb[16].mxu1 %vm262_vm1, %v4419_v42  ;;  %6585 = vmatprep.mubr.msk.bf16.mxu0 %vm262_vm1, %v3131_v15  ;;  %v4589_v42 = vpack.c.bf16 %v5957_v11, %v5956_v6  ;;  %v4590_v15 = vpack.c.bf16 %v5959_v0, %v5958_v4 }
 0x1a4   : > { %6742 = vmatpush3.bf16.msra.mxu1 %v4619_v18  ;;  %6729 = vmatprep.mubr.msk.bf16.mxu1 %vm262_vm1, %v4420_v16  ;;  %v5960_v16 = vld [vmem:[%s7357_s15 + $0x140c] sm:$0xff]  ;;  %v5961_v18 = vld [vmem:[%s7357_s15 + $0x1414] sm:$0xff] }
 0x1a5   : > { %v4591_v19 = vpack.c.bf16 %v5961_v18, %v5960_v16  ;;  %6760 = vmatpush3.bf16.msra.mxu0 %v7233_v25 }
 0x1a6   : > { %6761 = vmatprep.subr.bf16.mxu0 %v7234_v29 }
 0x1a9   : > { %6762 = vmatpush3.bf16.msra.mxu0 %v7234_v29 }
 0x1aa   : > { %6586 = vmatmul.mubr.msk.bf16.gmra.mrb[36].mxu0 %vm262_vm1, %v3132_v63  ;;  %6763 = vmatprep.subr.bf16.mxu0 %v7235_v36 }
 0x1ab   : > { %6730 = vmatmul.mubr.msk.bf16.gmra.mrb[20].mxu1 %vm262_vm1, %v4421_v30  ;;  %6589 = vmatprep.mubr.msk.bf16.mxu0 %vm262_vm1, %v3133_v32 }
 0x1ac   : > { %6733 = vmatprep.mubr.msk.bf16.mxu1 %vm262_vm1, %v4422_v3 }
 0x1ad   : > { %6764 = vmatpush3.bf16.msra.mxu0 %v7235_v36 }
 0x1ae   : > { %6765 = vmatprep.subr.bf16.mxu0 %v7236_v40 }
 0x1b1   : > { %6766 = vmatpush3.bf16.msra.mxu0 %v7236_v40 }
 0x1b2   : > { %6590 = vmatmul.mubr.msk.bf16.gmra.mrb[40].mxu0 %vm262_vm1, %v3134_v10  ;;  %6767 = vmatprep.subr.bf16.mxu0 %v7237_v53 }
 0x1b3   : > { %6734 = vmatmul.mubr.msk.bf16.gmra.mrb[24].mxu1 %vm262_vm1, %v4423_v62  ;;  %6593 = vmatprep.mubr.msk.bf16.mxu0 %vm262_vm1, %v3135_v21 }
 0x1b4   : > { %6737 = vmatprep.mubr.msk.bf16.mxu1 %vm262_vm1, %v4424_v22 }
 0x1b5   : > { %6768 = vmatpush3.bf16.msra.mxu0 %v7237_v53 }
 0x1b6   : > { %6769 = vmatprep.subr.bf16.mxu0 %v7238_v52 }
 0x1b9   : > { %6770 = vmatpush3.bf16.msra.mxu0 %v7238_v52 }
 0x1ba   : > { %6594 = vmatmul.mubr.msk.bf16.gmra.mrb[44].mxu0 %vm262_vm1, %v3136_v24  ;;  %6771 = vmatprep.subr.bf16.mxu0 %v7239_v5 }
 0x1bb   : > { %6738 = vmatmul.mubr.msk.bf16.gmra.mrb[28].mxu1 %vm262_vm1, %v4425_v55 }
 0x1bc   : > { %6743 = vmatprep.mubr.msk.bf16.mxu1 %vm262_vm1, %v4584_v56 }
 0x1bd   : > { %6772 = vmatpush3.bf16.msra.mxu0 %v7239_v5 }
 0x1c3   : > { %6744 = vmatmul.mubr.msk.bf16.vlgmr.msra.gmra.mrb[16].mxu1 %vm262_vm1, %v4585_v23 }
 0x1c4   : > { %6747 = vmatprep.mubr.msk.bf16.mxu1 %vm262_vm1, %v4586_v60 }
 0x1cb   : > { %6748 = vmatmul.mubr.msk.bf16.gmra.mrb[20].mxu1 %vm262_vm1, %v4587_v8 }
 0x1cc   : > { %6751 = vmatprep.mubr.msk.bf16.mxu1 %vm262_vm1, %v4588_v41 }
 0x1d3   : > { %6752 = vmatmul.mubr.msk.bf16.gmra.mrb[24].mxu1 %vm262_vm1, %v4589_v42  ;;  %v7240_v42 = vld [vmem:[%s8543_s3 + $0x38] sm:$0xff]  }
 0x1d4   : > { %6755 = vmatprep.mubr.msk.bf16.mxu1 %vm262_vm1, %v4590_v15  ;;  %6773 = vmatprep.subr.bf16.mxu0 %v7240_v42 }
 0x1d5   : > { %6774 = vmatpush3.bf16.msra.mxu0 %v7240_v42 }
 0x1db   : > { %6756 = vmatmul.mubr.msk.bf16.gmra.mrb[28].mxu1 %vm262_vm1, %v4591_v19 }
 0x275   : > { %v6583_v12 = vpop.f32.mrb[32].mxu0 }
 0x276   : > { %v3285_v58 = vadd.f32 %v6583_v12, %v8330_v28  ;;  %v3200_v63 = vpop.f32.mrb[33].mxu0 }
 0x277   : > { %v3283_v30 = vadd.f32 %v8330_v28, %v3200_v63  ;;  %v6584_v32 = vpop.f32.mrb[34].mxu0  ;;  %v4736_v63 = vsub.s32 3, %v7797_v50 }
 0x278   : > { %v3286_v3 = vadd.f32 %v6584_v32, %v8330_v28  ;;  %v3203_v34 = vpop.f32.mrb[35].mxu0  ;;  %v3301_v37 = vmax.f32 %v3285_v58, 0.0 }
 0x279   : > { %v3284_v31 = vadd.f32 %v8330_v28, %v3203_v34  ;;  %v3299_v46 = vmax.f32 %v3283_v30, 0.0  ;;  %v8375_v36 = vrot.slane %v8327_v27, %v4736_v63 }
 0x27a   : > { %v3302_v38 = vmax.f32 %v3286_v3, 0.0 }
 0x27b   : > { %v3300_v9 = vmax.f32 %v3284_v31, 0.0 }
 0x27c   : > { %v4787_v10 = vpack.c.bf16 %v3302_v38, %v3301_v37 }
 0x27d   : > { %v4786_v62 = vpack.c.bf16 %v3300_v9, %v3299_v46  ;;  %v6587_v21 = vpop.f32.mrb[36].mxu0 }
 0x27e   : > { %v3289_v22 = vadd.f32 %v6587_v21, %v8330_v28  ;;  %v3216_v51 = vpop.f32.mrb[37].mxu0  ;;  %4836 = vrot.lane.b32.xlu1 %v4787_v10, %s7267_s9 }
 0x27f   : > { %v3287_v45 = vadd.f32 %v8330_v28, %v3216_v51  ;;  %v6588_v26 = vpop.f32.mrb[38].mxu0 }
 0x280   : > { %v3290_v14 = vadd.f32 %v6588_v26, %v8330_v28  ;;  %v3219_v47 = vpop.f32.mrb[39].mxu0  ;;  %v3305_v55 = vmax.f32 %v3289_v22, 0.0 }
 0x281   : > { %v3288_v24 = vadd.f32 %v8330_v28, %v3219_v47  ;;  %v3303_v57 = vmax.f32 %v3287_v45, 0.0 }
 0x282   : > { %v3306_v56 = vmax.f32 %v3290_v14, 0.0  ;;  %4834 = vrot.lane.b32.xlu1 %v4786_v62, %s7267_s9 }
 0x283   : > { %v3304_v59 = vmax.f32 %v3288_v24, 0.0 }
 0x284   : > { %v4789_v54 = vpack.c.bf16 %v3306_v56, %v3305_v55 }
 0x285   : > { %v4788_v23 = vpack.c.bf16 %v3304_v59, %v3303_v57  ;;  %v6591_v60 = vpop.f32.mrb[40].mxu0 }
 0x286   : > { %v3293_v2 = vadd.f32 %v6591_v60, %v8330_v28  ;;  %v3232_v1 = vpop.f32.mrb[41].mxu0  ;;  %4840 = vrot.lane.b32.xlu1 %v4789_v54, %s7267_s9 }
 0x287   : > { %v3291_v61 = vadd.f32 %v8330_v28, %v3232_v1  ;;  %v6592_v8 = vpop.f32.mrb[42].mxu0  ;;  %4838 = vrot.lane.b32.xlu0 %v4788_v23, %s7267_s9 }
 0x288   : > { %v3294_v41 = vadd.f32 %v6592_v8, %v8330_v28  ;;  %v3235_v6 = vpop.f32.mrb[43].mxu0  ;;  %v3309_v4 = vmax.f32 %v3293_v2, 0.0 }
 0x289   : > { %v3292_v11 = vadd.f32 %v8330_v28, %v3235_v6  ;;  %v3307_v15 = vmax.f32 %v3291_v61, 0.0 }
 0x28a   : > { %v3310_v0 = vmax.f32 %v3294_v41, 0.0 }
 0x28b   : > { %v3308_v16 = vmax.f32 %v3292_v11, 0.0 }
 0x28c   : > { %v4791_v18 = vpack.c.bf16 %v3310_v0, %v3309_v4 }
 0x28d   : > { %v4790_v19 = vpack.c.bf16 %v3308_v16, %v3307_v15  ;;  %v6595_v49 = vpop.f32.mrb[44].mxu0 }
 0x28e   : > { %v3297_v25 = vadd.f32 %v6595_v49, %v8330_v28  ;;  %v3248_v12 = vpop.f32.mrb[45].mxu0 }
 0x28f   : > { %v3295_v29 = vadd.f32 %v8330_v28, %v3248_v12  ;;  %v6596_v58 = vpop.f32.mrb[46].mxu0 }
 0x290   : > { %v3298_v30 = vadd.f32 %v6596_v58, %v8330_v28  ;;  %v3251_v32 = vpop.f32.mrb[47].mxu0  ;;  %v3313_v34 = vmax.f32 %v3297_v25, 0.0 }
 0x291   : > { %v3296_v3 = vadd.f32 %v8330_v28, %v3251_v32  ;;  %v3311_v37 = vmax.f32 %v3295_v29, 0.0 }
 0x292   : > { %v3314_v31 = vmax.f32 %v3298_v30, 0.0 }
 0x293   : > { %v3312_v38 = vmax.f32 %v3296_v3, 0.0 }
 0x294   : > { %v8377_v40 = vpack.c.bf16 %v3314_v31, %v3313_v34 }
 0x295   : > { %v8379_v46 = vpack.c.bf16 %v3312_v38, %v3311_v37 }
 0x296   : > { %v6745_v9 = vpop.f32.mrb[16].mxu1 }
 0x297   : > { %v4740_v10 = vadd.f32 %v6745_v9, %v8375_v36  ;;  %v4655_v62 = vpop.f32.mrb[17].mxu1 }
 0x298   : > { %v4738_v21 = vadd.f32 %v8375_v36, %v4655_v62  ;;  %v6746_v22 = vpop.f32.mrb[18].mxu1 }
 0x299   : > { %v4741_v28 = vadd.f32 %v6746_v22, %v8375_v36  ;;  %v4658_v51 = vpop.f32.mrb[19].mxu1  ;;  %v4756_v45 = vmax.f32 %v4740_v10, 0.0 }
 0x29a   : > { %v4739_v53 = vadd.f32 %v8375_v36, %v4658_v51  ;;  %v4754_v14 = vmax.f32 %v4738_v21, 0.0  ;;  %v4813_v51 = vpop.permute.xlu0 %4812 }
 0x29b   : > { %v4757_v26 = vmax.f32 %v4741_v28, 0.0  ;;  %v4817_v28 = vpop.permute.xlu1 %4816 }
 0x29c   : > { %v4755_v47 = vmax.f32 %v4739_v53, 0.0 }
 0x29d   : > { %v4795_v24 = vpack.c.bf16 %v4757_v26, %v4756_v45 }
 0x29e   : > { %v4794_v55 = vpack.c.bf16 %v4755_v47, %v4754_v14  ;;  %v6749_v56 = vpop.f32.mrb[20].mxu1 }
 0x29f   : > { %v4744_v52 = vadd.f32 %v6749_v56, %v8375_v36  ;;  %v4671_v57 = vpop.f32.mrb[21].mxu1  ;;  %4860 = vrot.lane.b32.xlu1 %v4795_v24, %s7268_s20  ;;  %v4821_v53 = vpop.permute.xlu1 %4820  ;;  %v4880_v56 = vsel %vm4874_vm2, %v7861_v39, %v4813_v51  ;;  %v4886_v39 = vsel %vm4874_vm2, %v7881_v7, %v4817_v28 }
 0x2a0   : > { %v4742_v59 = vadd.f32 %v8375_v36, %v4671_v57  ;;  %v6750_v54 = vpop.f32.mrb[22].mxu1  ;;  %4858 = vrot.lane.b32.xlu0 %v4794_v55, %s7268_s20  ;;  %v4892_v7 = vsel %vm4874_vm2, %v7901_v43, %v4821_v53 }
 0x2a1   : > { %v4745_v23 = vadd.f32 %v6750_v54, %v8375_v36  ;;  %v4674_v60 = vpop.f32.mrb[23].mxu1  ;;  %v4760_v1 = vmax.f32 %v4744_v52, 0.0 }
 0x2a2   : > { %v4743_v2 = vadd.f32 %v8375_v36, %v4674_v60  ;;  %v4758_v61 = vmax.f32 %v4742_v59, 0.0 }
 0x2a3   : > { %v4761_v5 = vmax.f32 %v4745_v23, 0.0  ;;  %4844 = vrot.lane.b32.xlu1 %v4791_v18, %s7267_s9 }
 0x2a4   : > { %v4759_v8 = vmax.f32 %v4743_v2, 0.0  ;;  %4842 = vrot.lane.b32.xlu0 %v4790_v19, %s7267_s9 }
 0x2a5   : > { %v4797_v41 = vpack.c.bf16 %v4761_v5, %v4760_v1 }
 0x2a6   : > { %v4796_v6 = vpack.c.bf16 %v4759_v8, %v4758_v61  ;;  %v6753_v11 = vpop.f32.mrb[24].mxu1 }
 0x2a7   : > { %v4748_v4 = vadd.f32 %v6753_v11, %v8375_v36  ;;  %v4687_v0 = vpop.f32.mrb[25].mxu1  ;;  %4864 = vrot.lane.b32.xlu1 %v4797_v41, %s7268_s20 }
 0x2a8   : > { %v4746_v42 = vadd.f32 %v8375_v36, %v4687_v0  ;;  %v6754_v15 = vpop.f32.mrb[26].mxu1  ;;  %4862 = vrot.lane.b32.xlu0 %v4796_v6, %s7268_s20 }
 0x2a9   : > { %v4749_v16 = vadd.f32 %v6754_v15, %v8375_v36  ;;  %v4690_v18 = vpop.f32.mrb[27].mxu1  ;;  %v4764_v25 = vmax.f32 %v4748_v4, 0.0 }
 0x2aa   : > { %v4747_v49 = vadd.f32 %v8375_v36, %v4690_v18  ;;  %v4762_v12 = vmax.f32 %v4746_v42, 0.0 }
 0x2ab   : > { %v4765_v19 = vmax.f32 %v4749_v16, 0.0  ;;  %4824 = vrot.lane.b32.xlu1 %v8244_v33, %s7266_s14 }
 0x2ac   : > { %v4763_v29 = vmax.f32 %v4747_v49, 0.0  ;;  %4822 = vrot.lane.b32.xlu0 %v8246_v35, %s7266_s14  ;;  %s223_s14 = sand.u32 1, %s7256_s21  }
 0x2ad   : > { %v4799_v58 = vpack.c.bf16 %v4765_v19, %v4764_v25  ;;  %s5354_s26 = sshll.u32 %s223_s14, 7 }
 0x2ae   : > { %v4798_v63 = vpack.c.bf16 %v4763_v29, %v4762_v12  ;;  %v6757_v30 = vpop.f32.mrb[28].mxu1  ;;  %s8459_s21 = scalar_lea.vmem [#allocation2], %s5354_s26 }
 0x2af   : > { %v4752_v32 = vadd.f32 %v6757_v30, %v8375_v36  ;;  %v4703_v3 = vpop.f32.mrb[29].mxu1  ;;  %4868 = vrot.lane.b32.xlu1 %v4799_v58, %s7268_s20 }
 0x2b0   : > { %v4750_v34 = vadd.f32 %v8375_v36, %v4703_v3  ;;  %v6758_v31 = vpop.f32.mrb[30].mxu1  ;;  %4866 = vrot.lane.b32.xlu0 %v4798_v63, %s7268_s20  ;;  %v5134_v3 = vsub.s32 4, %v7797_v50 }
 0x2b1   : > { %v4753_v33 = vadd.f32 %v6758_v31, %v8375_v36  ;;  %v4706_v37 = vpop.f32.mrb[31].mxu1  ;;  %v4768_v9 = vmax.f32 %v4752_v32, 0.0 }
 0x2b2   : > { %v4751_v38 = vadd.f32 %v8375_v36, %v4706_v37  ;;  %v4766_v10 = vmax.f32 %v4750_v34, 0.0  ;;  %v4811_v36 = vpop.permute.xlu0 %4810 }
 0x2b3   : > { %v4769_v35 = vmax.f32 %v4753_v33, 0.0  ;;  %4848 = vrot.lane.b32.xlu1 %v8377_v40, %s7267_s9 }
 0x2b4   : > { %v4767_v62 = vmax.f32 %v4751_v38, 0.0  ;;  %4846 = vrot.lane.b32.xlu0 %v8379_v46, %s7267_s9  ;;  %v4877_v46 = vsel %vm4874_vm2, %v7865_v44, %v4811_v36 }
 0x2b5   : > { %v4801_v21 = vpack.c.bf16 %v4769_v35, %v4768_v9 }
 0x2b6   : > { %v4800_v22 = vpack.c.bf16 %v4767_v62, %v4766_v10  ;;  %v4815_v26 = vpop.permute.xlu0 %4814 }
 0x2b7   : > { %4872 = vrot.lane.b32.xlu1 %v4801_v21, %s7268_s20  ;;  %v4883_v44 = vsel %vm4874_vm2, %v7885_v13, %v4815_v26 }
 0x2b8   : > { %4870 = vrot.lane.b32.xlu0 %v4800_v22, %s7268_s20 }
 0x2ba   : > { %v4819_v47 = vpop.permute.xlu0 %4818 }
 0x2bb   : > { %v4889_v13 = vsel %vm4874_vm2, %v7905_v48, %v4819_v47 }
 0x2f0   : > { %v4837_v45 = vpop.permute.xlu1 %4836 }
 0x2f1   : > { %v4903_v59 = vsel %vm4899_vm3, %v4880_v56, %v4837_v45 }
 0x2f4   : > { %v4835_v14 = vpop.permute.xlu1 %4834 }
 0x2f5   : > { %v4901_v52 = vsel %vm4899_vm3, %v4877_v46, %v4835_v14 }
 0x2f8   : > { %v4841_v40 = vpop.permute.xlu1 %4840 }
 0x2f9   : > { %v4839_v24 = vpop.permute.xlu0 %4838  ;;  %v4907_v8 = vsel %vm4899_vm3, %v4886_v39, %v4841_v40 }
 0x2fa   : > { %v4905_v5 = vsel %vm4899_vm3, %v4883_v44, %v4839_v24 }
 0x311   : > { %v4861_v55 = vpop.permute.xlu1 %4860 }
 0x312   : > { %v4859_v57 = vpop.permute.xlu0 %4858  ;;  %v4921_v23 = vsel %vm4916_vm4, %v4903_v59, %v4861_v55 }
 0x313   : > { %v4918_v54 = vsel %vm4916_vm4, %v4901_v52, %v4859_v57 }
 0x314   : > { %6775 = vmatprep.mubr.bf16.mxu0 %v4918_v54 }
 0x315   : > { %v4845_v60 = vpop.permute.xlu1 %4844  ;;  %6776 = vmatmul.mubr.bf16.vlgmr.msra.gmra.mrb[48].mxu0 %v4921_v23  ;;  %v5980_v23 = vld [vmem:[%s8544_s4 + $0x1] ss:$0 sm:$0xff] }
 0x316   : > { %v4843_v2 = vpop.permute.xlu0 %4842  ;;  %v4911_v16 = vsel %vm4899_vm3, %v4892_v7, %v4845_v60 }
 0x317   : > { %v4909_v42 = vsel %vm4899_vm3, %v4889_v13, %v4843_v2 }
 0x319   : > { %v4865_v1 = vpop.permute.xlu1 %4864 }
 0x31a   : > { %v4863_v61 = vpop.permute.xlu0 %4862  ;;  %v4927_v6 = vsel %vm4916_vm4, %v4907_v8, %v4865_v1 }
 0x31b   : > { %v4924_v41 = vsel %vm4916_vm4, %v4905_v5, %v4863_v61 }
 0x31c   : > { %6779 = vmatprep.mubr.bf16.mxu0 %v4924_v41 }
 0x31d   : > { %v4825_v11 = vpop.permute.xlu1 %4824  ;;  %6780 = vmatmul.mubr.bf16.gmra.mrb[52].mxu0 %v4927_v6 }
 0x31e   : > { %v4823_v4 = vpop.permute.xlu0 %4822  ;;  %v4898_v43 = vsel %vm4874_vm2, %v7931_v17, %v4825_v11  ;;  %v8453_v17 = vrot.slane %v8327_v27, %v5134_v3 }
 0x31f   : > { %v4895_v48 = vsel %vm4874_vm2, %v7935_v20, %v4823_v4  ;;  %v5979_v20 = vld [vmem:[%s8544_s4] ss:$0 sm:$0xff] }
 0x321   : > { %v4869_v0 = vpop.permute.xlu1 %4868 }
 0x322   : > { %v4867_v15 = vpop.permute.xlu0 %4866  ;;  %v4933_v49 = vsel %vm4916_vm4, %v4911_v16, %v4869_v0 }
 0x323   : > { %v4930_v18 = vsel %vm4916_vm4, %v4909_v42, %v4867_v15 }
 0x324   : > { %6783 = vmatprep.mubr.bf16.mxu0 %v4930_v18 }
 0x325   : > { %v4849_v25 = vpop.permute.xlu1 %4848  ;;  %6784 = vmatmul.mubr.bf16.gmra.mrb[56].mxu0 %v4933_v49 }
 0x326   : > { %v4847_v19 = vpop.permute.xlu0 %4846  ;;  %v4915_v63 = vsel %vm4899_vm3, %v4898_v43, %v4849_v25 }
 0x327   : > { %v4913_v29 = vsel %vm4899_vm3, %v4895_v48, %v4847_v19 }
 0x329   : > { %v4873_v12 = vpop.permute.xlu1 %4872 }
 0x32a   : > { %v4871_v58 = vpop.permute.xlu0 %4870  ;;  %v4939_v32 = vsel %vm4916_vm4, %v4915_v63, %v4873_v12 }
 0x32b   : > { %v4936_v30 = vsel %vm4916_vm4, %v4913_v29, %v4871_v58 }
 0x32c   : > { %6787 = vmatprep.mubr.bf16.mxu0 %v4936_v30 }
 0x32d   : > { %6788 = vmatmul.mubr.bf16.gmra.mrb[60].mxu0 %v4939_v32 }
 0x3e8   : > { %v6777_v34 = vpop.f32.mrb[48].mxu0 }
 0x3e9   : > { %v5118_v31 = vadd.f32 %v6777_v34, %v5979_v20  ;;  %v5039_v33 = vpop.f32.mrb[49].mxu0 }
 0x3ea   : > { %v5116_v37 = vadd.f32 %v5979_v20, %v5039_v33  ;;  %v6778_v38 = vpop.f32.mrb[50].mxu0 }
 0x3eb   : > { %v5138_v9 = vadd.f32 %v8453_v17, %v5118_v31  ;;  %v5119_v35 = vadd.f32 %v6778_v38, %v5979_v20  ;;  %v5042_v10 = vpop.f32.mrb[51].mxu0 }
 0x3ec   : > { %v5136_v50 = vadd.f32 %v8453_v17, %v5116_v37  ;;  %v5117_v62 = vadd.f32 %v5979_v20, %v5042_v10 }
 0x3ed   : > { %v5154_v21 = vmax.f32 %v5138_v9, 0.0  ;;  %v5139_v22 = vadd.f32 %v8453_v17, %v5119_v35 }
 0x3ee   : > { %v5152_v28 = vmax.f32 %v5136_v50, 0.0  ;;  %v5137_v27 = vadd.f32 %v8453_v17, %v5117_v62 }
 0x3ef   : > { %5170 = vst.msk [vmem:[%s8459_s21 + $0x10] sm:$0xff] %vm4874_vm2, %v5154_v21  ;;  %v5155_v51 = vmax.f32 %v5139_v22, 0.0 }
 0x3f0   : > { %5168 = vst.msk [vmem:[%s8459_s21] sm:$0xff] %vm4874_vm2, %v5152_v28  ;;  %v5153_v53 = vmax.f32 %v5137_v27, 0.0  ;;  %v6781_v36 = vpop.f32.mrb[52].mxu0 }
 0x3f1   : > { %5171 = vst.msk [vmem:[%s8459_s21 + $0x18] sm:$0xff] %vm4874_vm2, %v5155_v51  ;;  %v5122_v45 = vadd.f32 %v6781_v36, %v5979_v20  ;;  %v5055_v26 = vpop.f32.mrb[53].mxu0 }
 0x3f2   : > { %5169 = vst.msk [vmem:[%s8459_s21 + $0x8] sm:$0xff] %vm4874_vm2, %v5153_v53  ;;  %v5120_v14 = vadd.f32 %v5979_v20, %v5055_v26  ;;  %v6782_v47 = vpop.f32.mrb[54].mxu0 }
 0x3f3   : > { %v5142_v40 = vadd.f32 %v8453_v17, %v5122_v45  ;;  %v5123_v24 = vadd.f32 %v6782_v47, %v5979_v20  ;;  %v5058_v46 = vpop.f32.mrb[55].mxu0 }
 0x3f4   : > { %v5140_v55 = vadd.f32 %v8453_v17, %v5120_v14  ;;  %v5121_v56 = vadd.f32 %v5979_v20, %v5058_v46 }
 0x3f5   : > { %v5158_v52 = vmax.f32 %v5142_v40, 0.0  ;;  %v5143_v57 = vadd.f32 %v8453_v17, %v5123_v24 }
 0x3f6   : > { %v5156_v59 = vmax.f32 %v5140_v55, 0.0  ;;  %v5141_v54 = vadd.f32 %v8453_v17, %v5121_v56  ;;  %v5255_v37 = vld [vmem:[%s8459_s21 + $0x10] sm:$0xff] (%p7329_p4) }
 0x3f7   : > { %5174 = vst.msk [vmem:[%s8459_s21 + $0x30] sm:$0xff] %vm4874_vm2, %v5158_v52  ;;  %v5159_v60 = vmax.f32 %v5143_v57, 0.0  ;;  %5256 = vst [vmem:[%s5193_s10 + $0x10] sm:$0xff] (%p7329_p4), %v5255_v37 }
 0x3f8   : > { %5172 = vst.msk [vmem:[%s8459_s21 + $0x20] sm:$0xff] %vm4874_vm2, %v5156_v59  ;;  %v5157_v2 = vmax.f32 %v5141_v54, 0.0  ;;  %v6785_v44 = vpop.f32.mrb[56].mxu0  ;;  %v5257_v38 = vld [vmem:[%s8459_s21 + $0x18] sm:$0xff] (%p7329_p4) }
 0x3f9   : > { %5175 = vst.msk [vmem:[%s8459_s21 + $0x38] sm:$0xff] %vm4874_vm2, %v5159_v60  ;;  %v5126_v1 = vadd.f32 %v6785_v44, %v5980_v23  ;;  %v5071_v39 = vpop.f32.mrb[57].mxu0  ;;  %v5253_v33 = vld [vmem:[%s8459_s21 + $0x8] sm:$0xff] (%p7329_p4)  ;;  %5258 = vst [vmem:[%s5193_s10 + $0x18] sm:$0xff] (%p7329_p4), %v5257_v38 }
 0x3fa   : > { %5173 = vst.msk [vmem:[%s8459_s21 + $0x28] sm:$0xff] %vm4874_vm2, %v5157_v2  ;;  %v5124_v5 = vadd.f32 %v5980_v23, %v5071_v39  ;;  %v6786_v61 = vpop.f32.mrb[58].mxu0  ;;  %5254 = vst [vmem:[%s5193_s10 + $0x8] sm:$0xff] (%p7329_p4), %v5253_v33 }
 0x3fb   : > { %v5146_v8 = vadd.f32 %v8453_v17, %v5126_v1  ;;  %v5127_v41 = vadd.f32 %v6786_v61, %v5980_v23  ;;  %v5074_v6 = vpop.f32.mrb[59].mxu0 }
 0x3fc   : > { %v5144_v11 = vadd.f32 %v8453_v17, %v5124_v5  ;;  %v5125_v4 = vadd.f32 %v5980_v23, %v5074_v6 }
 0x3fd   : > { %v5162_v13 = vmax.f32 %v5146_v8, 0.0  ;;  %v5147_v0 = vadd.f32 %v8453_v17, %v5127_v41 }
 0x3fe   : > { %v5160_v7 = vmax.f32 %v5144_v11, 0.0  ;;  %v5145_v42 = vadd.f32 %v8453_v17, %v5125_v4  ;;  %v5263_v10 = vld [vmem:[%s8459_s21 + $0x30] sm:$0xff] (%p7329_p4) }
 0x3ff   : > { %5178 = vst.msk [vmem:[%s8459_s21 + $0x50] sm:$0xff] %vm4874_vm2, %v5162_v13  ;;  %v5163_v15 = vmax.f32 %v5147_v0, 0.0  ;;  %v5259_v9 = vld [vmem:[%s8459_s21 + $0x20] sm:$0xff] (%p7329_p4)  ;;  %5264 = vst [vmem:[%s5193_s10 + $0x30] sm:$0xff] (%p7329_p4), %v5263_v10 }
 0x400   : > { %5176 = vst.msk [vmem:[%s8459_s21 + $0x40] sm:$0xff] %vm4874_vm2, %v5160_v7  ;;  %v5161_v16 = vmax.f32 %v5145_v42, 0.0  ;;  %v6789_v18 = vpop.f32.mrb[60].mxu0  ;;  %5260 = vst [vmem:[%s5193_s10 + $0x20] sm:$0xff] (%p7329_p4), %v5259_v9  ;;  %v5265_v50 = vld [vmem:[%s8459_s21 + $0x38] sm:$0xff] (%p7329_p4) }
 0x401   : > { %5179 = vst.msk [vmem:[%s8459_s21 + $0x58] sm:$0xff] %vm4874_vm2, %v5163_v15  ;;  %v5130_v49 = vadd.f32 %v6789_v18, %v5980_v23  ;;  %v5087_v25 = vpop.f32.mrb[61].mxu0  ;;  %v5261_v35 = vld [vmem:[%s8459_s21 + $0x28] sm:$0xff] (%p7329_p4)  ;;  %5266 = vst [vmem:[%s5193_s10 + $0x38] sm:$0xff] (%p7329_p4), %v5265_v50 }
 0x402   : > { %5177 = vst.msk [vmem:[%s8459_s21 + $0x48] sm:$0xff] %vm4874_vm2, %v5161_v16  ;;  %v5128_v19 = vadd.f32 %v5980_v23, %v5087_v25  ;;  %v6790_v48 = vpop.f32.mrb[62].mxu0  ;;  %5262 = vst [vmem:[%s5193_s10 + $0x28] sm:$0xff] (%p7329_p4), %v5261_v35 }
 0x403   : > { %v5150_v12 = vadd.f32 %v8453_v17, %v5130_v49  ;;  %v5131_v43 = vadd.f32 %v6790_v48, %v5980_v23  ;;  %v5090_v29 = vpop.f32.mrb[63].mxu0 }
 0x404   : > { %v5148_v58 = vadd.f32 %v8453_v17, %v5128_v19  ;;  %v5129_v63 = vadd.f32 %v5980_v23, %v5090_v29  ;;  %5190 = sbr.rel (!%p7329_p4) target bundleno = 1043 (0x413), region = 48 }
 0x405   : > { %v5166_v30 = vmax.f32 %v5150_v12, 0.0  ;;  %v5151_v32 = vadd.f32 %v8453_v17, %v5131_v43 }
 0x406   : > { %v5164_v3 = vmax.f32 %v5148_v58, 0.0  ;;  %v5149_v20 = vadd.f32 %v8453_v17, %v5129_v63  ;;  %v5251_v17 = vld [vmem:[%s8459_s21] sm:$0xff] (%p7329_p4)  ;;  %v5271_v22 = vld [vmem:[%s8459_s21 + $0x50] sm:$0xff] (%p7329_p4) }
 0x407   : > { %5182 = vst.msk [vmem:[%s8459_s21 + $0x70] sm:$0xff] %vm4874_vm2, %v5166_v30  ;;  %v5167_v34 = vmax.f32 %v5151_v32, 0.0  ;;  %5252 = vst [vmem:[%s5193_s10] sm:$0xff] (%p7329_p4), %v5251_v17  ;;  %v5267_v62 = vld [vmem:[%s8459_s21 + $0x40] sm:$0xff] (%p7329_p4) }
 0x408   : > { %5180 = vst.msk [vmem:[%s8459_s21 + $0x60] sm:$0xff] %vm4874_vm2, %v5164_v3  ;;  %v5165_v31 = vmax.f32 %v5149_v20, 0.0  ;;  %5268 = vst [vmem:[%s5193_s10 + $0x100] sm:$0xff] (%p7329_p4), %v5267_v62  ;;  %v5273_v28 = vld [vmem:[%s8459_s21 + $0x58] sm:$0xff] (%p7329_p4) }
 0x409   : > { %5183 = vst.msk [vmem:[%s8459_s21 + $0x78] sm:$0xff] %vm4874_vm2, %v5167_v34  ;;  %v5269_v21 = vld [vmem:[%s8459_s21 + $0x48] sm:$0xff] (%p7329_p4)  ;;  %5272 = vst [vmem:[%s5193_s10 + $0x110] sm:$0xff] (%p7329_p4), %v5271_v22 }
 0x40a   : > { %5181 = vst.msk [vmem:[%s8459_s21 + $0x68] sm:$0xff] %vm4874_vm2, %v5165_v31  ;;  %5270 = vst [vmem:[%s5193_s10 + $0x108] sm:$0xff] (%p7329_p4), %v5269_v21 }
 0x40b   : > { %5274 = vst [vmem:[%s5193_s10 + $0x118] sm:$0xff] %v5273_v28 }
 0x40e   : > { %v5279_v53 = vld [vmem:[%s8459_s21 + $0x70] sm:$0xff] }
 0x40f   : > { %v5275_v27 = vld [vmem:[%s8459_s21 + $0x60] sm:$0xff]  ;;  %5280 = vst [vmem:[%s5193_s10 + $0x130] sm:$0xff] %v5279_v53 }
 0x410   : > { %5276 = vst [vmem:[%s5193_s10 + $0x120] sm:$0xff] %v5275_v27  ;;  %v5281_v36 = vld [vmem:[%s8459_s21 + $0x78] sm:$0xff] }
 0x411   : > { %v5277_v51 = vld [vmem:[%s8459_s21 + $0x68] sm:$0xff]  ;;  %5282 = vst [vmem:[%s5193_s10 + $0x138] sm:$0xff] %v5281_v36 }
 0x412   : > { %5278 = vst [vmem:[%s5193_s10 + $0x128] sm:$0xff] %v5277_v51 }
 0x413 PF: > { %p13_p7 = scmp.ge.s32.totalorder %s7319_s25, 6   ;;  %s8548_s21 = smov %s7260_s22 }
 0x414   : > { %s8549_s22 = smov %s7327_s28  ;;  %s8550_s23 = smov %s7319_s25 }
 0x415   :  { %15 = sbr.rel (!%p13_p7) target bundleno = 2 (0x2), region = 142 }

</bundles_post_ra>
